<compile_context>
chip_gen: v6e
topology: v6e:2x2x1
jax: 0.10.0
libtpu: 0.0.40
codegen_flags: <defaults>
</compile_context>

<pallas_src>
import jax
import jax.numpy as jnp
import numpy as np
from jax import lax
from jax.experimental import pallas as pl
from jax.experimental.pallas import tpu as pltpu

# ---- model hyper-parameters (match the PyTorch module defaults) --------------------
NUM_FEATURES   = 8
NUM_CLASSES    = 4
NUM_GAT_LAYERS = 6
GAT_DIM        = 16                  # per-head output dim
HEADS          = 4
HID            = GAT_DIM * HEADS     # 64 (concat=True)
FC1_DIM        = 2 * GAT_DIM         # 32

# ---- kernel-side layout / padding sizes --------------------------------------------
N_NODES  = 16                        # nodes per graph mini-batch
N_GRAPHS = 2                         # graphs per mini-batch (global_max_pool rows)
B_PAD    = 8                         # pooled rows padded to a full sublane tile
F_PAD    = 128                       # num_features padded to a full lane tile
FC1_PAD  = 128                       # fc1 hidden padded to a full lane tile
C_PAD    = 128                       # num_classes padded to a full lane tile

ATT_SLOPE = 0.2                      # GATConv attention leaky_relu slope
NEG_BIG   = -1e30


# =====================================================================================
# Pallas kernel: full forward for one graph mini-batch per grid step
# =====================================================================================
def ti_gat_kernel(adj_ref, x_ref, poolT_ref,
                  w_in_ref, adst_in_ref, asrcT_in_ref, b_in_ref,
                  w_stk_ref, adst_stk_ref, asrcT_stk_ref, b_stk_ref,
                  wfc1_ref, bfc1_ref, wfc2_ref, bfc2_ref,
                  out_ref):
    # adj[i, j] != 0  <=>  edge j -> i exists or i == j (self loops added)
    adj_pos = adj_ref[...] > 0.0                                           # [N, N] bool

    def gat_layer(h_bf16, w, a_dst, a_srcT, bias):
        # h_bf16 [N, in] bf16, w [in, HID] bf16, a_dst [HID, H] bf16,
        # a_srcT [H, HID] bf16, bias [1, HID] f32
        z = jnp.dot(h_bf16, w, preferred_element_type=jnp.float32)         # [N, HID] f32
        zb = z.astype(jnp.bfloat16)
        alpha_dst = jnp.dot(zb, a_dst, preferred_element_type=jnp.float32)   # [N, H]
        # source scores produced already transposed ([H, N]) via a trans-B matmul
        alpha_srcT = lax.dot_general(a_srcT, zb, (((1,), (1,)), ((), ())),
                                     preferred_element_type=jnp.float32)     # [H, N]
        head_outs = []
        for h in range(HEADS):
            s = alpha_dst[:, h:h + 1] + alpha_srcT[h:h + 1, :]             # [N, N]
            s = jnp.where(s > 0, s, ATT_SLOPE * s)                         # leaky_relu(., 0.2)
            s = jnp.where(adj_pos, s, NEG_BIG)                             # mask non-edges
            s = s - jnp.max(s, axis=-1, keepdims=True)
            p = jnp.where(adj_pos, jnp.exp(s), 0.0)
            att = p / jnp.sum(p, axis=-1, keepdims=True)                   # masked softmax
            z_h = zb[:, h * GAT_DIM:(h + 1) * GAT_DIM]                     # [N, D] bf16
            head_outs.append(jnp.dot(att.astype(jnp.bfloat16), z_h,
                                     preferred_element_type=jnp.float32))  # [N, D] f32
        out = jnp.concatenate(head_outs, axis=-1) + bias                   # [N, HID]
        out = jnp.maximum(out, 0.0)                                        # F.relu (module forward)
        return out.astype(jnp.bfloat16)

    # input_conv + 5 stacked GATConv layers
    h = gat_layer(x_ref[...], w_in_ref[...], adst_in_ref[...],
                  asrcT_in_ref[...], b_in_ref[...])
    for i in range(NUM_GAT_LAYERS - 1):
        h = gat_layer(h, w_stk_ref[i], adst_stk_ref[i],
                      asrcT_stk_ref[i], b_stk_ref[i])

    # global_max_pool (padded graph rows come out as NEG_BIG and are sliced away outside)
    hf = h.astype(jnp.float32)                                             # [N, HID]
    poolT = poolT_ref[...]                                                 # [N, B_PAD]
    pooled_rows = []
    for b in range(B_PAD):
        node_in_b = poolT[:, b:b + 1] > 0.0                                # [N, 1]
        masked = jnp.where(node_in_b, hf, NEG_BIG)
        pooled_rows.append(jnp.max(masked, axis=0, keepdims=True))         # [1, HID]
    g = jnp.concatenate(pooled_rows, axis=0)                               # [B_PAD, HID]

    # fc1 + relu, fc2 (lane-dense padded widths; padding columns stay exactly zero)
    h3 = jnp.dot(g.astype(jnp.bfloat16), wfc1_ref[...],
                 preferred_element_type=jnp.float32) + bfc1_ref[...]       # [B_PAD, FC1_PAD]
    h3 = jnp.maximum(h3, 0.0)
    logits = jnp.dot(h3.astype(jnp.bfloat16), wfc2_ref[...],
                     preferred_element_type=jnp.float32) + bfc2_ref[...]   # [B_PAD, C_PAD]
    out_ref[...] = logits


def ti_gat_forward(adj_all, x_all, poolT_all,
                   w_in, adst_in, asrcT_in, b_in,
                   w_stk, adst_stk, asrcT_stk, b_stk,
                   wfc1, bfc1, wfc2, bfc2):
    G = adj_all.shape[0]

    def per_batch_spec(arr):
        nd = arr.ndim
        return pl.BlockSpec((None,) + tuple(arr.shape[1:]),
                            lambda g: (g,) + (0,) * (nd - 1))

    def shared_spec(arr):
        nd = arr.ndim
        return pl.BlockSpec(tuple(arr.shape), lambda g: (0,) * nd)

    args = (adj_all, x_all, poolT_all,
            w_in, adst_in, asrcT_in, b_in,
            w_stk, adst_stk, asrcT_stk, b_stk,
            wfc1, bfc1, wfc2, bfc2)
    in_specs = ([per_batch_spec(adj_all), per_batch_spec(x_all), per_batch_spec(poolT_all)]
                + [shared_spec(a) for a in args[3:]])

    # rough cost estimate (advisory only)
    flops_l1   = 2 * N_NODES * F_PAD * HID
    flops_lk   = 2 * N_NODES * HID * HID
    flops_attn = 4 * N_NODES * HID * HEADS + HEADS * 2 * N_NODES * N_NODES * GAT_DIM
    flops_fc   = 2 * B_PAD * HID * FC1_PAD + 2 * B_PAD * FC1_PAD * C_PAD
    flops = G * (flops_l1 + (NUM_GAT_LAYERS - 1) * flops_lk
                 + NUM_GAT_LAYERS * flops_attn + flops_fc)
    transcendentals = G * NUM_GAT_LAYERS * HEADS * N_NODES * N_NODES
    bytes_accessed = (sum(int(np.prod(a.shape)) * a.dtype.itemsize for a in args)
                      + G * B_PAD * C_PAD * 4)

    out = pl.pallas_call(
        ti_gat_kernel,
        grid=(G,),
        in_specs=in_specs,
        out_specs=pl.BlockSpec((None, B_PAD, C_PAD), lambda g: (g, 0, 0)),
        out_shape=jax.ShapeDtypeStruct((G, B_PAD, C_PAD), jnp.float32),
        compiler_params=pltpu.CompilerParams(dimension_semantics=("parallel",)),
        cost_estimate=pl.CostEstimate(flops=int(flops),
                                      transcendentals=int(transcendentals),
                                      bytes_accessed=int(bytes_accessed)),
    )(*args)
    # slice the lane-dense padded slab back to the real (graphs, classes) logits
    return out[:, :N_GRAPHS, :NUM_CLASSES]


# =====================================================================================
# Host-side glue: dense adjacency / pooling masks, padding, attention-matrix packing
# =====================================================================================
def ring_edges(base, n):
    es = []
    for i in range(n):
        j = (i + 1) % n
        es.append((base + i, base + j))
        es.append((base + j, base + i))
    return es


def build_adj_mask(edges, num_nodes):
    m = np.zeros((num_nodes, num_nodes), np.float32)
    for s, d in edges:
        m[d, s] = 1.0                         # message flows source -> target
    np.fill_diagonal(m, 1.0)                  # add_self_loops=True
    return jnp.asarray(m)


def build_poolT(batch_vec, num_graphs_padded):
    return (batch_vec[:, None] == jnp.arange(num_graphs_padded)[None, :]).astype(jnp.float32)


def pad2d(a, rows, cols):
    out = np.zeros((rows, cols), np.float32)
    a_np = np.asarray(a)
    out[:a_np.shape[0], :a_np.shape[1]] = a_np
    return jnp.asarray(out)


def att_to_dst_mat(att_dst):                  # [H, D] -> [HID, H]
    m = np.zeros((HID, HEADS), np.float32)
    for h in range(HEADS):
        m[h * GAT_DIM:(h + 1) * GAT_DIM, h] = np.asarray(att_dst[h])
    return jnp.asarray(m)


def att_to_srcT_mat(att_src):                 # [H, D] -> [H, HID]
    m = np.zeros((HEADS, HID), np.float32)
    for h in range(HEADS):
        m[h, h * GAT_DIM:(h + 1) * GAT_DIM] = np.asarray(att_src[h])
    return jnp.asarray(m)


# =====================================================================================
# Plain-JAX reference (unpadded, same bf16-operand / f32-accumulate casting)
# =====================================================================================
def reference_forward(adj, x, batch_vec, layer_params, wf1, bf1, wf2, bf2):
    def gat_layer(h, w, a_src, a_dst, bias):
        hb = h.astype(jnp.bfloat16)
        z = jnp.dot(hb, w.astype(jnp.bfloat16), preferred_element_type=jnp.float32)
        zb3 = z.astype(jnp.bfloat16).astype(jnp.float32).reshape(-1, HEADS, GAT_DIM)
        asrc = a_src.astype(jnp.bfloat16).astype(jnp.float32)
        adst = a_dst.astype(jnp.bfloat16).astype(jnp.float32)
        alpha_src = (zb3 * asrc[None]).sum(-1)                 # [N, H]
        alpha_dst = (zb3 * adst[None]).sum(-1)                 # [N, H]
        e = alpha_dst[:, None, :] + alpha_src[None, :, :]      # e[i, j, h]
        e = jnp.where(e > 0, e, ATT_SLOPE * e)
        m = (adj > 0)[:, :, None]
        e = jnp.where(m, e, NEG_BIG)
        e = e - jnp.max(e, axis=1, keepdims=True)
        p = jnp.where(m, jnp.exp(e), 0.0)
        att = p / jnp.sum(p, axis=1, keepdims=True)
        att = att.astype(jnp.bfloat16).astype(jnp.float32)
        out = jnp.einsum('ijh,jhd->ihd', att, zb3)
        out = out.reshape(-1, HEADS * GAT_DIM) + bias
        out = jnp.maximum(out, 0.0)                            # F.relu
        return out.astype(jnp.bfloat16).astype(jnp.float32)

    h = x
    for (w, a_src, a_dst, b) in layer_params:
        h = gat_layer(h, w, a_src, a_dst, b)

    pooled = []
    for b in range(N_GRAPHS):                                  # global_max_pool
        mask = (batch_vec == b)[:, None]
        pooled.append(jnp.max(jnp.where(mask, h, NEG_BIG), axis=0))
    g = jnp.stack(pooled, axis=0)                              # [B, HID]

    h3 = jnp.dot(g.astype(jnp.bfloat16), wf1.astype(jnp.bfloat16),
                 preferred_element_type=jnp.float32) + bf1
    h3 = jnp.maximum(h3, 0.0)
    return jnp.dot(h3.astype(jnp.bfloat16), wf2.astype(jnp.bfloat16),
                   preferred_element_type=jnp.float32) + bf2


# =====================================================================================
if __name__ == "__main__":
    keys = jax.random.split(jax.random.PRNGKey(0), 64)
    kit = iter(keys)

    def nk():
        return next(kit)

    def rand(shape, scale=0.1):
        return jax.random.normal(nk(), shape, jnp.float32) * scale

    # ---- two graph mini-batches (grid axis), each with 2 graphs / 16 nodes ----------
    G = 2
    graph_sizes = [(8, 8), (10, 6)]

    adjs, xs, poolTs, batch_vecs = [], [], [], []
    for sizes in graph_sizes:
        edges, bvec, base = [], [], 0
        for b, n in enumerate(sizes):
            edges += ring_edges(base, n)
            bvec += [b] * n
            base += n
        batch_vec = jnp.asarray(np.array(bvec, np.int32))
        adjs.append(build_adj_mask(edges, N_NODES))
        poolTs.append(build_poolT(batch_vec, B_PAD))
        batch_vecs.append(batch_vec)
        xs.append(jax.random.normal(nk(), (N_NODES, NUM_FEATURES), jnp.float32))

    # ---- synthetic deterministic parameters (shapes follow the module __init__) -----
    layer_params = []
    in_dim = NUM_FEATURES
    for _ in range(NUM_GAT_LAYERS):
        w = rand((in_dim, HID))
        a_src = rand((HEADS, GAT_DIM))
        a_dst = rand((HEADS, GAT_DIM))
        b = rand((HID,))
        layer_params.append((w, a_src, a_dst, b))
        in_dim = HID
    wf1, bf1 = rand((HID, FC1_DIM)), rand((FC1_DIM,))
    wf2, bf2 = rand((FC1_DIM, NUM_CLASSES)), rand((NUM_CLASSES,))

    # ---- pack / pad / cast kernel inputs (lane-dense, bf16 operands) ----------------
    adj_all = jnp.stack(adjs)                                              # [G, N, N] f32
    x_all = jnp.stack(xs)                                                  # [G, N, F] f32
    x_all_pad = jnp.zeros((G, N_NODES, F_PAD), jnp.float32)
    x_all_pad = x_all_pad.at[:, :, :NUM_FEATURES].set(x_all).astype(jnp.bfloat16)
    poolT_all = jnp.stack(poolTs)                                          # [G, N, B_PAD] f32

    w0, asrc0, adst0, b0 = layer_params[0]
    w_in = pad2d(w0, F_PAD, HID).astype(jnp.bfloat16)
    adst_in = att_to_dst_mat(adst0).astype(jnp.bfloat16)
    asrcT_in = att_to_srcT_mat(asrc0).astype(jnp.bfloat16)
    b_in = b0.reshape(1, HID).astype(jnp.float32)

    w_stk = jnp.stack([lp[0] for lp in layer_params[1:]]).astype(jnp.bfloat16)
    asrcT_stk = jnp.stack([att_to_srcT_mat(lp[1]) for lp in layer_params[1:]]).astype(jnp.bfloat16)
    adst_stk = jnp.stack([att_to_dst_mat(lp[2]) for lp in layer_params[1:]]).astype(jnp.bfloat16)
    b_stk = jnp.stack([lp[3].reshape(1, HID) for lp in layer_params[1:]]).astype(jnp.float32)

    wfc1 = pad2d(wf1, HID, FC1_PAD).astype(jnp.bfloat16)
    bfc1 = pad2d(bf1.reshape(1, -1), 1, FC1_PAD)
    wfc2 = pad2d(wf2, FC1_PAD, C_PAD).astype(jnp.bfloat16)
    bfc2 = pad2d(bf2.reshape(1, -1), 1, C_PAD)

    # ---- run kernel ------------------------------------------------------------------
    out = ti_gat_forward(adj_all, x_all_pad, poolT_all,
                         w_in, adst_in, asrcT_in, b_in,
                         w_stk, adst_stk, asrcT_stk, b_stk,
                         wfc1, bfc1, wfc2, bfc2)
    out = jax.block_until_ready(out)                                       # [G, B, C]

    # ---- check against the plain-JAX reference ---------------------------------------
    ref = jnp.stack([reference_forward(adjs[g], xs[g], batch_vecs[g],
                                       layer_params, wf1, bf1, wf2, bf2)
                     for g in range(G)])

    assert out.shape == (G, N_GRAPHS, NUM_CLASSES)
    assert bool(jnp.all(jnp.isfinite(out)))
    max_err = float(jnp.max(jnp.abs(out - ref)))
    assert jnp.allclose(out, ref, atol=1e-2, rtol=1e-2), (
        f"mismatch vs JAX reference, max abs err {max_err}")

    print("KERNEL_OK")
</pallas_src>

<mosaic_0001>
module attributes {stable_mosaic.version = 11 : i64} {
  func.func @ti_gat_kernel(%arg0: i32, %arg1: memref<1x16x16xf32, #tpu.memory_space<vmem>>, %arg2: memref<1x16x128xbf16, #tpu.memory_space<vmem>>, %arg3: memref<1x16x8xf32, #tpu.memory_space<vmem>>, %arg4: memref<128x64xbf16, #tpu.memory_space<vmem>>, %arg5: memref<64x4xbf16, #tpu.memory_space<vmem>>, %arg6: memref<4x64xbf16, #tpu.memory_space<vmem>>, %arg7: memref<1x64xf32, #tpu.memory_space<vmem>>, %arg8: memref<5x64x64xbf16, #tpu.memory_space<vmem>>, %arg9: memref<5x64x4xbf16, #tpu.memory_space<vmem>>, %arg10: memref<5x4x64xbf16, #tpu.memory_space<vmem>>, %arg11: memref<5x1x64xf32, #tpu.memory_space<vmem>>, %arg12: memref<64x128xbf16, #tpu.memory_space<vmem>>, %arg13: memref<1x128xf32, #tpu.memory_space<vmem>>, %arg14: memref<128x128xbf16, #tpu.memory_space<vmem>>, %arg15: memref<1x128xf32, #tpu.memory_space<vmem>>, %arg16: memref<1x8x128xf32, #tpu.memory_space<vmem>>) attributes {dimension_semantics = [#tpu.dimension_semantics<parallel>], iteration_bounds = array<i64: 2>, scalar_prefetch = 0 : i64, scratch_operands = 0 : i64, tpu.core_type = #tpu.core_type<tc>, window_params = [{transform_indices = @transform_0, window_bounds = array<i64: 1, 16, 16>}, {transform_indices = @transform_1, window_bounds = array<i64: 1, 16, 128>}, {transform_indices = @transform_2, window_bounds = array<i64: 1, 16, 8>}, {pipeline_mode = #tpu.pipeline_mode<synchronous>, transform_indices = @transform_3, window_bounds = array<i64: 128, 64>}, {pipeline_mode = #tpu.pipeline_mode<synchronous>, transform_indices = @transform_4, window_bounds = array<i64: 64, 4>}, {pipeline_mode = #tpu.pipeline_mode<synchronous>, transform_indices = @transform_5, window_bounds = array<i64: 4, 64>}, {pipeline_mode = #tpu.pipeline_mode<synchronous>, transform_indices = @transform_6, window_bounds = array<i64: 1, 64>}, {pipeline_mode = #tpu.pipeline_mode<synchronous>, transform_indices = @transform_7, window_bounds = array<i64: 5, 64, 64>}, {pipeline_mode = #tpu.pipeline_mode<synchronous>, transform_indices = @transform_8, window_bounds = array<i64: 5, 64, 4>}, {pipeline_mode = #tpu.pipeline_mode<synchronous>, transform_indices = @transform_9, window_bounds = array<i64: 5, 4, 64>}, {pipeline_mode = #tpu.pipeline_mode<synchronous>, transform_indices = @transform_10, window_bounds = array<i64: 5, 1, 64>}, {pipeline_mode = #tpu.pipeline_mode<synchronous>, transform_indices = @transform_11, window_bounds = array<i64: 64, 128>}, {pipeline_mode = #tpu.pipeline_mode<synchronous>, transform_indices = @transform_12, window_bounds = array<i64: 1, 128>}, {pipeline_mode = #tpu.pipeline_mode<synchronous>, transform_indices = @transform_13, window_bounds = array<i64: 128, 128>}, {pipeline_mode = #tpu.pipeline_mode<synchronous>, transform_indices = @transform_14, window_bounds = array<i64: 1, 128>}, {transform_indices = @transform_15, window_bounds = array<i64: 1, 8, 128>}]} {
    %c0 = arith.constant 0 : index
    %c0_0 = arith.constant 0 : index
    %c0_1 = arith.constant 0 : index
    %0 = vector.load %arg1[%c0, %c0_0, %c0_1] : memref<1x16x16xf32, #tpu.memory_space<vmem>>, vector<1x16x16xf32>
    %1 = vector.shape_cast %0 : vector<1x16x16xf32> to vector<16x16xf32>
    %cst = arith.constant 0.000000e+00 : f32
    %2 = vector.broadcast %cst : f32 to vector<16x16xf32>
    %3 = arith.cmpf ogt, %1, %2 : vector<16x16xf32>
    %c0_2 = arith.constant 0 : index
    %c0_3 = arith.constant 0 : index
    %c0_4 = arith.constant 0 : index
    %4 = vector.load %arg2[%c0_2, %c0_3, %c0_4] : memref<1x16x128xbf16, #tpu.memory_space<vmem>>, vector<1x16x128xbf16>
    %5 = vector.shape_cast %4 : vector<1x16x128xbf16> to vector<16x128xbf16>
    %c0_5 = arith.constant 0 : index
    %c0_6 = arith.constant 0 : index
    %6 = vector.load %arg4[%c0_5, %c0_6] : memref<128x64xbf16, #tpu.memory_space<vmem>>, vector<128x64xbf16>
    %c0_7 = arith.constant 0 : index
    %c0_8 = arith.constant 0 : index
    %7 = vector.load %arg5[%c0_7, %c0_8] : memref<64x4xbf16, #tpu.memory_space<vmem>>, vector<64x4xbf16>
    %c0_9 = arith.constant 0 : index
    %c0_10 = arith.constant 0 : index
    %8 = vector.load %arg6[%c0_9, %c0_10] : memref<4x64xbf16, #tpu.memory_space<vmem>>, vector<4x64xbf16>
    %c0_11 = arith.constant 0 : index
    %c0_12 = arith.constant 0 : index
    %9 = vector.load %arg7[%c0_11, %c0_12] : memref<1x64xf32, #tpu.memory_space<vmem>>, vector<1x64xf32>
    %cst_13 = arith.constant dense<0.000000e+00> : vector<16x64xf32>
    %10 = tpu.matmul %5, %6, %cst_13 {dimension_numbers = #tpu.dot_dimension_numbers<[1], [0], [0], [1], [0, 0, 1, 1], [], []>} : vector<16x128xbf16>, vector<128x64xbf16>, vector<16x64xf32> -> vector<16x64xf32>
    %11 = arith.truncf %10 : vector<16x64xf32> to vector<16x64xbf16>
    %cst_14 = arith.constant dense<0.000000e+00> : vector<16x4xf32>
    %12 = tpu.matmul %11, %7, %cst_14 {dimension_numbers = #tpu.dot_dimension_numbers<[1], [0], [0], [1], [0, 0, 1, 1], [], []>} : vector<16x64xbf16>, vector<64x4xbf16>, vector<16x4xf32> -> vector<16x4xf32>
    %cst_15 = arith.constant dense<0.000000e+00> : vector<4x16xf32>
    %13 = tpu.matmul %8, %11, %cst_15 {dimension_numbers = #tpu.dot_dimension_numbers<[1], [1], [0], [0], [0, 0, 1, 0], [], []>} : vector<4x64xbf16>, vector<16x64xbf16>, vector<4x16xf32> -> vector<4x16xf32>
    %14 = vector.extract_strided_slice %12 {offsets = [0, 0], sizes = [16, 1], strides = [1, 1]} : vector<16x4xf32> to vector<16x1xf32>
    %15 = vector.extract_strided_slice %13 {offsets = [0, 0], sizes = [1, 16], strides = [1, 1]} : vector<4x16xf32> to vector<1x16xf32>
    %16 = vector.broadcast %14 : vector<16x1xf32> to vector<16x16xf32>
    %17 = vector.broadcast %15 : vector<1x16xf32> to vector<16x16xf32>
    %18 = arith.addf %16, %17 : vector<16x16xf32>
    %cst_16 = arith.constant 0.000000e+00 : f32
    %19 = vector.broadcast %cst_16 : f32 to vector<16x16xf32>
    %20 = arith.cmpf ogt, %18, %19 : vector<16x16xf32>
    %cst_17 = arith.constant 2.000000e-01 : f32
    %21 = vector.broadcast %cst_17 : f32 to vector<16x16xf32>
    %22 = arith.mulf %21, %18 : vector<16x16xf32>
    %23 = arith.select %20, %18, %22 : vector<16x16xi1>, vector<16x16xf32>
    %cst_18 = arith.constant -1.000000e+30 : f32
    %24 = vector.broadcast %cst_18 : f32 to vector<16x16xf32>
    %25 = arith.select %3, %23, %24 : vector<16x16xi1>, vector<16x16xf32>
    %cst_19 = arith.constant dense<0xFF800000> : vector<16xf32>
    %26 = vector.multi_reduction <maximumf>, %25, %cst_19 [1] : vector<16x16xf32> to vector<16xf32>
    %27 = vector.shape_cast %26 : vector<16xf32> to vector<16x1xf32>
    %28 = vector.broadcast %27 : vector<16x1xf32> to vector<16x16xf32>
    %29 = arith.subf %25, %28 : vector<16x16xf32>
    %30 = math.exp %29 : vector<16x16xf32>
    %cst_20 = arith.constant 0.000000e+00 : f32
    %31 = vector.broadcast %cst_20 : f32 to vector<16x16xf32>
    %32 = arith.select %3, %30, %31 : vector<16x16xi1>, vector<16x16xf32>
    %cst_21 = arith.constant dense<0.000000e+00> : vector<16xf32>
    %33 = vector.multi_reduction <add>, %32, %cst_21 [1] : vector<16x16xf32> to vector<16xf32>
    %34 = vector.shape_cast %33 : vector<16xf32> to vector<16x1xf32>
    %35 = vector.broadcast %34 : vector<16x1xf32> to vector<16x16xf32>
    %36 = arith.divf %32, %35 : vector<16x16xf32>
    %37 = vector.extract_strided_slice %11 {offsets = [0, 0], sizes = [16, 16], strides = [1, 1]} : vector<16x64xbf16> to vector<16x16xbf16>
    %38 = arith.truncf %36 : vector<16x16xf32> to vector<16x16xbf16>
    %cst_22 = arith.constant dense<0.000000e+00> : vector<16x16xf32>
    %39 = tpu.matmul %38, %37, %cst_22 {dimension_numbers = #tpu.dot_dimension_numbers<[1], [0], [0], [1], [0, 0, 1, 1], [], []>} : vector<16x16xbf16>, vector<16x16xbf16>, vector<16x16xf32> -> vector<16x16xf32>
    %40 = vector.extract_strided_slice %12 {offsets = [0, 1], sizes = [16, 1], strides = [1, 1]} : vector<16x4xf32> to vector<16x1xf32>
    %41 = vector.extract_strided_slice %13 {offsets = [1, 0], sizes = [1, 16], strides = [1, 1]} : vector<4x16xf32> to vector<1x16xf32>
    %42 = vector.broadcast %40 : vector<16x1xf32> to vector<16x16xf32>
    %43 = vector.broadcast %41 : vector<1x16xf32> to vector<16x16xf32>
    %44 = arith.addf %42, %43 : vector<16x16xf32>
    %cst_23 = arith.constant 0.000000e+00 : f32
    %45 = vector.broadcast %cst_23 : f32 to vector<16x16xf32>
    %46 = arith.cmpf ogt, %44, %45 : vector<16x16xf32>
    %cst_24 = arith.constant 2.000000e-01 : f32
    %47 = vector.broadcast %cst_24 : f32 to vector<16x16xf32>
    %48 = arith.mulf %47, %44 : vector<16x16xf32>
    %49 = arith.select %46, %44, %48 : vector<16x16xi1>, vector<16x16xf32>
    %cst_25 = arith.constant -1.000000e+30 : f32
    %50 = vector.broadcast %cst_25 : f32 to vector<16x16xf32>
    %51 = arith.select %3, %49, %50 : vector<16x16xi1>, vector<16x16xf32>
    %cst_26 = arith.constant dense<0xFF800000> : vector<16xf32>
    %52 = vector.multi_reduction <maximumf>, %51, %cst_26 [1] : vector<16x16xf32> to vector<16xf32>
    %53 = vector.shape_cast %52 : vector<16xf32> to vector<16x1xf32>
    %54 = vector.broadcast %53 : vector<16x1xf32> to vector<16x16xf32>
    %55 = arith.subf %51, %54 : vector<16x16xf32>
    %56 = math.exp %55 : vector<16x16xf32>
    %cst_27 = arith.constant 0.000000e+00 : f32
    %57 = vector.broadcast %cst_27 : f32 to vector<16x16xf32>
    %58 = arith.select %3, %56, %57 : vector<16x16xi1>, vector<16x16xf32>
    %cst_28 = arith.constant dense<0.000000e+00> : vector<16xf32>
    %59 = vector.multi_reduction <add>, %58, %cst_28 [1] : vector<16x16xf32> to vector<16xf32>
    %60 = vector.shape_cast %59 : vector<16xf32> to vector<16x1xf32>
    %61 = vector.broadcast %60 : vector<16x1xf32> to vector<16x16xf32>
    %62 = arith.divf %58, %61 : vector<16x16xf32>
    %63 = vector.extract_strided_slice %11 {offsets = [0, 16], sizes = [16, 16], strides = [1, 1]} : vector<16x64xbf16> to vector<16x16xbf16>
    %64 = arith.truncf %62 : vector<16x16xf32> to vector<16x16xbf16>
    %cst_29 = arith.constant dense<0.000000e+00> : vector<16x16xf32>
    %65 = tpu.matmul %64, %63, %cst_29 {dimension_numbers = #tpu.dot_dimension_numbers<[1], [0], [0], [1], [0, 0, 1, 1], [], []>} : vector<16x16xbf16>, vector<16x16xbf16>, vector<16x16xf32> -> vector<16x16xf32>
    %66 = vector.extract_strided_slice %12 {offsets = [0, 2], sizes = [16, 1], strides = [1, 1]} : vector<16x4xf32> to vector<16x1xf32>
    %67 = vector.extract_strided_slice %13 {offsets = [2, 0], sizes = [1, 16], strides = [1, 1]} : vector<4x16xf32> to vector<1x16xf32>
    %68 = vector.broadcast %66 : vector<16x1xf32> to vector<16x16xf32>
    %69 = vector.broadcast %67 : vector<1x16xf32> to vector<16x16xf32>
    %70 = arith.addf %68, %69 : vector<16x16xf32>
    %cst_30 = arith.constant 0.000000e+00 : f32
    %71 = vector.broadcast %cst_30 : f32 to vector<16x16xf32>
    %72 = arith.cmpf ogt, %70, %71 : vector<16x16xf32>
    %cst_31 = arith.constant 2.000000e-01 : f32
    %73 = vector.broadcast %cst_31 : f32 to vector<16x16xf32>
    %74 = arith.mulf %73, %70 : vector<16x16xf32>
    %75 = arith.select %72, %70, %74 : vector<16x16xi1>, vector<16x16xf32>
    %cst_32 = arith.constant -1.000000e+30 : f32
    %76 = vector.broadcast %cst_32 : f32 to vector<16x16xf32>
    %77 = arith.select %3, %75, %76 : vector<16x16xi1>, vector<16x16xf32>
    %cst_33 = arith.constant dense<0xFF800000> : vector<16xf32>
    %78 = vector.multi_reduction <maximumf>, %77, %cst_33 [1] : vector<16x16xf32> to vector<16xf32>
    %79 = vector.shape_cast %78 : vector<16xf32> to vector<16x1xf32>
    %80 = vector.broadcast %79 : vector<16x1xf32> to vector<16x16xf32>
    %81 = arith.subf %77, %80 : vector<16x16xf32>
    %82 = math.exp %81 : vector<16x16xf32>
    %cst_34 = arith.constant 0.000000e+00 : f32
    %83 = vector.broadcast %cst_34 : f32 to vector<16x16xf32>
    %84 = arith.select %3, %82, %83 : vector<16x16xi1>, vector<16x16xf32>
    %cst_35 = arith.constant dense<0.000000e+00> : vector<16xf32>
    %85 = vector.multi_reduction <add>, %84, %cst_35 [1] : vector<16x16xf32> to vector<16xf32>
    %86 = vector.shape_cast %85 : vector<16xf32> to vector<16x1xf32>
    %87 = vector.broadcast %86 : vector<16x1xf32> to vector<16x16xf32>
    %88 = arith.divf %84, %87 : vector<16x16xf32>
    %89 = vector.extract_strided_slice %11 {offsets = [0, 32], sizes = [16, 16], strides = [1, 1]} : vector<16x64xbf16> to vector<16x16xbf16>
    %90 = arith.truncf %88 : vector<16x16xf32> to vector<16x16xbf16>
    %cst_36 = arith.constant dense<0.000000e+00> : vector<16x16xf32>
    %91 = tpu.matmul %90, %89, %cst_36 {dimension_numbers = #tpu.dot_dimension_numbers<[1], [0], [0], [1], [0, 0, 1, 1], [], []>} : vector<16x16xbf16>, vector<16x16xbf16>, vector<16x16xf32> -> vector<16x16xf32>
    %92 = vector.extract_strided_slice %12 {offsets = [0, 3], sizes = [16, 1], strides = [1, 1]} : vector<16x4xf32> to vector<16x1xf32>
    %93 = vector.extract_strided_slice %13 {offsets = [3, 0], sizes = [1, 16], strides = [1, 1]} : vector<4x16xf32> to vector<1x16xf32>
    %94 = vector.broadcast %92 : vector<16x1xf32> to vector<16x16xf32>
    %95 = vector.broadcast %93 : vector<1x16xf32> to vector<16x16xf32>
    %96 = arith.addf %94, %95 : vector<16x16xf32>
    %cst_37 = arith.constant 0.000000e+00 : f32
    %97 = vector.broadcast %cst_37 : f32 to vector<16x16xf32>
    %98 = arith.cmpf ogt, %96, %97 : vector<16x16xf32>
    %cst_38 = arith.constant 2.000000e-01 : f32
    %99 = vector.broadcast %cst_38 : f32 to vector<16x16xf32>
    %100 = arith.mulf %99, %96 : vector<16x16xf32>
    %101 = arith.select %98, %96, %100 : vector<16x16xi1>, vector<16x16xf32>
    %cst_39 = arith.constant -1.000000e+30 : f32
    %102 = vector.broadcast %cst_39 : f32 to vector<16x16xf32>
    %103 = arith.select %3, %101, %102 : vector<16x16xi1>, vector<16x16xf32>
    %cst_40 = arith.constant dense<0xFF800000> : vector<16xf32>
    %104 = vector.multi_reduction <maximumf>, %103, %cst_40 [1] : vector<16x16xf32> to vector<16xf32>
    %105 = vector.shape_cast %104 : vector<16xf32> to vector<16x1xf32>
    %106 = vector.broadcast %105 : vector<16x1xf32> to vector<16x16xf32>
    %107 = arith.subf %103, %106 : vector<16x16xf32>
    %108 = math.exp %107 : vector<16x16xf32>
    %cst_41 = arith.constant 0.000000e+00 : f32
    %109 = vector.broadcast %cst_41 : f32 to vector<16x16xf32>
    %110 = arith.select %3, %108, %109 : vector<16x16xi1>, vector<16x16xf32>
    %cst_42 = arith.constant dense<0.000000e+00> : vector<16xf32>
    %111 = vector.multi_reduction <add>, %110, %cst_42 [1] : vector<16x16xf32> to vector<16xf32>
    %112 = vector.shape_cast %111 : vector<16xf32> to vector<16x1xf32>
    %113 = vector.broadcast %112 : vector<16x1xf32> to vector<16x16xf32>
    %114 = arith.divf %110, %113 : vector<16x16xf32>
    %115 = vector.extract_strided_slice %11 {offsets = [0, 48], sizes = [16, 16], strides = [1, 1]} : vector<16x64xbf16> to vector<16x16xbf16>
    %116 = arith.truncf %114 : vector<16x16xf32> to vector<16x16xbf16>
    %cst_43 = arith.constant dense<0.000000e+00> : vector<16x16xf32>
    %117 = tpu.matmul %116, %115, %cst_43 {dimension_numbers = #tpu.dot_dimension_numbers<[1], [0], [0], [1], [0, 0, 1, 1], [], []>} : vector<16x16xbf16>, vector<16x16xbf16>, vector<16x16xf32> -> vector<16x16xf32>
    %118 = tpu.concatenate %39, %65, %91, %117 in 1 : vector<16x16xf32>, vector<16x16xf32>, vector<16x16xf32>, vector<16x16xf32> -> vector<16x64xf32>
    %119 = vector.broadcast %9 : vector<1x64xf32> to vector<16x64xf32>
    %120 = arith.addf %118, %119 : vector<16x64xf32>
    %cst_44 = arith.constant 0.000000e+00 : f32
    %121 = vector.broadcast %cst_44 : f32 to vector<16x64xf32>
    %122 = arith.maximumf %120, %121 : vector<16x64xf32>
    %123 = arith.truncf %122 : vector<16x64xf32> to vector<16x64xbf16>
    %c0_45 = arith.constant 0 : index
    %c0_46 = arith.constant 0 : index
    %c0_47 = arith.constant 0 : index
    %124 = vector.load %arg8[%c0_45, %c0_46, %c0_47] : memref<5x64x64xbf16, #tpu.memory_space<vmem>>, vector<1x64x64xbf16>
    %125 = vector.shape_cast %124 : vector<1x64x64xbf16> to vector<64x64xbf16>
    %c0_48 = arith.constant 0 : index
    %c0_49 = arith.constant 0 : index
    %c0_50 = arith.constant 0 : index
    %126 = vector.load %arg9[%c0_48, %c0_49, %c0_50] : memref<5x64x4xbf16, #tpu.memory_space<vmem>>, vector<1x64x4xbf16>
    %127 = vector.shape_cast %126 : vector<1x64x4xbf16> to vector<64x4xbf16>
    %c0_51 = arith.constant 0 : index
    %c0_52 = arith.constant 0 : index
    %c0_53 = arith.constant 0 : index
    %128 = vector.load %arg10[%c0_51, %c0_52, %c0_53] : memref<5x4x64xbf16, #tpu.memory_space<vmem>>, vector<1x4x64xbf16>
    %129 = vector.shape_cast %128 : vector<1x4x64xbf16> to vector<4x64xbf16>
    %c0_54 = arith.constant 0 : index
    %c0_55 = arith.constant 0 : index
    %c0_56 = arith.constant 0 : index
    %130 = vector.load %arg11[%c0_54, %c0_55, %c0_56] : memref<5x1x64xf32, #tpu.memory_space<vmem>>, vector<1x1x64xf32>
    %131 = vector.shape_cast %130 : vector<1x1x64xf32> to vector<1x64xf32>
    %cst_57 = arith.constant dense<0.000000e+00> : vector<16x64xf32>
    %132 = tpu.matmul %123, %125, %cst_57 {dimension_numbers = #tpu.dot_dimension_numbers<[1], [0], [0], [1], [0, 0, 1, 1], [], []>} : vector<16x64xbf16>, vector<64x64xbf16>, vector<16x64xf32> -> vector<16x64xf32>
    %133 = arith.truncf %132 : vector<16x64xf32> to vector<16x64xbf16>
    %cst_58 = arith.constant dense<0.000000e+00> : vector<16x4xf32>
    %134 = tpu.matmul %133, %127, %cst_58 {dimension_numbers = #tpu.dot_dimension_numbers<[1], [0], [0], [1], [0, 0, 1, 1], [], []>} : vector<16x64xbf16>, vector<64x4xbf16>, vector<16x4xf32> -> vector<16x4xf32>
    %cst_59 = arith.constant dense<0.000000e+00> : vector<4x16xf32>
    %135 = tpu.matmul %129, %133, %cst_59 {dimension_numbers = #tpu.dot_dimension_numbers<[1], [1], [0], [0], [0, 0, 1, 0], [], []>} : vector<4x64xbf16>, vector<16x64xbf16>, vector<4x16xf32> -> vector<4x16xf32>
    %136 = vector.extract_strided_slice %134 {offsets = [0, 0], sizes = [16, 1], strides = [1, 1]} : vector<16x4xf32> to vector<16x1xf32>
    %137 = vector.extract_strided_slice %135 {offsets = [0, 0], sizes = [1, 16], strides = [1, 1]} : vector<4x16xf32> to vector<1x16xf32>
    %138 = vector.broadcast %136 : vector<16x1xf32> to vector<16x16xf32>
    %139 = vector.broadcast %137 : vector<1x16xf32> to vector<16x16xf32>
    %140 = arith.addf %138, %139 : vector<16x16xf32>
    %cst_60 = arith.constant 0.000000e+00 : f32
    %141 = vector.broadcast %cst_60 : f32 to vector<16x16xf32>
    %142 = arith.cmpf ogt, %140, %141 : vector<16x16xf32>
    %cst_61 = arith.constant 2.000000e-01 : f32
    %143 = vector.broadcast %cst_61 : f32 to vector<16x16xf32>
    %144 = arith.mulf %143, %140 : vector<16x16xf32>
    %145 = arith.select %142, %140, %144 : vector<16x16xi1>, vector<16x16xf32>
    %cst_62 = arith.constant -1.000000e+30 : f32
    %146 = vector.broadcast %cst_62 : f32 to vector<16x16xf32>
    %147 = arith.select %3, %145, %146 : vector<16x16xi1>, vector<16x16xf32>
    %cst_63 = arith.constant dense<0xFF800000> : vector<16xf32>
    %148 = vector.multi_reduction <maximumf>, %147, %cst_63 [1] : vector<16x16xf32> to vector<16xf32>
    %149 = vector.shape_cast %148 : vector<16xf32> to vector<16x1xf32>
    %150 = vector.broadcast %149 : vector<16x1xf32> to vector<16x16xf32>
    %151 = arith.subf %147, %150 : vector<16x16xf32>
    %152 = math.exp %151 : vector<16x16xf32>
    %cst_64 = arith.constant 0.000000e+00 : f32
    %153 = vector.broadcast %cst_64 : f32 to vector<16x16xf32>
    %154 = arith.select %3, %152, %153 : vector<16x16xi1>, vector<16x16xf32>
    %cst_65 = arith.constant dense<0.000000e+00> : vector<16xf32>
    %155 = vector.multi_reduction <add>, %154, %cst_65 [1] : vector<16x16xf32> to vector<16xf32>
    %156 = vector.shape_cast %155 : vector<16xf32> to vector<16x1xf32>
    %157 = vector.broadcast %156 : vector<16x1xf32> to vector<16x16xf32>
    %158 = arith.divf %154, %157 : vector<16x16xf32>
    %159 = vector.extract_strided_slice %133 {offsets = [0, 0], sizes = [16, 16], strides = [1, 1]} : vector<16x64xbf16> to vector<16x16xbf16>
    %160 = arith.truncf %158 : vector<16x16xf32> to vector<16x16xbf16>
    %cst_66 = arith.constant dense<0.000000e+00> : vector<16x16xf32>
    %161 = tpu.matmul %160, %159, %cst_66 {dimension_numbers = #tpu.dot_dimension_numbers<[1], [0], [0], [1], [0, 0, 1, 1], [], []>} : vector<16x16xbf16>, vector<16x16xbf16>, vector<16x16xf32> -> vector<16x16xf32>
    %162 = vector.extract_strided_slice %134 {offsets = [0, 1], sizes = [16, 1], strides = [1, 1]} : vector<16x4xf32> to vector<16x1xf32>
    %163 = vector.extract_strided_slice %135 {offsets = [1, 0], sizes = [1, 16], strides = [1, 1]} : vector<4x16xf32> to vector<1x16xf32>
    %164 = vector.broadcast %162 : vector<16x1xf32> to vector<16x16xf32>
    %165 = vector.broadcast %163 : vector<1x16xf32> to vector<16x16xf32>
    %166 = arith.addf %164, %165 : vector<16x16xf32>
    %cst_67 = arith.constant 0.000000e+00 : f32
    %167 = vector.broadcast %cst_67 : f32 to vector<16x16xf32>
    %168 = arith.cmpf ogt, %166, %167 : vector<16x16xf32>
    %cst_68 = arith.constant 2.000000e-01 : f32
    %169 = vector.broadcast %cst_68 : f32 to vector<16x16xf32>
    %170 = arith.mulf %169, %166 : vector<16x16xf32>
    %171 = arith.select %168, %166, %170 : vector<16x16xi1>, vector<16x16xf32>
    %cst_69 = arith.constant -1.000000e+30 : f32
    %172 = vector.broadcast %cst_69 : f32 to vector<16x16xf32>
    %173 = arith.select %3, %171, %172 : vector<16x16xi1>, vector<16x16xf32>
    %cst_70 = arith.constant dense<0xFF800000> : vector<16xf32>
    %174 = vector.multi_reduction <maximumf>, %173, %cst_70 [1] : vector<16x16xf32> to vector<16xf32>
    %175 = vector.shape_cast %174 : vector<16xf32> to vector<16x1xf32>
    %176 = vector.broadcast %175 : vector<16x1xf32> to vector<16x16xf32>
    %177 = arith.subf %173, %176 : vector<16x16xf32>
    %178 = math.exp %177 : vector<16x16xf32>
    %cst_71 = arith.constant 0.000000e+00 : f32
    %179 = vector.broadcast %cst_71 : f32 to vector<16x16xf32>
    %180 = arith.select %3, %178, %179 : vector<16x16xi1>, vector<16x16xf32>
    %cst_72 = arith.constant dense<0.000000e+00> : vector<16xf32>
    %181 = vector.multi_reduction <add>, %180, %cst_72 [1] : vector<16x16xf32> to vector<16xf32>
    %182 = vector.shape_cast %181 : vector<16xf32> to vector<16x1xf32>
    %183 = vector.broadcast %182 : vector<16x1xf32> to vector<16x16xf32>
    %184 = arith.divf %180, %183 : vector<16x16xf32>
    %185 = vector.extract_strided_slice %133 {offsets = [0, 16], sizes = [16, 16], strides = [1, 1]} : vector<16x64xbf16> to vector<16x16xbf16>
    %186 = arith.truncf %184 : vector<16x16xf32> to vector<16x16xbf16>
    %cst_73 = arith.constant dense<0.000000e+00> : vector<16x16xf32>
    %187 = tpu.matmul %186, %185, %cst_73 {dimension_numbers = #tpu.dot_dimension_numbers<[1], [0], [0], [1], [0, 0, 1, 1], [], []>} : vector<16x16xbf16>, vector<16x16xbf16>, vector<16x16xf32> -> vector<16x16xf32>
    %188 = vector.extract_strided_slice %134 {offsets = [0, 2], sizes = [16, 1], strides = [1, 1]} : vector<16x4xf32> to vector<16x1xf32>
    %189 = vector.extract_strided_slice %135 {offsets = [2, 0], sizes = [1, 16], strides = [1, 1]} : vector<4x16xf32> to vector<1x16xf32>
    %190 = vector.broadcast %188 : vector<16x1xf32> to vector<16x16xf32>
    %191 = vector.broadcast %189 : vector<1x16xf32> to vector<16x16xf32>
    %192 = arith.addf %190, %191 : vector<16x16xf32>
    %cst_74 = arith.constant 0.000000e+00 : f32
    %193 = vector.broadcast %cst_74 : f32 to vector<16x16xf32>
    %194 = arith.cmpf ogt, %192, %193 : vector<16x16xf32>
    %cst_75 = arith.constant 2.000000e-01 : f32
    %195 = vector.broadcast %cst_75 : f32 to vector<16x16xf32>
    %196 = arith.mulf %195, %192 : vector<16x16xf32>
    %197 = arith.select %194, %192, %196 : vector<16x16xi1>, vector<16x16xf32>
    %cst_76 = arith.constant -1.000000e+30 : f32
    %198 = vector.broadcast %cst_76 : f32 to vector<16x16xf32>
    %199 = arith.select %3, %197, %198 : vector<16x16xi1>, vector<16x16xf32>
    %cst_77 = arith.constant dense<0xFF800000> : vector<16xf32>
    %200 = vector.multi_reduction <maximumf>, %199, %cst_77 [1] : vector<16x16xf32> to vector<16xf32>
    %201 = vector.shape_cast %200 : vector<16xf32> to vector<16x1xf32>
    %202 = vector.broadcast %201 : vector<16x1xf32> to vector<16x16xf32>
    %203 = arith.subf %199, %202 : vector<16x16xf32>
    %204 = math.exp %203 : vector<16x16xf32>
    %cst_78 = arith.constant 0.000000e+00 : f32
    %205 = vector.broadcast %cst_78 : f32 to vector<16x16xf32>
    %206 = arith.select %3, %204, %205 : vector<16x16xi1>, vector<16x16xf32>
    %cst_79 = arith.constant dense<0.000000e+00> : vector<16xf32>
    %207 = vector.multi_reduction <add>, %206, %cst_79 [1] : vector<16x16xf32> to vector<16xf32>
    %208 = vector.shape_cast %207 : vector<16xf32> to vector<16x1xf32>
    %209 = vector.broadcast %208 : vector<16x1xf32> to vector<16x16xf32>
    %210 = arith.divf %206, %209 : vector<16x16xf32>
    %211 = vector.extract_strided_slice %133 {offsets = [0, 32], sizes = [16, 16], strides = [1, 1]} : vector<16x64xbf16> to vector<16x16xbf16>
    %212 = arith.truncf %210 : vector<16x16xf32> to vector<16x16xbf16>
    %cst_80 = arith.constant dense<0.000000e+00> : vector<16x16xf32>
    %213 = tpu.matmul %212, %211, %cst_80 {dimension_numbers = #tpu.dot_dimension_numbers<[1], [0], [0], [1], [0, 0, 1, 1], [], []>} : vector<16x16xbf16>, vector<16x16xbf16>, vector<16x16xf32> -> vector<16x16xf32>
    %214 = vector.extract_strided_slice %134 {offsets = [0, 3], sizes = [16, 1], strides = [1, 1]} : vector<16x4xf32> to vector<16x1xf32>
    %215 = vector.extract_strided_slice %135 {offsets = [3, 0], sizes = [1, 16], strides = [1, 1]} : vector<4x16xf32> to vector<1x16xf32>
    %216 = vector.broadcast %214 : vector<16x1xf32> to vector<16x16xf32>
    %217 = vector.broadcast %215 : vector<1x16xf32> to vector<16x16xf32>
    %218 = arith.addf %216, %217 : vector<16x16xf32>
    %cst_81 = arith.constant 0.000000e+00 : f32
    %219 = vector.broadcast %cst_81 : f32 to vector<16x16xf32>
    %220 = arith.cmpf ogt, %218, %219 : vector<16x16xf32>
    %cst_82 = arith.constant 2.000000e-01 : f32
    %221 = vector.broadcast %cst_82 : f32 to vector<16x16xf32>
    %222 = arith.mulf %221, %218 : vector<16x16xf32>
    %223 = arith.select %220, %218, %222 : vector<16x16xi1>, vector<16x16xf32>
    %cst_83 = arith.constant -1.000000e+30 : f32
    %224 = vector.broadcast %cst_83 : f32 to vector<16x16xf32>
    %225 = arith.select %3, %223, %224 : vector<16x16xi1>, vector<16x16xf32>
    %cst_84 = arith.constant dense<0xFF800000> : vector<16xf32>
    %226 = vector.multi_reduction <maximumf>, %225, %cst_84 [1] : vector<16x16xf32> to vector<16xf32>
    %227 = vector.shape_cast %226 : vector<16xf32> to vector<16x1xf32>
    %228 = vector.broadcast %227 : vector<16x1xf32> to vector<16x16xf32>
    %229 = arith.subf %225, %228 : vector<16x16xf32>
    %230 = math.exp %229 : vector<16x16xf32>
    %cst_85 = arith.constant 0.000000e+00 : f32
    %231 = vector.broadcast %cst_85 : f32 to vector<16x16xf32>
    %232 = arith.select %3, %230, %231 : vector<16x16xi1>, vector<16x16xf32>
    %cst_86 = arith.constant dense<0.000000e+00> : vector<16xf32>
    %233 = vector.multi_reduction <add>, %232, %cst_86 [1] : vector<16x16xf32> to vector<16xf32>
    %234 = vector.shape_cast %233 : vector<16xf32> to vector<16x1xf32>
    %235 = vector.broadcast %234 : vector<16x1xf32> to vector<16x16xf32>
    %236 = arith.divf %232, %235 : vector<16x16xf32>
    %237 = vector.extract_strided_slice %133 {offsets = [0, 48], sizes = [16, 16], strides = [1, 1]} : vector<16x64xbf16> to vector<16x16xbf16>
    %238 = arith.truncf %236 : vector<16x16xf32> to vector<16x16xbf16>
    %cst_87 = arith.constant dense<0.000000e+00> : vector<16x16xf32>
    %239 = tpu.matmul %238, %237, %cst_87 {dimension_numbers = #tpu.dot_dimension_numbers<[1], [0], [0], [1], [0, 0, 1, 1], [], []>} : vector<16x16xbf16>, vector<16x16xbf16>, vector<16x16xf32> -> vector<16x16xf32>
    %240 = tpu.concatenate %161, %187, %213, %239 in 1 : vector<16x16xf32>, vector<16x16xf32>, vector<16x16xf32>, vector<16x16xf32> -> vector<16x64xf32>
    %241 = vector.broadcast %131 : vector<1x64xf32> to vector<16x64xf32>
    %242 = arith.addf %240, %241 : vector<16x64xf32>
    %cst_88 = arith.constant 0.000000e+00 : f32
    %243 = vector.broadcast %cst_88 : f32 to vector<16x64xf32>
    %244 = arith.maximumf %242, %243 : vector<16x64xf32>
    %245 = arith.truncf %244 : vector<16x64xf32> to vector<16x64xbf16>
    %c1 = arith.constant 1 : index
    %c0_89 = arith.constant 0 : index
    %c0_90 = arith.constant 0 : index
    %246 = vector.load %arg8[%c1, %c0_89, %c0_90] : memref<5x64x64xbf16, #tpu.memory_space<vmem>>, vector<1x64x64xbf16>
    %247 = vector.shape_cast %246 : vector<1x64x64xbf16> to vector<64x64xbf16>
    %c1_91 = arith.constant 1 : index
    %c0_92 = arith.constant 0 : index
    %c0_93 = arith.constant 0 : index
    %248 = vector.load %arg9[%c1_91, %c0_92, %c0_93] : memref<5x64x4xbf16, #tpu.memory_space<vmem>>, vector<1x64x4xbf16>
    %249 = vector.shape_cast %248 : vector<1x64x4xbf16> to vector<64x4xbf16>
    %c1_94 = arith.constant 1 : index
    %c0_95 = arith.constant 0 : index
    %c0_96 = arith.constant 0 : index
    %250 = vector.load %arg10[%c1_94, %c0_95, %c0_96] : memref<5x4x64xbf16, #tpu.memory_space<vmem>>, vector<1x4x64xbf16>
    %251 = vector.shape_cast %250 : vector<1x4x64xbf16> to vector<4x64xbf16>
    %c1_97 = arith.constant 1 : index
    %c0_98 = arith.constant 0 : index
    %c0_99 = arith.constant 0 : index
    %252 = vector.load %arg11[%c1_97, %c0_98, %c0_99] : memref<5x1x64xf32, #tpu.memory_space<vmem>>, vector<1x1x64xf32>
    %253 = vector.shape_cast %252 : vector<1x1x64xf32> to vector<1x64xf32>
    %cst_100 = arith.constant dense<0.000000e+00> : vector<16x64xf32>
    %254 = tpu.matmul %245, %247, %cst_100 {dimension_numbers = #tpu.dot_dimension_numbers<[1], [0], [0], [1], [0, 0, 1, 1], [], []>} : vector<16x64xbf16>, vector<64x64xbf16>, vector<16x64xf32> -> vector<16x64xf32>
    %255 = arith.truncf %254 : vector<16x64xf32> to vector<16x64xbf16>
    %cst_101 = arith.constant dense<0.000000e+00> : vector<16x4xf32>
    %256 = tpu.matmul %255, %249, %cst_101 {dimension_numbers = #tpu.dot_dimension_numbers<[1], [0], [0], [1], [0, 0, 1, 1], [], []>} : vector<16x64xbf16>, vector<64x4xbf16>, vector<16x4xf32> -> vector<16x4xf32>
    %cst_102 = arith.constant dense<0.000000e+00> : vector<4x16xf32>
    %257 = tpu.matmul %251, %255, %cst_102 {dimension_numbers = #tpu.dot_dimension_numbers<[1], [1], [0], [0], [0, 0, 1, 0], [], []>} : vector<4x64xbf16>, vector<16x64xbf16>, vector<4x16xf32> -> vector<4x16xf32>
    %258 = vector.extract_strided_slice %256 {offsets = [0, 0], sizes = [16, 1], strides = [1, 1]} : vector<16x4xf32> to vector<16x1xf32>
    %259 = vector.extract_strided_slice %257 {offsets = [0, 0], sizes = [1, 16], strides = [1, 1]} : vector<4x16xf32> to vector<1x16xf32>
    %260 = vector.broadcast %258 : vector<16x1xf32> to vector<16x16xf32>
    %261 = vector.broadcast %259 : vector<1x16xf32> to vector<16x16xf32>
    %262 = arith.addf %260, %261 : vector<16x16xf32>
    %cst_103 = arith.constant 0.000000e+00 : f32
    %263 = vector.broadcast %cst_103 : f32 to vector<16x16xf32>
    %264 = arith.cmpf ogt, %262, %263 : vector<16x16xf32>
    %cst_104 = arith.constant 2.000000e-01 : f32
    %265 = vector.broadcast %cst_104 : f32 to vector<16x16xf32>
    %266 = arith.mulf %265, %262 : vector<16x16xf32>
    %267 = arith.select %264, %262, %266 : vector<16x16xi1>, vector<16x16xf32>
    %cst_105 = arith.constant -1.000000e+30 : f32
    %268 = vector.broadcast %cst_105 : f32 to vector<16x16xf32>
    %269 = arith.select %3, %267, %268 : vector<16x16xi1>, vector<16x16xf32>
    %cst_106 = arith.constant dense<0xFF800000> : vector<16xf32>
    %270 = vector.multi_reduction <maximumf>, %269, %cst_106 [1] : vector<16x16xf32> to vector<16xf32>
    %271 = vector.shape_cast %270 : vector<16xf32> to vector<16x1xf32>
    %272 = vector.broadcast %271 : vector<16x1xf32> to vector<16x16xf32>
    %273 = arith.subf %269, %272 : vector<16x16xf32>
    %274 = math.exp %273 : vector<16x16xf32>
    %cst_107 = arith.constant 0.000000e+00 : f32
    %275 = vector.broadcast %cst_107 : f32 to vector<16x16xf32>
    %276 = arith.select %3, %274, %275 : vector<16x16xi1>, vector<16x16xf32>
    %cst_108 = arith.constant dense<0.000000e+00> : vector<16xf32>
    %277 = vector.multi_reduction <add>, %276, %cst_108 [1] : vector<16x16xf32> to vector<16xf32>
    %278 = vector.shape_cast %277 : vector<16xf32> to vector<16x1xf32>
    %279 = vector.broadcast %278 : vector<16x1xf32> to vector<16x16xf32>
    %280 = arith.divf %276, %279 : vector<16x16xf32>
    %281 = vector.extract_strided_slice %255 {offsets = [0, 0], sizes = [16, 16], strides = [1, 1]} : vector<16x64xbf16> to vector<16x16xbf16>
    %282 = arith.truncf %280 : vector<16x16xf32> to vector<16x16xbf16>
    %cst_109 = arith.constant dense<0.000000e+00> : vector<16x16xf32>
    %283 = tpu.matmul %282, %281, %cst_109 {dimension_numbers = #tpu.dot_dimension_numbers<[1], [0], [0], [1], [0, 0, 1, 1], [], []>} : vector<16x16xbf16>, vector<16x16xbf16>, vector<16x16xf32> -> vector<16x16xf32>
    %284 = vector.extract_strided_slice %256 {offsets = [0, 1], sizes = [16, 1], strides = [1, 1]} : vector<16x4xf32> to vector<16x1xf32>
    %285 = vector.extract_strided_slice %257 {offsets = [1, 0], sizes = [1, 16], strides = [1, 1]} : vector<4x16xf32> to vector<1x16xf32>
    %286 = vector.broadcast %284 : vector<16x1xf32> to vector<16x16xf32>
    %287 = vector.broadcast %285 : vector<1x16xf32> to vector<16x16xf32>
    %288 = arith.addf %286, %287 : vector<16x16xf32>
    %cst_110 = arith.constant 0.000000e+00 : f32
    %289 = vector.broadcast %cst_110 : f32 to vector<16x16xf32>
    %290 = arith.cmpf ogt, %288, %289 : vector<16x16xf32>
    %cst_111 = arith.constant 2.000000e-01 : f32
    %291 = vector.broadcast %cst_111 : f32 to vector<16x16xf32>
    %292 = arith.mulf %291, %288 : vector<16x16xf32>
    %293 = arith.select %290, %288, %292 : vector<16x16xi1>, vector<16x16xf32>
    %cst_112 = arith.constant -1.000000e+30 : f32
    %294 = vector.broadcast %cst_112 : f32 to vector<16x16xf32>
    %295 = arith.select %3, %293, %294 : vector<16x16xi1>, vector<16x16xf32>
    %cst_113 = arith.constant dense<0xFF800000> : vector<16xf32>
    %296 = vector.multi_reduction <maximumf>, %295, %cst_113 [1] : vector<16x16xf32> to vector<16xf32>
    %297 = vector.shape_cast %296 : vector<16xf32> to vector<16x1xf32>
    %298 = vector.broadcast %297 : vector<16x1xf32> to vector<16x16xf32>
    %299 = arith.subf %295, %298 : vector<16x16xf32>
    %300 = math.exp %299 : vector<16x16xf32>
    %cst_114 = arith.constant 0.000000e+00 : f32
    %301 = vector.broadcast %cst_114 : f32 to vector<16x16xf32>
    %302 = arith.select %3, %300, %301 : vector<16x16xi1>, vector<16x16xf32>
    %cst_115 = arith.constant dense<0.000000e+00> : vector<16xf32>
    %303 = vector.multi_reduction <add>, %302, %cst_115 [1] : vector<16x16xf32> to vector<16xf32>
    %304 = vector.shape_cast %303 : vector<16xf32> to vector<16x1xf32>
    %305 = vector.broadcast %304 : vector<16x1xf32> to vector<16x16xf32>
    %306 = arith.divf %302, %305 : vector<16x16xf32>
    %307 = vector.extract_strided_slice %255 {offsets = [0, 16], sizes = [16, 16], strides = [1, 1]} : vector<16x64xbf16> to vector<16x16xbf16>
    %308 = arith.truncf %306 : vector<16x16xf32> to vector<16x16xbf16>
    %cst_116 = arith.constant dense<0.000000e+00> : vector<16x16xf32>
    %309 = tpu.matmul %308, %307, %cst_116 {dimension_numbers = #tpu.dot_dimension_numbers<[1], [0], [0], [1], [0, 0, 1, 1], [], []>} : vector<16x16xbf16>, vector<16x16xbf16>, vector<16x16xf32> -> vector<16x16xf32>
    %310 = vector.extract_strided_slice %256 {offsets = [0, 2], sizes = [16, 1], strides = [1, 1]} : vector<16x4xf32> to vector<16x1xf32>
    %311 = vector.extract_strided_slice %257 {offsets = [2, 0], sizes = [1, 16], strides = [1, 1]} : vector<4x16xf32> to vector<1x16xf32>
    %312 = vector.broadcast %310 : vector<16x1xf32> to vector<16x16xf32>
    %313 = vector.broadcast %311 : vector<1x16xf32> to vector<16x16xf32>
    %314 = arith.addf %312, %313 : vector<16x16xf32>
    %cst_117 = arith.constant 0.000000e+00 : f32
    %315 = vector.broadcast %cst_117 : f32 to vector<16x16xf32>
    %316 = arith.cmpf ogt, %314, %315 : vector<16x16xf32>
    %cst_118 = arith.constant 2.000000e-01 : f32
    %317 = vector.broadcast %cst_118 : f32 to vector<16x16xf32>
    %318 = arith.mulf %317, %314 : vector<16x16xf32>
    %319 = arith.select %316, %314, %318 : vector<16x16xi1>, vector<16x16xf32>
    %cst_119 = arith.constant -1.000000e+30 : f32
    %320 = vector.broadcast %cst_119 : f32 to vector<16x16xf32>
    %321 = arith.select %3, %319, %320 : vector<16x16xi1>, vector<16x16xf32>
    %cst_120 = arith.constant dense<0xFF800000> : vector<16xf32>
    %322 = vector.multi_reduction <maximumf>, %321, %cst_120 [1] : vector<16x16xf32> to vector<16xf32>
    %323 = vector.shape_cast %322 : vector<16xf32> to vector<16x1xf32>
    %324 = vector.broadcast %323 : vector<16x1xf32> to vector<16x16xf32>
    %325 = arith.subf %321, %324 : vector<16x16xf32>
    %326 = math.exp %325 : vector<16x16xf32>
    %cst_121 = arith.constant 0.000000e+00 : f32
    %327 = vector.broadcast %cst_121 : f32 to vector<16x16xf32>
    %328 = arith.select %3, %326, %327 : vector<16x16xi1>, vector<16x16xf32>
    %cst_122 = arith.constant dense<0.000000e+00> : vector<16xf32>
    %329 = vector.multi_reduction <add>, %328, %cst_122 [1] : vector<16x16xf32> to vector<16xf32>
    %330 = vector.shape_cast %329 : vector<16xf32> to vector<16x1xf32>
    %331 = vector.broadcast %330 : vector<16x1xf32> to vector<16x16xf32>
    %332 = arith.divf %328, %331 : vector<16x16xf32>
    %333 = vector.extract_strided_slice %255 {offsets = [0, 32], sizes = [16, 16], strides = [1, 1]} : vector<16x64xbf16> to vector<16x16xbf16>
    %334 = arith.truncf %332 : vector<16x16xf32> to vector<16x16xbf16>
    %cst_123 = arith.constant dense<0.000000e+00> : vector<16x16xf32>
    %335 = tpu.matmul %334, %333, %cst_123 {dimension_numbers = #tpu.dot_dimension_numbers<[1], [0], [0], [1], [0, 0, 1, 1], [], []>} : vector<16x16xbf16>, vector<16x16xbf16>, vector<16x16xf32> -> vector<16x16xf32>
    %336 = vector.extract_strided_slice %256 {offsets = [0, 3], sizes = [16, 1], strides = [1, 1]} : vector<16x4xf32> to vector<16x1xf32>
    %337 = vector.extract_strided_slice %257 {offsets = [3, 0], sizes = [1, 16], strides = [1, 1]} : vector<4x16xf32> to vector<1x16xf32>
    %338 = vector.broadcast %336 : vector<16x1xf32> to vector<16x16xf32>
    %339 = vector.broadcast %337 : vector<1x16xf32> to vector<16x16xf32>
    %340 = arith.addf %338, %339 : vector<16x16xf32>
    %cst_124 = arith.constant 0.000000e+00 : f32
    %341 = vector.broadcast %cst_124 : f32 to vector<16x16xf32>
    %342 = arith.cmpf ogt, %340, %341 : vector<16x16xf32>
    %cst_125 = arith.constant 2.000000e-01 : f32
    %343 = vector.broadcast %cst_125 : f32 to vector<16x16xf32>
    %344 = arith.mulf %343, %340 : vector<16x16xf32>
    %345 = arith.select %342, %340, %344 : vector<16x16xi1>, vector<16x16xf32>
    %cst_126 = arith.constant -1.000000e+30 : f32
    %346 = vector.broadcast %cst_126 : f32 to vector<16x16xf32>
    %347 = arith.select %3, %345, %346 : vector<16x16xi1>, vector<16x16xf32>
    %cst_127 = arith.constant dense<0xFF800000> : vector<16xf32>
    %348 = vector.multi_reduction <maximumf>, %347, %cst_127 [1] : vector<16x16xf32> to vector<16xf32>
    %349 = vector.shape_cast %348 : vector<16xf32> to vector<16x1xf32>
    %350 = vector.broadcast %349 : vector<16x1xf32> to vector<16x16xf32>
    %351 = arith.subf %347, %350 : vector<16x16xf32>
    %352 = math.exp %351 : vector<16x16xf32>
    %cst_128 = arith.constant 0.000000e+00 : f32
    %353 = vector.broadcast %cst_128 : f32 to vector<16x16xf32>
    %354 = arith.select %3, %352, %353 : vector<16x16xi1>, vector<16x16xf32>
    %cst_129 = arith.constant dense<0.000000e+00> : vector<16xf32>
    %355 = vector.multi_reduction <add>, %354, %cst_129 [1] : vector<16x16xf32> to vector<16xf32>
    %356 = vector.shape_cast %355 : vector<16xf32> to vector<16x1xf32>
    %357 = vector.broadcast %356 : vector<16x1xf32> to vector<16x16xf32>
    %358 = arith.divf %354, %357 : vector<16x16xf32>
    %359 = vector.extract_strided_slice %255 {offsets = [0, 48], sizes = [16, 16], strides = [1, 1]} : vector<16x64xbf16> to vector<16x16xbf16>
    %360 = arith.truncf %358 : vector<16x16xf32> to vector<16x16xbf16>
    %cst_130 = arith.constant dense<0.000000e+00> : vector<16x16xf32>
    %361 = tpu.matmul %360, %359, %cst_130 {dimension_numbers = #tpu.dot_dimension_numbers<[1], [0], [0], [1], [0, 0, 1, 1], [], []>} : vector<16x16xbf16>, vector<16x16xbf16>, vector<16x16xf32> -> vector<16x16xf32>
    %362 = tpu.concatenate %283, %309, %335, %361 in 1 : vector<16x16xf32>, vector<16x16xf32>, vector<16x16xf32>, vector<16x16xf32> -> vector<16x64xf32>
    %363 = vector.broadcast %253 : vector<1x64xf32> to vector<16x64xf32>
    %364 = arith.addf %362, %363 : vector<16x64xf32>
    %cst_131 = arith.constant 0.000000e+00 : f32
    %365 = vector.broadcast %cst_131 : f32 to vector<16x64xf32>
    %366 = arith.maximumf %364, %365 : vector<16x64xf32>
    %367 = arith.truncf %366 : vector<16x64xf32> to vector<16x64xbf16>
    %c2 = arith.constant 2 : index
    %c0_132 = arith.constant 0 : index
    %c0_133 = arith.constant 0 : index
    %368 = vector.load %arg8[%c2, %c0_132, %c0_133] : memref<5x64x64xbf16, #tpu.memory_space<vmem>>, vector<1x64x64xbf16>
    %369 = vector.shape_cast %368 : vector<1x64x64xbf16> to vector<64x64xbf16>
    %c2_134 = arith.constant 2 : index
    %c0_135 = arith.constant 0 : index
    %c0_136 = arith.constant 0 : index
    %370 = vector.load %arg9[%c2_134, %c0_135, %c0_136] : memref<5x64x4xbf16, #tpu.memory_space<vmem>>, vector<1x64x4xbf16>
    %371 = vector.shape_cast %370 : vector<1x64x4xbf16> to vector<64x4xbf16>
    %c2_137 = arith.constant 2 : index
    %c0_138 = arith.constant 0 : index
    %c0_139 = arith.constant 0 : index
    %372 = vector.load %arg10[%c2_137, %c0_138, %c0_139] : memref<5x4x64xbf16, #tpu.memory_space<vmem>>, vector<1x4x64xbf16>
    %373 = vector.shape_cast %372 : vector<1x4x64xbf16> to vector<4x64xbf16>
    %c2_140 = arith.constant 2 : index
    %c0_141 = arith.constant 0 : index
    %c0_142 = arith.constant 0 : index
    %374 = vector.load %arg11[%c2_140, %c0_141, %c0_142] : memref<5x1x64xf32, #tpu.memory_space<vmem>>, vector<1x1x64xf32>
    %375 = vector.shape_cast %374 : vector<1x1x64xf32> to vector<1x64xf32>
    %cst_143 = arith.constant dense<0.000000e+00> : vector<16x64xf32>
    %376 = tpu.matmul %367, %369, %cst_143 {dimension_numbers = #tpu.dot_dimension_numbers<[1], [0], [0], [1], [0, 0, 1, 1], [], []>} : vector<16x64xbf16>, vector<64x64xbf16>, vector<16x64xf32> -> vector<16x64xf32>
    %377 = arith.truncf %376 : vector<16x64xf32> to vector<16x64xbf16>
    %cst_144 = arith.constant dense<0.000000e+00> : vector<16x4xf32>
    %378 = tpu.matmul %377, %371, %cst_144 {dimension_numbers = #tpu.dot_dimension_numbers<[1], [0], [0], [1], [0, 0, 1, 1], [], []>} : vector<16x64xbf16>, vector<64x4xbf16>, vector<16x4xf32> -> vector<16x4xf32>
    %cst_145 = arith.constant dense<0.000000e+00> : vector<4x16xf32>
    %379 = tpu.matmul %373, %377, %cst_145 {dimension_numbers = #tpu.dot_dimension_numbers<[1], [1], [0], [0], [0, 0, 1, 0], [], []>} : vector<4x64xbf16>, vector<16x64xbf16>, vector<4x16xf32> -> vector<4x16xf32>
    %380 = vector.extract_strided_slice %378 {offsets = [0, 0], sizes = [16, 1], strides = [1, 1]} : vector<16x4xf32> to vector<16x1xf32>
    %381 = vector.extract_strided_slice %379 {offsets = [0, 0], sizes = [1, 16], strides = [1, 1]} : vector<4x16xf32> to vector<1x16xf32>
    %382 = vector.broadcast %380 : vector<16x1xf32> to vector<16x16xf32>
    %383 = vector.broadcast %381 : vector<1x16xf32> to vector<16x16xf32>
    %384 = arith.addf %382, %383 : vector<16x16xf32>
    %cst_146 = arith.constant 0.000000e+00 : f32
    %385 = vector.broadcast %cst_146 : f32 to vector<16x16xf32>
    %386 = arith.cmpf ogt, %384, %385 : vector<16x16xf32>
    %cst_147 = arith.constant 2.000000e-01 : f32
    %387 = vector.broadcast %cst_147 : f32 to vector<16x16xf32>
    %388 = arith.mulf %387, %384 : vector<16x16xf32>
    %389 = arith.select %386, %384, %388 : vector<16x16xi1>, vector<16x16xf32>
    %cst_148 = arith.constant -1.000000e+30 : f32
    %390 = vector.broadcast %cst_148 : f32 to vector<16x16xf32>
    %391 = arith.select %3, %389, %390 : vector<16x16xi1>, vector<16x16xf32>
    %cst_149 = arith.constant dense<0xFF800000> : vector<16xf32>
    %392 = vector.multi_reduction <maximumf>, %391, %cst_149 [1] : vector<16x16xf32> to vector<16xf32>
    %393 = vector.shape_cast %392 : vector<16xf32> to vector<16x1xf32>
    %394 = vector.broadcast %393 : vector<16x1xf32> to vector<16x16xf32>
    %395 = arith.subf %391, %394 : vector<16x16xf32>
    %396 = math.exp %395 : vector<16x16xf32>
    %cst_150 = arith.constant 0.000000e+00 : f32
    %397 = vector.broadcast %cst_150 : f32 to vector<16x16xf32>
    %398 = arith.select %3, %396, %397 : vector<16x16xi1>, vector<16x16xf32>
    %cst_151 = arith.constant dense<0.000000e+00> : vector<16xf32>
    %399 = vector.multi_reduction <add>, %398, %cst_151 [1] : vector<16x16xf32> to vector<16xf32>
    %400 = vector.shape_cast %399 : vector<16xf32> to vector<16x1xf32>
    %401 = vector.broadcast %400 : vector<16x1xf32> to vector<16x16xf32>
    %402 = arith.divf %398, %401 : vector<16x16xf32>
    %403 = vector.extract_strided_slice %377 {offsets = [0, 0], sizes = [16, 16], strides = [1, 1]} : vector<16x64xbf16> to vector<16x16xbf16>
    %404 = arith.truncf %402 : vector<16x16xf32> to vector<16x16xbf16>
    %cst_152 = arith.constant dense<0.000000e+00> : vector<16x16xf32>
    %405 = tpu.matmul %404, %403, %cst_152 {dimension_numbers = #tpu.dot_dimension_numbers<[1], [0], [0], [1], [0, 0, 1, 1], [], []>} : vector<16x16xbf16>, vector<16x16xbf16>, vector<16x16xf32> -> vector<16x16xf32>
    %406 = vector.extract_strided_slice %378 {offsets = [0, 1], sizes = [16, 1], strides = [1, 1]} : vector<16x4xf32> to vector<16x1xf32>
    %407 = vector.extract_strided_slice %379 {offsets = [1, 0], sizes = [1, 16], strides = [1, 1]} : vector<4x16xf32> to vector<1x16xf32>
    %408 = vector.broadcast %406 : vector<16x1xf32> to vector<16x16xf32>
    %409 = vector.broadcast %407 : vector<1x16xf32> to vector<16x16xf32>
    %410 = arith.addf %408, %409 : vector<16x16xf32>
    %cst_153 = arith.constant 0.000000e+00 : f32
    %411 = vector.broadcast %cst_153 : f32 to vector<16x16xf32>
    %412 = arith.cmpf ogt, %410, %411 : vector<16x16xf32>
    %cst_154 = arith.constant 2.000000e-01 : f32
    %413 = vector.broadcast %cst_154 : f32 to vector<16x16xf32>
    %414 = arith.mulf %413, %410 : vector<16x16xf32>
    %415 = arith.select %412, %410, %414 : vector<16x16xi1>, vector<16x16xf32>
    %cst_155 = arith.constant -1.000000e+30 : f32
    %416 = vector.broadcast %cst_155 : f32 to vector<16x16xf32>
    %417 = arith.select %3, %415, %416 : vector<16x16xi1>, vector<16x16xf32>
    %cst_156 = arith.constant dense<0xFF800000> : vector<16xf32>
    %418 = vector.multi_reduction <maximumf>, %417, %cst_156 [1] : vector<16x16xf32> to vector<16xf32>
    %419 = vector.shape_cast %418 : vector<16xf32> to vector<16x1xf32>
    %420 = vector.broadcast %419 : vector<16x1xf32> to vector<16x16xf32>
    %421 = arith.subf %417, %420 : vector<16x16xf32>
    %422 = math.exp %421 : vector<16x16xf32>
    %cst_157 = arith.constant 0.000000e+00 : f32
    %423 = vector.broadcast %cst_157 : f32 to vector<16x16xf32>
    %424 = arith.select %3, %422, %423 : vector<16x16xi1>, vector<16x16xf32>
    %cst_158 = arith.constant dense<0.000000e+00> : vector<16xf32>
    %425 = vector.multi_reduction <add>, %424, %cst_158 [1] : vector<16x16xf32> to vector<16xf32>
    %426 = vector.shape_cast %425 : vector<16xf32> to vector<16x1xf32>
    %427 = vector.broadcast %426 : vector<16x1xf32> to vector<16x16xf32>
    %428 = arith.divf %424, %427 : vector<16x16xf32>
    %429 = vector.extract_strided_slice %377 {offsets = [0, 16], sizes = [16, 16], strides = [1, 1]} : vector<16x64xbf16> to vector<16x16xbf16>
    %430 = arith.truncf %428 : vector<16x16xf32> to vector<16x16xbf16>
    %cst_159 = arith.constant dense<0.000000e+00> : vector<16x16xf32>
    %431 = tpu.matmul %430, %429, %cst_159 {dimension_numbers = #tpu.dot_dimension_numbers<[1], [0], [0], [1], [0, 0, 1, 1], [], []>} : vector<16x16xbf16>, vector<16x16xbf16>, vector<16x16xf32> -> vector<16x16xf32>
    %432 = vector.extract_strided_slice %378 {offsets = [0, 2], sizes = [16, 1], strides = [1, 1]} : vector<16x4xf32> to vector<16x1xf32>
    %433 = vector.extract_strided_slice %379 {offsets = [2, 0], sizes = [1, 16], strides = [1, 1]} : vector<4x16xf32> to vector<1x16xf32>
    %434 = vector.broadcast %432 : vector<16x1xf32> to vector<16x16xf32>
    %435 = vector.broadcast %433 : vector<1x16xf32> to vector<16x16xf32>
    %436 = arith.addf %434, %435 : vector<16x16xf32>
    %cst_160 = arith.constant 0.000000e+00 : f32
    %437 = vector.broadcast %cst_160 : f32 to vector<16x16xf32>
    %438 = arith.cmpf ogt, %436, %437 : vector<16x16xf32>
    %cst_161 = arith.constant 2.000000e-01 : f32
    %439 = vector.broadcast %cst_161 : f32 to vector<16x16xf32>
    %440 = arith.mulf %439, %436 : vector<16x16xf32>
    %441 = arith.select %438, %436, %440 : vector<16x16xi1>, vector<16x16xf32>
    %cst_162 = arith.constant -1.000000e+30 : f32
    %442 = vector.broadcast %cst_162 : f32 to vector<16x16xf32>
    %443 = arith.select %3, %441, %442 : vector<16x16xi1>, vector<16x16xf32>
    %cst_163 = arith.constant dense<0xFF800000> : vector<16xf32>
    %444 = vector.multi_reduction <maximumf>, %443, %cst_163 [1] : vector<16x16xf32> to vector<16xf32>
    %445 = vector.shape_cast %444 : vector<16xf32> to vector<16x1xf32>
    %446 = vector.broadcast %445 : vector<16x1xf32> to vector<16x16xf32>
    %447 = arith.subf %443, %446 : vector<16x16xf32>
    %448 = math.exp %447 : vector<16x16xf32>
    %cst_164 = arith.constant 0.000000e+00 : f32
    %449 = vector.broadcast %cst_164 : f32 to vector<16x16xf32>
    %450 = arith.select %3, %448, %449 : vector<16x16xi1>, vector<16x16xf32>
    %cst_165 = arith.constant dense<0.000000e+00> : vector<16xf32>
    %451 = vector.multi_reduction <add>, %450, %cst_165 [1] : vector<16x16xf32> to vector<16xf32>
    %452 = vector.shape_cast %451 : vector<16xf32> to vector<16x1xf32>
    %453 = vector.broadcast %452 : vector<16x1xf32> to vector<16x16xf32>
    %454 = arith.divf %450, %453 : vector<16x16xf32>
    %455 = vector.extract_strided_slice %377 {offsets = [0, 32], sizes = [16, 16], strides = [1, 1]} : vector<16x64xbf16> to vector<16x16xbf16>
    %456 = arith.truncf %454 : vector<16x16xf32> to vector<16x16xbf16>
    %cst_166 = arith.constant dense<0.000000e+00> : vector<16x16xf32>
    %457 = tpu.matmul %456, %455, %cst_166 {dimension_numbers = #tpu.dot_dimension_numbers<[1], [0], [0], [1], [0, 0, 1, 1], [], []>} : vector<16x16xbf16>, vector<16x16xbf16>, vector<16x16xf32> -> vector<16x16xf32>
    %458 = vector.extract_strided_slice %378 {offsets = [0, 3], sizes = [16, 1], strides = [1, 1]} : vector<16x4xf32> to vector<16x1xf32>
    %459 = vector.extract_strided_slice %379 {offsets = [3, 0], sizes = [1, 16], strides = [1, 1]} : vector<4x16xf32> to vector<1x16xf32>
    %460 = vector.broadcast %458 : vector<16x1xf32> to vector<16x16xf32>
    %461 = vector.broadcast %459 : vector<1x16xf32> to vector<16x16xf32>
    %462 = arith.addf %460, %461 : vector<16x16xf32>
    %cst_167 = arith.constant 0.000000e+00 : f32
    %463 = vector.broadcast %cst_167 : f32 to vector<16x16xf32>
    %464 = arith.cmpf ogt, %462, %463 : vector<16x16xf32>
    %cst_168 = arith.constant 2.000000e-01 : f32
    %465 = vector.broadcast %cst_168 : f32 to vector<16x16xf32>
    %466 = arith.mulf %465, %462 : vector<16x16xf32>
    %467 = arith.select %464, %462, %466 : vector<16x16xi1>, vector<16x16xf32>
    %cst_169 = arith.constant -1.000000e+30 : f32
    %468 = vector.broadcast %cst_169 : f32 to vector<16x16xf32>
    %469 = arith.select %3, %467, %468 : vector<16x16xi1>, vector<16x16xf32>
    %cst_170 = arith.constant dense<0xFF800000> : vector<16xf32>
    %470 = vector.multi_reduction <maximumf>, %469, %cst_170 [1] : vector<16x16xf32> to vector<16xf32>
    %471 = vector.shape_cast %470 : vector<16xf32> to vector<16x1xf32>
    %472 = vector.broadcast %471 : vector<16x1xf32> to vector<16x16xf32>
    %473 = arith.subf %469, %472 : vector<16x16xf32>
    %474 = math.exp %473 : vector<16x16xf32>
    %cst_171 = arith.constant 0.000000e+00 : f32
    %475 = vector.broadcast %cst_171 : f32 to vector<16x16xf32>
    %476 = arith.select %3, %474, %475 : vector<16x16xi1>, vector<16x16xf32>
    %cst_172 = arith.constant dense<0.000000e+00> : vector<16xf32>
    %477 = vector.multi_reduction <add>, %476, %cst_172 [1] : vector<16x16xf32> to vector<16xf32>
    %478 = vector.shape_cast %477 : vector<16xf32> to vector<16x1xf32>
    %479 = vector.broadcast %478 : vector<16x1xf32> to vector<16x16xf32>
    %480 = arith.divf %476, %479 : vector<16x16xf32>
    %481 = vector.extract_strided_slice %377 {offsets = [0, 48], sizes = [16, 16], strides = [1, 1]} : vector<16x64xbf16> to vector<16x16xbf16>
    %482 = arith.truncf %480 : vector<16x16xf32> to vector<16x16xbf16>
    %cst_173 = arith.constant dense<0.000000e+00> : vector<16x16xf32>
    %483 = tpu.matmul %482, %481, %cst_173 {dimension_numbers = #tpu.dot_dimension_numbers<[1], [0], [0], [1], [0, 0, 1, 1], [], []>} : vector<16x16xbf16>, vector<16x16xbf16>, vector<16x16xf32> -> vector<16x16xf32>
    %484 = tpu.concatenate %405, %431, %457, %483 in 1 : vector<16x16xf32>, vector<16x16xf32>, vector<16x16xf32>, vector<16x16xf32> -> vector<16x64xf32>
    %485 = vector.broadcast %375 : vector<1x64xf32> to vector<16x64xf32>
    %486 = arith.addf %484, %485 : vector<16x64xf32>
    %cst_174 = arith.constant 0.000000e+00 : f32
    %487 = vector.broadcast %cst_174 : f32 to vector<16x64xf32>
    %488 = arith.maximumf %486, %487 : vector<16x64xf32>
    %489 = arith.truncf %488 : vector<16x64xf32> to vector<16x64xbf16>
    %c3 = arith.constant 3 : index
    %c0_175 = arith.constant 0 : index
    %c0_176 = arith.constant 0 : index
    %490 = vector.load %arg8[%c3, %c0_175, %c0_176] : memref<5x64x64xbf16, #tpu.memory_space<vmem>>, vector<1x64x64xbf16>
    %491 = vector.shape_cast %490 : vector<1x64x64xbf16> to vector<64x64xbf16>
    %c3_177 = arith.constant 3 : index
    %c0_178 = arith.constant 0 : index
    %c0_179 = arith.constant 0 : index
    %492 = vector.load %arg9[%c3_177, %c0_178, %c0_179] : memref<5x64x4xbf16, #tpu.memory_space<vmem>>, vector<1x64x4xbf16>
    %493 = vector.shape_cast %492 : vector<1x64x4xbf16> to vector<64x4xbf16>
    %c3_180 = arith.constant 3 : index
    %c0_181 = arith.constant 0 : index
    %c0_182 = arith.constant 0 : index
    %494 = vector.load %arg10[%c3_180, %c0_181, %c0_182] : memref<5x4x64xbf16, #tpu.memory_space<vmem>>, vector<1x4x64xbf16>
    %495 = vector.shape_cast %494 : vector<1x4x64xbf16> to vector<4x64xbf16>
    %c3_183 = arith.constant 3 : index
    %c0_184 = arith.constant 0 : index
    %c0_185 = arith.constant 0 : index
    %496 = vector.load %arg11[%c3_183, %c0_184, %c0_185] : memref<5x1x64xf32, #tpu.memory_space<vmem>>, vector<1x1x64xf32>
    %497 = vector.shape_cast %496 : vector<1x1x64xf32> to vector<1x64xf32>
    %cst_186 = arith.constant dense<0.000000e+00> : vector<16x64xf32>
    %498 = tpu.matmul %489, %491, %cst_186 {dimension_numbers = #tpu.dot_dimension_numbers<[1], [0], [0], [1], [0, 0, 1, 1], [], []>} : vector<16x64xbf16>, vector<64x64xbf16>, vector<16x64xf32> -> vector<16x64xf32>
    %499 = arith.truncf %498 : vector<16x64xf32> to vector<16x64xbf16>
    %cst_187 = arith.constant dense<0.000000e+00> : vector<16x4xf32>
    %500 = tpu.matmul %499, %493, %cst_187 {dimension_numbers = #tpu.dot_dimension_numbers<[1], [0], [0], [1], [0, 0, 1, 1], [], []>} : vector<16x64xbf16>, vector<64x4xbf16>, vector<16x4xf32> -> vector<16x4xf32>
    %cst_188 = arith.constant dense<0.000000e+00> : vector<4x16xf32>
    %501 = tpu.matmul %495, %499, %cst_188 {dimension_numbers = #tpu.dot_dimension_numbers<[1], [1], [0], [0], [0, 0, 1, 0], [], []>} : vector<4x64xbf16>, vector<16x64xbf16>, vector<4x16xf32> -> vector<4x16xf32>
    %502 = vector.extract_strided_slice %500 {offsets = [0, 0], sizes = [16, 1], strides = [1, 1]} : vector<16x4xf32> to vector<16x1xf32>
    %503 = vector.extract_strided_slice %501 {offsets = [0, 0], sizes = [1, 16], strides = [1, 1]} : vector<4x16xf32> to vector<1x16xf32>
    %504 = vector.broadcast %502 : vector<16x1xf32> to vector<16x16xf32>
    %505 = vector.broadcast %503 : vector<1x16xf32> to vector<16x16xf32>
    %506 = arith.addf %504, %505 : vector<16x16xf32>
    %cst_189 = arith.constant 0.000000e+00 : f32
    %507 = vector.broadcast %cst_189 : f32 to vector<16x16xf32>
    %508 = arith.cmpf ogt, %506, %507 : vector<16x16xf32>
    %cst_190 = arith.constant 2.000000e-01 : f32
    %509 = vector.broadcast %cst_190 : f32 to vector<16x16xf32>
    %510 = arith.mulf %509, %506 : vector<16x16xf32>
    %511 = arith.select %508, %506, %510 : vector<16x16xi1>, vector<16x16xf32>
    %cst_191 = arith.constant -1.000000e+30 : f32
    %512 = vector.broadcast %cst_191 : f32 to vector<16x16xf32>
    %513 = arith.select %3, %511, %512 : vector<16x16xi1>, vector<16x16xf32>
    %cst_192 = arith.constant dense<0xFF800000> : vector<16xf32>
    %514 = vector.multi_reduction <maximumf>, %513, %cst_192 [1] : vector<16x16xf32> to vector<16xf32>
    %515 = vector.shape_cast %514 : vector<16xf32> to vector<16x1xf32>
    %516 = vector.broadcast %515 : vector<16x1xf32> to vector<16x16xf32>
    %517 = arith.subf %513, %516 : vector<16x16xf32>
    %518 = math.exp %517 : vector<16x16xf32>
    %cst_193 = arith.constant 0.000000e+00 : f32
    %519 = vector.broadcast %cst_193 : f32 to vector<16x16xf32>
    %520 = arith.select %3, %518, %519 : vector<16x16xi1>, vector<16x16xf32>
    %cst_194 = arith.constant dense<0.000000e+00> : vector<16xf32>
    %521 = vector.multi_reduction <add>, %520, %cst_194 [1] : vector<16x16xf32> to vector<16xf32>
    %522 = vector.shape_cast %521 : vector<16xf32> to vector<16x1xf32>
    %523 = vector.broadcast %522 : vector<16x1xf32> to vector<16x16xf32>
    %524 = arith.divf %520, %523 : vector<16x16xf32>
    %525 = vector.extract_strided_slice %499 {offsets = [0, 0], sizes = [16, 16], strides = [1, 1]} : vector<16x64xbf16> to vector<16x16xbf16>
    %526 = arith.truncf %524 : vector<16x16xf32> to vector<16x16xbf16>
    %cst_195 = arith.constant dense<0.000000e+00> : vector<16x16xf32>
    %527 = tpu.matmul %526, %525, %cst_195 {dimension_numbers = #tpu.dot_dimension_numbers<[1], [0], [0], [1], [0, 0, 1, 1], [], []>} : vector<16x16xbf16>, vector<16x16xbf16>, vector<16x16xf32> -> vector<16x16xf32>
    %528 = vector.extract_strided_slice %500 {offsets = [0, 1], sizes = [16, 1], strides = [1, 1]} : vector<16x4xf32> to vector<16x1xf32>
    %529 = vector.extract_strided_slice %501 {offsets = [1, 0], sizes = [1, 16], strides = [1, 1]} : vector<4x16xf32> to vector<1x16xf32>
    %530 = vector.broadcast %528 : vector<16x1xf32> to vector<16x16xf32>
    %531 = vector.broadcast %529 : vector<1x16xf32> to vector<16x16xf32>
    %532 = arith.addf %530, %531 : vector<16x16xf32>
    %cst_196 = arith.constant 0.000000e+00 : f32
    %533 = vector.broadcast %cst_196 : f32 to vector<16x16xf32>
    %534 = arith.cmpf ogt, %532, %533 : vector<16x16xf32>
    %cst_197 = arith.constant 2.000000e-01 : f32
    %535 = vector.broadcast %cst_197 : f32 to vector<16x16xf32>
    %536 = arith.mulf %535, %532 : vector<16x16xf32>
    %537 = arith.select %534, %532, %536 : vector<16x16xi1>, vector<16x16xf32>
    %cst_198 = arith.constant -1.000000e+30 : f32
    %538 = vector.broadcast %cst_198 : f32 to vector<16x16xf32>
    %539 = arith.select %3, %537, %538 : vector<16x16xi1>, vector<16x16xf32>
    %cst_199 = arith.constant dense<0xFF800000> : vector<16xf32>
    %540 = vector.multi_reduction <maximumf>, %539, %cst_199 [1] : vector<16x16xf32> to vector<16xf32>
    %541 = vector.shape_cast %540 : vector<16xf32> to vector<16x1xf32>
    %542 = vector.broadcast %541 : vector<16x1xf32> to vector<16x16xf32>
    %543 = arith.subf %539, %542 : vector<16x16xf32>
    %544 = math.exp %543 : vector<16x16xf32>
    %cst_200 = arith.constant 0.000000e+00 : f32
    %545 = vector.broadcast %cst_200 : f32 to vector<16x16xf32>
    %546 = arith.select %3, %544, %545 : vector<16x16xi1>, vector<16x16xf32>
    %cst_201 = arith.constant dense<0.000000e+00> : vector<16xf32>
    %547 = vector.multi_reduction <add>, %546, %cst_201 [1] : vector<16x16xf32> to vector<16xf32>
    %548 = vector.shape_cast %547 : vector<16xf32> to vector<16x1xf32>
    %549 = vector.broadcast %548 : vector<16x1xf32> to vector<16x16xf32>
    %550 = arith.divf %546, %549 : vector<16x16xf32>
    %551 = vector.extract_strided_slice %499 {offsets = [0, 16], sizes = [16, 16], strides = [1, 1]} : vector<16x64xbf16> to vector<16x16xbf16>
    %552 = arith.truncf %550 : vector<16x16xf32> to vector<16x16xbf16>
    %cst_202 = arith.constant dense<0.000000e+00> : vector<16x16xf32>
    %553 = tpu.matmul %552, %551, %cst_202 {dimension_numbers = #tpu.dot_dimension_numbers<[1], [0], [0], [1], [0, 0, 1, 1], [], []>} : vector<16x16xbf16>, vector<16x16xbf16>, vector<16x16xf32> -> vector<16x16xf32>
    %554 = vector.extract_strided_slice %500 {offsets = [0, 2], sizes = [16, 1], strides = [1, 1]} : vector<16x4xf32> to vector<16x1xf32>
    %555 = vector.extract_strided_slice %501 {offsets = [2, 0], sizes = [1, 16], strides = [1, 1]} : vector<4x16xf32> to vector<1x16xf32>
    %556 = vector.broadcast %554 : vector<16x1xf32> to vector<16x16xf32>
    %557 = vector.broadcast %555 : vector<1x16xf32> to vector<16x16xf32>
    %558 = arith.addf %556, %557 : vector<16x16xf32>
    %cst_203 = arith.constant 0.000000e+00 : f32
    %559 = vector.broadcast %cst_203 : f32 to vector<16x16xf32>
    %560 = arith.cmpf ogt, %558, %559 : vector<16x16xf32>
    %cst_204 = arith.constant 2.000000e-01 : f32
    %561 = vector.broadcast %cst_204 : f32 to vector<16x16xf32>
    %562 = arith.mulf %561, %558 : vector<16x16xf32>
    %563 = arith.select %560, %558, %562 : vector<16x16xi1>, vector<16x16xf32>
    %cst_205 = arith.constant -1.000000e+30 : f32
    %564 = vector.broadcast %cst_205 : f32 to vector<16x16xf32>
    %565 = arith.select %3, %563, %564 : vector<16x16xi1>, vector<16x16xf32>
    %cst_206 = arith.constant dense<0xFF800000> : vector<16xf32>
    %566 = vector.multi_reduction <maximumf>, %565, %cst_206 [1] : vector<16x16xf32> to vector<16xf32>
    %567 = vector.shape_cast %566 : vector<16xf32> to vector<16x1xf32>
    %568 = vector.broadcast %567 : vector<16x1xf32> to vector<16x16xf32>
    %569 = arith.subf %565, %568 : vector<16x16xf32>
    %570 = math.exp %569 : vector<16x16xf32>
    %cst_207 = arith.constant 0.000000e+00 : f32
    %571 = vector.broadcast %cst_207 : f32 to vector<16x16xf32>
    %572 = arith.select %3, %570, %571 : vector<16x16xi1>, vector<16x16xf32>
    %cst_208 = arith.constant dense<0.000000e+00> : vector<16xf32>
    %573 = vector.multi_reduction <add>, %572, %cst_208 [1] : vector<16x16xf32> to vector<16xf32>
    %574 = vector.shape_cast %573 : vector<16xf32> to vector<16x1xf32>
    %575 = vector.broadcast %574 : vector<16x1xf32> to vector<16x16xf32>
    %576 = arith.divf %572, %575 : vector<16x16xf32>
    %577 = vector.extract_strided_slice %499 {offsets = [0, 32], sizes = [16, 16], strides = [1, 1]} : vector<16x64xbf16> to vector<16x16xbf16>
    %578 = arith.truncf %576 : vector<16x16xf32> to vector<16x16xbf16>
    %cst_209 = arith.constant dense<0.000000e+00> : vector<16x16xf32>
    %579 = tpu.matmul %578, %577, %cst_209 {dimension_numbers = #tpu.dot_dimension_numbers<[1], [0], [0], [1], [0, 0, 1, 1], [], []>} : vector<16x16xbf16>, vector<16x16xbf16>, vector<16x16xf32> -> vector<16x16xf32>
    %580 = vector.extract_strided_slice %500 {offsets = [0, 3], sizes = [16, 1], strides = [1, 1]} : vector<16x4xf32> to vector<16x1xf32>
    %581 = vector.extract_strided_slice %501 {offsets = [3, 0], sizes = [1, 16], strides = [1, 1]} : vector<4x16xf32> to vector<1x16xf32>
    %582 = vector.broadcast %580 : vector<16x1xf32> to vector<16x16xf32>
    %583 = vector.broadcast %581 : vector<1x16xf32> to vector<16x16xf32>
    %584 = arith.addf %582, %583 : vector<16x16xf32>
    %cst_210 = arith.constant 0.000000e+00 : f32
    %585 = vector.broadcast %cst_210 : f32 to vector<16x16xf32>
    %586 = arith.cmpf ogt, %584, %585 : vector<16x16xf32>
    %cst_211 = arith.constant 2.000000e-01 : f32
    %587 = vector.broadcast %cst_211 : f32 to vector<16x16xf32>
    %588 = arith.mulf %587, %584 : vector<16x16xf32>
    %589 = arith.select %586, %584, %588 : vector<16x16xi1>, vector<16x16xf32>
    %cst_212 = arith.constant -1.000000e+30 : f32
    %590 = vector.broadcast %cst_212 : f32 to vector<16x16xf32>
    %591 = arith.select %3, %589, %590 : vector<16x16xi1>, vector<16x16xf32>
    %cst_213 = arith.constant dense<0xFF800000> : vector<16xf32>
    %592 = vector.multi_reduction <maximumf>, %591, %cst_213 [1] : vector<16x16xf32> to vector<16xf32>
    %593 = vector.shape_cast %592 : vector<16xf32> to vector<16x1xf32>
    %594 = vector.broadcast %593 : vector<16x1xf32> to vector<16x16xf32>
    %595 = arith.subf %591, %594 : vector<16x16xf32>
    %596 = math.exp %595 : vector<16x16xf32>
    %cst_214 = arith.constant 0.000000e+00 : f32
    %597 = vector.broadcast %cst_214 : f32 to vector<16x16xf32>
    %598 = arith.select %3, %596, %597 : vector<16x16xi1>, vector<16x16xf32>
    %cst_215 = arith.constant dense<0.000000e+00> : vector<16xf32>
    %599 = vector.multi_reduction <add>, %598, %cst_215 [1] : vector<16x16xf32> to vector<16xf32>
    %600 = vector.shape_cast %599 : vector<16xf32> to vector<16x1xf32>
    %601 = vector.broadcast %600 : vector<16x1xf32> to vector<16x16xf32>
    %602 = arith.divf %598, %601 : vector<16x16xf32>
    %603 = vector.extract_strided_slice %499 {offsets = [0, 48], sizes = [16, 16], strides = [1, 1]} : vector<16x64xbf16> to vector<16x16xbf16>
    %604 = arith.truncf %602 : vector<16x16xf32> to vector<16x16xbf16>
    %cst_216 = arith.constant dense<0.000000e+00> : vector<16x16xf32>
    %605 = tpu.matmul %604, %603, %cst_216 {dimension_numbers = #tpu.dot_dimension_numbers<[1], [0], [0], [1], [0, 0, 1, 1], [], []>} : vector<16x16xbf16>, vector<16x16xbf16>, vector<16x16xf32> -> vector<16x16xf32>
    %606 = tpu.concatenate %527, %553, %579, %605 in 1 : vector<16x16xf32>, vector<16x16xf32>, vector<16x16xf32>, vector<16x16xf32> -> vector<16x64xf32>
    %607 = vector.broadcast %497 : vector<1x64xf32> to vector<16x64xf32>
    %608 = arith.addf %606, %607 : vector<16x64xf32>
    %cst_217 = arith.constant 0.000000e+00 : f32
    %609 = vector.broadcast %cst_217 : f32 to vector<16x64xf32>
    %610 = arith.maximumf %608, %609 : vector<16x64xf32>
    %611 = arith.truncf %610 : vector<16x64xf32> to vector<16x64xbf16>
    %c4 = arith.constant 4 : index
    %c0_218 = arith.constant 0 : index
    %c0_219 = arith.constant 0 : index
    %612 = vector.load %arg8[%c4, %c0_218, %c0_219] : memref<5x64x64xbf16, #tpu.memory_space<vmem>>, vector<1x64x64xbf16>
    %613 = vector.shape_cast %612 : vector<1x64x64xbf16> to vector<64x64xbf16>
    %c4_220 = arith.constant 4 : index
    %c0_221 = arith.constant 0 : index
    %c0_222 = arith.constant 0 : index
    %614 = vector.load %arg9[%c4_220, %c0_221, %c0_222] : memref<5x64x4xbf16, #tpu.memory_space<vmem>>, vector<1x64x4xbf16>
    %615 = vector.shape_cast %614 : vector<1x64x4xbf16> to vector<64x4xbf16>
    %c4_223 = arith.constant 4 : index
    %c0_224 = arith.constant 0 : index
    %c0_225 = arith.constant 0 : index
    %616 = vector.load %arg10[%c4_223, %c0_224, %c0_225] : memref<5x4x64xbf16, #tpu.memory_space<vmem>>, vector<1x4x64xbf16>
    %617 = vector.shape_cast %616 : vector<1x4x64xbf16> to vector<4x64xbf16>
    %c4_226 = arith.constant 4 : index
    %c0_227 = arith.constant 0 : index
    %c0_228 = arith.constant 0 : index
    %618 = vector.load %arg11[%c4_226, %c0_227, %c0_228] : memref<5x1x64xf32, #tpu.memory_space<vmem>>, vector<1x1x64xf32>
    %619 = vector.shape_cast %618 : vector<1x1x64xf32> to vector<1x64xf32>
    %cst_229 = arith.constant dense<0.000000e+00> : vector<16x64xf32>
    %620 = tpu.matmul %611, %613, %cst_229 {dimension_numbers = #tpu.dot_dimension_numbers<[1], [0], [0], [1], [0, 0, 1, 1], [], []>} : vector<16x64xbf16>, vector<64x64xbf16>, vector<16x64xf32> -> vector<16x64xf32>
    %621 = arith.truncf %620 : vector<16x64xf32> to vector<16x64xbf16>
    %cst_230 = arith.constant dense<0.000000e+00> : vector<16x4xf32>
    %622 = tpu.matmul %621, %615, %cst_230 {dimension_numbers = #tpu.dot_dimension_numbers<[1], [0], [0], [1], [0, 0, 1, 1], [], []>} : vector<16x64xbf16>, vector<64x4xbf16>, vector<16x4xf32> -> vector<16x4xf32>
    %cst_231 = arith.constant dense<0.000000e+00> : vector<4x16xf32>
    %623 = tpu.matmul %617, %621, %cst_231 {dimension_numbers = #tpu.dot_dimension_numbers<[1], [1], [0], [0], [0, 0, 1, 0], [], []>} : vector<4x64xbf16>, vector<16x64xbf16>, vector<4x16xf32> -> vector<4x16xf32>
    %624 = vector.extract_strided_slice %622 {offsets = [0, 0], sizes = [16, 1], strides = [1, 1]} : vector<16x4xf32> to vector<16x1xf32>
    %625 = vector.extract_strided_slice %623 {offsets = [0, 0], sizes = [1, 16], strides = [1, 1]} : vector<4x16xf32> to vector<1x16xf32>
    %626 = vector.broadcast %624 : vector<16x1xf32> to vector<16x16xf32>
    %627 = vector.broadcast %625 : vector<1x16xf32> to vector<16x16xf32>
    %628 = arith.addf %626, %627 : vector<16x16xf32>
    %cst_232 = arith.constant 0.000000e+00 : f32
    %629 = vector.broadcast %cst_232 : f32 to vector<16x16xf32>
    %630 = arith.cmpf ogt, %628, %629 : vector<16x16xf32>
    %cst_233 = arith.constant 2.000000e-01 : f32
    %631 = vector.broadcast %cst_233 : f32 to vector<16x16xf32>
    %632 = arith.mulf %631, %628 : vector<16x16xf32>
    %633 = arith.select %630, %628, %632 : vector<16x16xi1>, vector<16x16xf32>
    %cst_234 = arith.constant -1.000000e+30 : f32
    %634 = vector.broadcast %cst_234 : f32 to vector<16x16xf32>
    %635 = arith.select %3, %633, %634 : vector<16x16xi1>, vector<16x16xf32>
    %cst_235 = arith.constant dense<0xFF800000> : vector<16xf32>
    %636 = vector.multi_reduction <maximumf>, %635, %cst_235 [1] : vector<16x16xf32> to vector<16xf32>
    %637 = vector.shape_cast %636 : vector<16xf32> to vector<16x1xf32>
    %638 = vector.broadcast %637 : vector<16x1xf32> to vector<16x16xf32>
    %639 = arith.subf %635, %638 : vector<16x16xf32>
    %640 = math.exp %639 : vector<16x16xf32>
    %cst_236 = arith.constant 0.000000e+00 : f32
    %641 = vector.broadcast %cst_236 : f32 to vector<16x16xf32>
    %642 = arith.select %3, %640, %641 : vector<16x16xi1>, vector<16x16xf32>
    %cst_237 = arith.constant dense<0.000000e+00> : vector<16xf32>
    %643 = vector.multi_reduction <add>, %642, %cst_237 [1] : vector<16x16xf32> to vector<16xf32>
    %644 = vector.shape_cast %643 : vector<16xf32> to vector<16x1xf32>
    %645 = vector.broadcast %644 : vector<16x1xf32> to vector<16x16xf32>
    %646 = arith.divf %642, %645 : vector<16x16xf32>
    %647 = vector.extract_strided_slice %621 {offsets = [0, 0], sizes = [16, 16], strides = [1, 1]} : vector<16x64xbf16> to vector<16x16xbf16>
    %648 = arith.truncf %646 : vector<16x16xf32> to vector<16x16xbf16>
    %cst_238 = arith.constant dense<0.000000e+00> : vector<16x16xf32>
    %649 = tpu.matmul %648, %647, %cst_238 {dimension_numbers = #tpu.dot_dimension_numbers<[1], [0], [0], [1], [0, 0, 1, 1], [], []>} : vector<16x16xbf16>, vector<16x16xbf16>, vector<16x16xf32> -> vector<16x16xf32>
    %650 = vector.extract_strided_slice %622 {offsets = [0, 1], sizes = [16, 1], strides = [1, 1]} : vector<16x4xf32> to vector<16x1xf32>
    %651 = vector.extract_strided_slice %623 {offsets = [1, 0], sizes = [1, 16], strides = [1, 1]} : vector<4x16xf32> to vector<1x16xf32>
    %652 = vector.broadcast %650 : vector<16x1xf32> to vector<16x16xf32>
    %653 = vector.broadcast %651 : vector<1x16xf32> to vector<16x16xf32>
    %654 = arith.addf %652, %653 : vector<16x16xf32>
    %cst_239 = arith.constant 0.000000e+00 : f32
    %655 = vector.broadcast %cst_239 : f32 to vector<16x16xf32>
    %656 = arith.cmpf ogt, %654, %655 : vector<16x16xf32>
    %cst_240 = arith.constant 2.000000e-01 : f32
    %657 = vector.broadcast %cst_240 : f32 to vector<16x16xf32>
    %658 = arith.mulf %657, %654 : vector<16x16xf32>
    %659 = arith.select %656, %654, %658 : vector<16x16xi1>, vector<16x16xf32>
    %cst_241 = arith.constant -1.000000e+30 : f32
    %660 = vector.broadcast %cst_241 : f32 to vector<16x16xf32>
    %661 = arith.select %3, %659, %660 : vector<16x16xi1>, vector<16x16xf32>
    %cst_242 = arith.constant dense<0xFF800000> : vector<16xf32>
    %662 = vector.multi_reduction <maximumf>, %661, %cst_242 [1] : vector<16x16xf32> to vector<16xf32>
    %663 = vector.shape_cast %662 : vector<16xf32> to vector<16x1xf32>
    %664 = vector.broadcast %663 : vector<16x1xf32> to vector<16x16xf32>
    %665 = arith.subf %661, %664 : vector<16x16xf32>
    %666 = math.exp %665 : vector<16x16xf32>
    %cst_243 = arith.constant 0.000000e+00 : f32
    %667 = vector.broadcast %cst_243 : f32 to vector<16x16xf32>
    %668 = arith.select %3, %666, %667 : vector<16x16xi1>, vector<16x16xf32>
    %cst_244 = arith.constant dense<0.000000e+00> : vector<16xf32>
    %669 = vector.multi_reduction <add>, %668, %cst_244 [1] : vector<16x16xf32> to vector<16xf32>
    %670 = vector.shape_cast %669 : vector<16xf32> to vector<16x1xf32>
    %671 = vector.broadcast %670 : vector<16x1xf32> to vector<16x16xf32>
    %672 = arith.divf %668, %671 : vector<16x16xf32>
    %673 = vector.extract_strided_slice %621 {offsets = [0, 16], sizes = [16, 16], strides = [1, 1]} : vector<16x64xbf16> to vector<16x16xbf16>
    %674 = arith.truncf %672 : vector<16x16xf32> to vector<16x16xbf16>
    %cst_245 = arith.constant dense<0.000000e+00> : vector<16x16xf32>
    %675 = tpu.matmul %674, %673, %cst_245 {dimension_numbers = #tpu.dot_dimension_numbers<[1], [0], [0], [1], [0, 0, 1, 1], [], []>} : vector<16x16xbf16>, vector<16x16xbf16>, vector<16x16xf32> -> vector<16x16xf32>
    %676 = vector.extract_strided_slice %622 {offsets = [0, 2], sizes = [16, 1], strides = [1, 1]} : vector<16x4xf32> to vector<16x1xf32>
    %677 = vector.extract_strided_slice %623 {offsets = [2, 0], sizes = [1, 16], strides = [1, 1]} : vector<4x16xf32> to vector<1x16xf32>
    %678 = vector.broadcast %676 : vector<16x1xf32> to vector<16x16xf32>
    %679 = vector.broadcast %677 : vector<1x16xf32> to vector<16x16xf32>
    %680 = arith.addf %678, %679 : vector<16x16xf32>
    %cst_246 = arith.constant 0.000000e+00 : f32
    %681 = vector.broadcast %cst_246 : f32 to vector<16x16xf32>
    %682 = arith.cmpf ogt, %680, %681 : vector<16x16xf32>
    %cst_247 = arith.constant 2.000000e-01 : f32
    %683 = vector.broadcast %cst_247 : f32 to vector<16x16xf32>
    %684 = arith.mulf %683, %680 : vector<16x16xf32>
    %685 = arith.select %682, %680, %684 : vector<16x16xi1>, vector<16x16xf32>
    %cst_248 = arith.constant -1.000000e+30 : f32
    %686 = vector.broadcast %cst_248 : f32 to vector<16x16xf32>
    %687 = arith.select %3, %685, %686 : vector<16x16xi1>, vector<16x16xf32>
    %cst_249 = arith.constant dense<0xFF800000> : vector<16xf32>
    %688 = vector.multi_reduction <maximumf>, %687, %cst_249 [1] : vector<16x16xf32> to vector<16xf32>
    %689 = vector.shape_cast %688 : vector<16xf32> to vector<16x1xf32>
    %690 = vector.broadcast %689 : vector<16x1xf32> to vector<16x16xf32>
    %691 = arith.subf %687, %690 : vector<16x16xf32>
    %692 = math.exp %691 : vector<16x16xf32>
    %cst_250 = arith.constant 0.000000e+00 : f32
    %693 = vector.broadcast %cst_250 : f32 to vector<16x16xf32>
    %694 = arith.select %3, %692, %693 : vector<16x16xi1>, vector<16x16xf32>
    %cst_251 = arith.constant dense<0.000000e+00> : vector<16xf32>
    %695 = vector.multi_reduction <add>, %694, %cst_251 [1] : vector<16x16xf32> to vector<16xf32>
    %696 = vector.shape_cast %695 : vector<16xf32> to vector<16x1xf32>
    %697 = vector.broadcast %696 : vector<16x1xf32> to vector<16x16xf32>
    %698 = arith.divf %694, %697 : vector<16x16xf32>
    %699 = vector.extract_strided_slice %621 {offsets = [0, 32], sizes = [16, 16], strides = [1, 1]} : vector<16x64xbf16> to vector<16x16xbf16>
    %700 = arith.truncf %698 : vector<16x16xf32> to vector<16x16xbf16>
    %cst_252 = arith.constant dense<0.000000e+00> : vector<16x16xf32>
    %701 = tpu.matmul %700, %699, %cst_252 {dimension_numbers = #tpu.dot_dimension_numbers<[1], [0], [0], [1], [0, 0, 1, 1], [], []>} : vector<16x16xbf16>, vector<16x16xbf16>, vector<16x16xf32> -> vector<16x16xf32>
    %702 = vector.extract_strided_slice %622 {offsets = [0, 3], sizes = [16, 1], strides = [1, 1]} : vector<16x4xf32> to vector<16x1xf32>
    %703 = vector.extract_strided_slice %623 {offsets = [3, 0], sizes = [1, 16], strides = [1, 1]} : vector<4x16xf32> to vector<1x16xf32>
    %704 = vector.broadcast %702 : vector<16x1xf32> to vector<16x16xf32>
    %705 = vector.broadcast %703 : vector<1x16xf32> to vector<16x16xf32>
    %706 = arith.addf %704, %705 : vector<16x16xf32>
    %cst_253 = arith.constant 0.000000e+00 : f32
    %707 = vector.broadcast %cst_253 : f32 to vector<16x16xf32>
    %708 = arith.cmpf ogt, %706, %707 : vector<16x16xf32>
    %cst_254 = arith.constant 2.000000e-01 : f32
    %709 = vector.broadcast %cst_254 : f32 to vector<16x16xf32>
    %710 = arith.mulf %709, %706 : vector<16x16xf32>
    %711 = arith.select %708, %706, %710 : vector<16x16xi1>, vector<16x16xf32>
    %cst_255 = arith.constant -1.000000e+30 : f32
    %712 = vector.broadcast %cst_255 : f32 to vector<16x16xf32>
    %713 = arith.select %3, %711, %712 : vector<16x16xi1>, vector<16x16xf32>
    %cst_256 = arith.constant dense<0xFF800000> : vector<16xf32>
    %714 = vector.multi_reduction <maximumf>, %713, %cst_256 [1] : vector<16x16xf32> to vector<16xf32>
    %715 = vector.shape_cast %714 : vector<16xf32> to vector<16x1xf32>
    %716 = vector.broadcast %715 : vector<16x1xf32> to vector<16x16xf32>
    %717 = arith.subf %713, %716 : vector<16x16xf32>
    %718 = math.exp %717 : vector<16x16xf32>
    %cst_257 = arith.constant 0.000000e+00 : f32
    %719 = vector.broadcast %cst_257 : f32 to vector<16x16xf32>
    %720 = arith.select %3, %718, %719 : vector<16x16xi1>, vector<16x16xf32>
    %cst_258 = arith.constant dense<0.000000e+00> : vector<16xf32>
    %721 = vector.multi_reduction <add>, %720, %cst_258 [1] : vector<16x16xf32> to vector<16xf32>
    %722 = vector.shape_cast %721 : vector<16xf32> to vector<16x1xf32>
    %723 = vector.broadcast %722 : vector<16x1xf32> to vector<16x16xf32>
    %724 = arith.divf %720, %723 : vector<16x16xf32>
    %725 = vector.extract_strided_slice %621 {offsets = [0, 48], sizes = [16, 16], strides = [1, 1]} : vector<16x64xbf16> to vector<16x16xbf16>
    %726 = arith.truncf %724 : vector<16x16xf32> to vector<16x16xbf16>
    %cst_259 = arith.constant dense<0.000000e+00> : vector<16x16xf32>
    %727 = tpu.matmul %726, %725, %cst_259 {dimension_numbers = #tpu.dot_dimension_numbers<[1], [0], [0], [1], [0, 0, 1, 1], [], []>} : vector<16x16xbf16>, vector<16x16xbf16>, vector<16x16xf32> -> vector<16x16xf32>
    %728 = tpu.concatenate %649, %675, %701, %727 in 1 : vector<16x16xf32>, vector<16x16xf32>, vector<16x16xf32>, vector<16x16xf32> -> vector<16x64xf32>
    %729 = vector.broadcast %619 : vector<1x64xf32> to vector<16x64xf32>
    %730 = arith.addf %728, %729 : vector<16x64xf32>
    %cst_260 = arith.constant 0.000000e+00 : f32
    %731 = vector.broadcast %cst_260 : f32 to vector<16x64xf32>
    %732 = arith.maximumf %730, %731 : vector<16x64xf32>
    %733 = arith.truncf %732 : vector<16x64xf32> to vector<16x64xbf16>
    %734 = arith.extf %733 : vector<16x64xbf16> to vector<16x64xf32>
    %c0_261 = arith.constant 0 : index
    %c0_262 = arith.constant 0 : index
    %c0_263 = arith.constant 0 : index
    %735 = vector.load %arg3[%c0_261, %c0_262, %c0_263] : memref<1x16x8xf32, #tpu.memory_space<vmem>>, vector<1x16x8xf32>
    %736 = vector.shape_cast %735 : vector<1x16x8xf32> to vector<16x8xf32>
    %737 = vector.extract_strided_slice %736 {offsets = [0, 0], sizes = [16, 1], strides = [1, 1]} : vector<16x8xf32> to vector<16x1xf32>
    %cst_264 = arith.constant 0.000000e+00 : f32
    %738 = vector.broadcast %cst_264 : f32 to vector<16x1xf32>
    %739 = arith.cmpf ogt, %737, %738 : vector<16x1xf32>
    %cst_265 = arith.constant -1.000000e+30 : f32
    %740 = vector.shape_cast %739 : vector<16x1xi1> to vector<16x1xi1>
    %741 = vector.broadcast %740 : vector<16x1xi1> to vector<16x64xi1>
    %742 = vector.broadcast %cst_265 : f32 to vector<16x64xf32>
    %743 = arith.select %741, %734, %742 : vector<16x64xi1>, vector<16x64xf32>
    %cst_266 = arith.constant dense<0xFF800000> : vector<64xf32>
    %744 = vector.multi_reduction <maximumf>, %743, %cst_266 [0] : vector<16x64xf32> to vector<64xf32>
    %745 = vector.shape_cast %744 : vector<64xf32> to vector<1x64xf32>
    %746 = vector.extract_strided_slice %736 {offsets = [0, 1], sizes = [16, 1], strides = [1, 1]} : vector<16x8xf32> to vector<16x1xf32>
    %cst_267 = arith.constant 0.000000e+00 : f32
    %747 = vector.broadcast %cst_267 : f32 to vector<16x1xf32>
    %748 = arith.cmpf ogt, %746, %747 : vector<16x1xf32>
    %cst_268 = arith.constant -1.000000e+30 : f32
    %749 = vector.shape_cast %748 : vector<16x1xi1> to vector<16x1xi1>
    %750 = vector.broadcast %749 : vector<16x1xi1> to vector<16x64xi1>
    %751 = vector.broadcast %cst_268 : f32 to vector<16x64xf32>
    %752 = arith.select %750, %734, %751 : vector<16x64xi1>, vector<16x64xf32>
    %cst_269 = arith.constant dense<0xFF800000> : vector<64xf32>
    %753 = vector.multi_reduction <maximumf>, %752, %cst_269 [0] : vector<16x64xf32> to vector<64xf32>
    %754 = vector.shape_cast %753 : vector<64xf32> to vector<1x64xf32>
    %755 = vector.extract_strided_slice %736 {offsets = [0, 2], sizes = [16, 1], strides = [1, 1]} : vector<16x8xf32> to vector<16x1xf32>
    %cst_270 = arith.constant 0.000000e+00 : f32
    %756 = vector.broadcast %cst_270 : f32 to vector<16x1xf32>
    %757 = arith.cmpf ogt, %755, %756 : vector<16x1xf32>
    %cst_271 = arith.constant -1.000000e+30 : f32
    %758 = vector.shape_cast %757 : vector<16x1xi1> to vector<16x1xi1>
    %759 = vector.broadcast %758 : vector<16x1xi1> to vector<16x64xi1>
    %760 = vector.broadcast %cst_271 : f32 to vector<16x64xf32>
    %761 = arith.select %759, %734, %760 : vector<16x64xi1>, vector<16x64xf32>
    %cst_272 = arith.constant dense<0xFF800000> : vector<64xf32>
    %762 = vector.multi_reduction <maximumf>, %761, %cst_272 [0] : vector<16x64xf32> to vector<64xf32>
    %763 = vector.shape_cast %762 : vector<64xf32> to vector<1x64xf32>
    %764 = vector.extract_strided_slice %736 {offsets = [0, 3], sizes = [16, 1], strides = [1, 1]} : vector<16x8xf32> to vector<16x1xf32>
    %cst_273 = arith.constant 0.000000e+00 : f32
    %765 = vector.broadcast %cst_273 : f32 to vector<16x1xf32>
    %766 = arith.cmpf ogt, %764, %765 : vector<16x1xf32>
    %cst_274 = arith.constant -1.000000e+30 : f32
    %767 = vector.shape_cast %766 : vector<16x1xi1> to vector<16x1xi1>
    %768 = vector.broadcast %767 : vector<16x1xi1> to vector<16x64xi1>
    %769 = vector.broadcast %cst_274 : f32 to vector<16x64xf32>
    %770 = arith.select %768, %734, %769 : vector<16x64xi1>, vector<16x64xf32>
    %cst_275 = arith.constant dense<0xFF800000> : vector<64xf32>
    %771 = vector.multi_reduction <maximumf>, %770, %cst_275 [0] : vector<16x64xf32> to vector<64xf32>
    %772 = vector.shape_cast %771 : vector<64xf32> to vector<1x64xf32>
    %773 = vector.extract_strided_slice %736 {offsets = [0, 4], sizes = [16, 1], strides = [1, 1]} : vector<16x8xf32> to vector<16x1xf32>
    %cst_276 = arith.constant 0.000000e+00 : f32
    %774 = vector.broadcast %cst_276 : f32 to vector<16x1xf32>
    %775 = arith.cmpf ogt, %773, %774 : vector<16x1xf32>
    %cst_277 = arith.constant -1.000000e+30 : f32
    %776 = vector.shape_cast %775 : vector<16x1xi1> to vector<16x1xi1>
    %777 = vector.broadcast %776 : vector<16x1xi1> to vector<16x64xi1>
    %778 = vector.broadcast %cst_277 : f32 to vector<16x64xf32>
    %779 = arith.select %777, %734, %778 : vector<16x64xi1>, vector<16x64xf32>
    %cst_278 = arith.constant dense<0xFF800000> : vector<64xf32>
    %780 = vector.multi_reduction <maximumf>, %779, %cst_278 [0] : vector<16x64xf32> to vector<64xf32>
    %781 = vector.shape_cast %780 : vector<64xf32> to vector<1x64xf32>
    %782 = vector.extract_strided_slice %736 {offsets = [0, 5], sizes = [16, 1], strides = [1, 1]} : vector<16x8xf32> to vector<16x1xf32>
    %cst_279 = arith.constant 0.000000e+00 : f32
    %783 = vector.broadcast %cst_279 : f32 to vector<16x1xf32>
    %784 = arith.cmpf ogt, %782, %783 : vector<16x1xf32>
    %cst_280 = arith.constant -1.000000e+30 : f32
    %785 = vector.shape_cast %784 : vector<16x1xi1> to vector<16x1xi1>
    %786 = vector.broadcast %785 : vector<16x1xi1> to vector<16x64xi1>
    %787 = vector.broadcast %cst_280 : f32 to vector<16x64xf32>
    %788 = arith.select %786, %734, %787 : vector<16x64xi1>, vector<16x64xf32>
    %cst_281 = arith.constant dense<0xFF800000> : vector<64xf32>
    %789 = vector.multi_reduction <maximumf>, %788, %cst_281 [0] : vector<16x64xf32> to vector<64xf32>
    %790 = vector.shape_cast %789 : vector<64xf32> to vector<1x64xf32>
    %791 = vector.extract_strided_slice %736 {offsets = [0, 6], sizes = [16, 1], strides = [1, 1]} : vector<16x8xf32> to vector<16x1xf32>
    %cst_282 = arith.constant 0.000000e+00 : f32
    %792 = vector.broadcast %cst_282 : f32 to vector<16x1xf32>
    %793 = arith.cmpf ogt, %791, %792 : vector<16x1xf32>
    %cst_283 = arith.constant -1.000000e+30 : f32
    %794 = vector.shape_cast %793 : vector<16x1xi1> to vector<16x1xi1>
    %795 = vector.broadcast %794 : vector<16x1xi1> to vector<16x64xi1>
    %796 = vector.broadcast %cst_283 : f32 to vector<16x64xf32>
    %797 = arith.select %795, %734, %796 : vector<16x64xi1>, vector<16x64xf32>
    %cst_284 = arith.constant dense<0xFF800000> : vector<64xf32>
    %798 = vector.multi_reduction <maximumf>, %797, %cst_284 [0] : vector<16x64xf32> to vector<64xf32>
    %799 = vector.shape_cast %798 : vector<64xf32> to vector<1x64xf32>
    %800 = vector.extract_strided_slice %736 {offsets = [0, 7], sizes = [16, 1], strides = [1, 1]} : vector<16x8xf32> to vector<16x1xf32>
    %cst_285 = arith.constant 0.000000e+00 : f32
    %801 = vector.broadcast %cst_285 : f32 to vector<16x1xf32>
    %802 = arith.cmpf ogt, %800, %801 : vector<16x1xf32>
    %cst_286 = arith.constant -1.000000e+30 : f32
    %803 = vector.shape_cast %802 : vector<16x1xi1> to vector<16x1xi1>
    %804 = vector.broadcast %803 : vector<16x1xi1> to vector<16x64xi1>
    %805 = vector.broadcast %cst_286 : f32 to vector<16x64xf32>
    %806 = arith.select %804, %734, %805 : vector<16x64xi1>, vector<16x64xf32>
    %cst_287 = arith.constant dense<0xFF800000> : vector<64xf32>
    %807 = vector.multi_reduction <maximumf>, %806, %cst_287 [0] : vector<16x64xf32> to vector<64xf32>
    %808 = vector.shape_cast %807 : vector<64xf32> to vector<1x64xf32>
    %809 = tpu.concatenate %745, %754, %763, %772, %781, %790, %799, %808 in 0 : vector<1x64xf32>, vector<1x64xf32>, vector<1x64xf32>, vector<1x64xf32>, vector<1x64xf32>, vector<1x64xf32>, vector<1x64xf32>, vector<1x64xf32> -> vector<8x64xf32>
    %810 = arith.truncf %809 : vector<8x64xf32> to vector<8x64xbf16>
    %c0_288 = arith.constant 0 : index
    %c0_289 = arith.constant 0 : index
    %811 = vector.load %arg12[%c0_288, %c0_289] : memref<64x128xbf16, #tpu.memory_space<vmem>>, vector<64x128xbf16>
    %cst_290 = arith.constant dense<0.000000e+00> : vector<8x128xf32>
    %812 = tpu.matmul %810, %811, %cst_290 {dimension_numbers = #tpu.dot_dimension_numbers<[1], [0], [0], [1], [0, 0, 1, 1], [], []>} : vector<8x64xbf16>, vector<64x128xbf16>, vector<8x128xf32> -> vector<8x128xf32>
    %c0_291 = arith.constant 0 : index
    %c0_292 = arith.constant 0 : index
    %813 = vector.load %arg13[%c0_291, %c0_292] : memref<1x128xf32, #tpu.memory_space<vmem>>, vector<1x128xf32>
    %814 = vector.broadcast %813 : vector<1x128xf32> to vector<8x128xf32>
    %815 = arith.addf %812, %814 : vector<8x128xf32>
    %cst_293 = arith.constant 0.000000e+00 : f32
    %816 = vector.broadcast %cst_293 : f32 to vector<8x128xf32>
    %817 = arith.maximumf %815, %816 : vector<8x128xf32>
    %818 = arith.truncf %817 : vector<8x128xf32> to vector<8x128xbf16>
    %c0_294 = arith.constant 0 : index
    %c0_295 = arith.constant 0 : index
    %819 = vector.load %arg14[%c0_294, %c0_295] : memref<128x128xbf16, #tpu.memory_space<vmem>>, vector<128x128xbf16>
    %cst_296 = arith.constant dense<0.000000e+00> : vector<8x128xf32>
    %820 = tpu.matmul %818, %819, %cst_296 {dimension_numbers = #tpu.dot_dimension_numbers<[1], [0], [0], [1], [0, 0, 1, 1], [], []>} : vector<8x128xbf16>, vector<128x128xbf16>, vector<8x128xf32> -> vector<8x128xf32>
    %c0_297 = arith.constant 0 : index
    %c0_298 = arith.constant 0 : index
    %821 = vector.load %arg15[%c0_297, %c0_298] : memref<1x128xf32, #tpu.memory_space<vmem>>, vector<1x128xf32>
    %822 = vector.broadcast %821 : vector<1x128xf32> to vector<8x128xf32>
    %823 = arith.addf %820, %822 : vector<8x128xf32>
    %c0_299 = arith.constant 0 : index
    %c0_300 = arith.constant 0 : index
    %c0_301 = arith.constant 0 : index
    %824 = vector.load %arg16[%c0_299, %c0_300, %c0_301] : memref<1x8x128xf32, #tpu.memory_space<vmem>>, vector<1x8x128xf32>
    %825 = vector.shape_cast %824 : vector<1x8x128xf32> to vector<8x128xf32>
    %826 = vector.shape_cast %823 : vector<8x128xf32> to vector<1x8x128xf32>
    tpu.vector_store %arg16[%c0_299, %c0_300, %c0_301], %826 {strides = array<i32>} : memref<1x8x128xf32, #tpu.memory_space<vmem>>, vector<1x8x128xf32>,
    return
  }
  func.func @transform_0(%arg0: i32) -> (i32, i32, i32) {
    %c0_i32 = arith.constant 0 : i32
    %c0_i32_0 = arith.constant 0 : i32
    %c0_i32_1 = arith.constant 0 : i32
    return %arg0, %c0_i32, %c0_i32_0 : i32, i32, i32
  }
  func.func @transform_1(%arg0: i32) -> (i32, i32, i32) {
    %c0_i32 = arith.constant 0 : i32
    %c0_i32_0 = arith.constant 0 : i32
    %c0_i32_1 = arith.constant 0 : i32
    return %arg0, %c0_i32, %c0_i32_0 : i32, i32, i32
  }
  func.func @transform_2(%arg0: i32) -> (i32, i32, i32) {
    %c0_i32 = arith.constant 0 : i32
    %c0_i32_0 = arith.constant 0 : i32
    %c0_i32_1 = arith.constant 0 : i32
    return %arg0, %c0_i32, %c0_i32_0 : i32, i32, i32
  }
  func.func @transform_3(%arg0: i32) -> (i32, i32) {
    %c0_i32 = arith.constant 0 : i32
    %c0_i32_0 = arith.constant 0 : i32
    %c0_i32_1 = arith.constant 0 : i32
    return %c0_i32, %c0_i32_0 : i32, i32
  }
  func.func @transform_4(%arg0: i32) -> (i32, i32) {
    %c0_i32 = arith.constant 0 : i32
    %c0_i32_0 = arith.constant 0 : i32
    %c0_i32_1 = arith.constant 0 : i32
    return %c0_i32, %c0_i32_0 : i32, i32
  }
  func.func @transform_5(%arg0: i32) -> (i32, i32) {
    %c0_i32 = arith.constant 0 : i32
    %c0_i32_0 = arith.constant 0 : i32
    %c0_i32_1 = arith.constant 0 : i32
    return %c0_i32, %c0_i32_0 : i32, i32
  }
  func.func @transform_6(%arg0: i32) -> (i32, i32) {
    %c0_i32 = arith.constant 0 : i32
    %c0_i32_0 = arith.constant 0 : i32
    %c0_i32_1 = arith.constant 0 : i32
    return %c0_i32, %c0_i32_0 : i32, i32
  }
  func.func @transform_7(%arg0: i32) -> (i32, i32, i32) {
    %c0_i32 = arith.constant 0 : i32
    %c0_i32_0 = arith.constant 0 : i32
    %c0_i32_1 = arith.constant 0 : i32
    %c0_i32_2 = arith.constant 0 : i32
    return %c0_i32, %c0_i32_0, %c0_i32_1 : i32, i32, i32
  }
  func.func @transform_8(%arg0: i32) -> (i32, i32, i32) {
    %c0_i32 = arith.constant 0 : i32
    %c0_i32_0 = arith.constant 0 : i32
    %c0_i32_1 = arith.constant 0 : i32
    %c0_i32_2 = arith.constant 0 : i32
    return %c0_i32, %c0_i32_0, %c0_i32_1 : i32, i32, i32
  }
  func.func @transform_9(%arg0: i32) -> (i32, i32, i32) {
    %c0_i32 = arith.constant 0 : i32
    %c0_i32_0 = arith.constant 0 : i32
    %c0_i32_1 = arith.constant 0 : i32
    %c0_i32_2 = arith.constant 0 : i32
    return %c0_i32, %c0_i32_0, %c0_i32_1 : i32, i32, i32
  }
  func.func @transform_10(%arg0: i32) -> (i32, i32, i32) {
    %c0_i32 = arith.constant 0 : i32
    %c0_i32_0 = arith.constant 0 : i32
    %c0_i32_1 = arith.constant 0 : i32
    %c0_i32_2 = arith.constant 0 : i32
    return %c0_i32, %c0_i32_0, %c0_i32_1 : i32, i32, i32
  }
  func.func @transform_11(%arg0: i32) -> (i32, i32) {
    %c0_i32 = arith.constant 0 : i32
    %c0_i32_0 = arith.constant 0 : i32
    %c0_i32_1 = arith.constant 0 : i32
    return %c0_i32, %c0_i32_0 : i32, i32
  }
  func.func @transform_12(%arg0: i32) -> (i32, i32) {
    %c0_i32 = arith.constant 0 : i32
    %c0_i32_0 = arith.constant 0 : i32
    %c0_i32_1 = arith.constant 0 : i32
    return %c0_i32, %c0_i32_0 : i32, i32
  }
  func.func @transform_13(%arg0: i32) -> (i32, i32) {
    %c0_i32 = arith.constant 0 : i32
    %c0_i32_0 = arith.constant 0 : i32
    %c0_i32_1 = arith.constant 0 : i32
    return %c0_i32, %c0_i32_0 : i32, i32
  }
  func.func @transform_14(%arg0: i32) -> (i32, i32) {
    %c0_i32 = arith.constant 0 : i32
    %c0_i32_0 = arith.constant 0 : i32
    %c0_i32_1 = arith.constant 0 : i32
    return %c0_i32, %c0_i32_0 : i32, i32
  }
  func.func @transform_15(%arg0: i32) -> (i32, i32, i32) {
    %c0_i32 = arith.constant 0 : i32
    %c0_i32_0 = arith.constant 0 : i32
    %c0_i32_1 = arith.constant 0 : i32
    return %arg0, %c0_i32, %c0_i32_0 : i32, i32, i32
  }
}

</mosaic_0001>

<bundles_post_ra>
// kernel: tpu_custom_call.1
= control target key start
LH: loop header
LB: loop body
LE: loop exit
PB: predicated region body
PF: predicated region fallthrough
CT: control target
= control target key end

     0   :  { %s7358_s0 = inlined_call_operand.vmem [shape: f32[2,16,16], index: 0, kind: input, shape index: {}]   ;;  %s7359_s1 = inlined_call_operand.vmem [shape: bf16[2,16,128], index: 1, kind: input, shape index: {}]   ;;  %s7360_s2 = inlined_call_operand.vmem [shape: f32[2,16,8], index: 2, kind: input, shape index: {}]   ;;  %s7361_s3 = inlined_call_operand.vmem [shape: bf16[128,64], index: 3, kind: input, shape index: {}]   ;;  %s7362_s4 = inlined_call_operand.vmem [shape: bf16[64,4], index: 4, kind: input, shape index: {}]   ;;  %s7363_s5 = inlined_call_operand.hbm [shape: bf16[4,64], index: 5, kind: input, shape index: {}]   ;;  %s7364_s6 = inlined_call_operand.hbm [shape: f32[1,64], index: 6, kind: input, shape index: {}]   ;;  %s7365_s7 = inlined_call_operand.vmem [shape: bf16[5,64,64], index: 7, kind: input, shape index: {}]   ;;  %s7366_s8 = inlined_call_operand.vmem [shape: bf16[5,64,4], index: 8, kind: input, shape index: {}]   ;;  %s7367_s9 = inlined_call_operand.vmem [shape: bf16[5,4,64], index: 9, kind: input, shape index: {}]   ;;  %s7368_s10 = inlined_call_operand.vmem [shape: f32[5,1,64], index: 10, kind: input, shape index: {}]   ;;  %s7369_s11 = inlined_call_operand.vmem [shape: bf16[64,128], index: 11, kind: input, shape index: {}]   ;;  %s7370_s12 = inlined_call_operand.vmem [shape: f32[1,128], index: 12, kind: input, shape index: {}]   ;;  %s7371_s13 = inlined_call_operand.vmem [shape: bf16[128,128], index: 13, kind: input, shape index: {}]   ;;  %s7372_s14 = inlined_call_operand.vmem [shape: f32[1,128], index: 14, kind: input, shape index: {}]   ;;  %s7373_s15 = inlined_call_operand.hbm [shape: f32[2,8,128], index: 15, kind: output, shape index: {}]  }
   0x1   :  { %7382 = sst [smem:[#allocation16_spill]] %s7363_s5 }
   0x2   :  { %7383 = sst [smem:[#allocation17_spill]] %s7364_s6 }
   0x3   :  { %20 = vsyncpa [#allocation3], 0 }
   0x4   :  { %21 = vsyncpa [#allocation6], 0 }
   0x5   :  { %22 = vsyncpa [#allocation4], 0 }
   0x6   :  { %24 = vsyncpa [#allocation4 + $0x1], 0  ;;  %s6121_s18 = smov 0   ;;  %s6123_s19 = smov 0  }
   0x7   :  { %s6125_s20 = smov 0   ;;  %s6127_s21 = smov 0  }
   0x8 LB: > { %7384 = sst [smem:[#allocation11_spill]] %s6008_s18  ;;  %s6142_s22 = sadd.s32 4294967295, %s6020_s21   ;;  %s6020_s21 = sphi %s6127_s21, %s7404_s21   ;;  %s6016_s20 = sphi %s6125_s20, %s7406_s20   ;;  %s6012_s19 = sphi %s6123_s19, %s7408_s19   ;;  %s6008_s18 = sphi %s6121_s18, %s7407_s18  }
   0x9   : > { %7385 = sst [smem:[#allocation12_spill]] %s6016_s20  ;;  %s4801_s23 = sadd.s32 4294967294, %s6020_s21  }
   0xa   : > { %s6146_s24 = sadd.s32 1, %s6020_s21   ;;  %s367_s25 = sadd.s32 1, %s6016_s20 }
   0xb   : > { %7386 = sst [smem:[#allocation13_spill]] %s6146_s24  ;;  %s364_s26 = ssub.s32 %s6020_s21, %s6146_s24 }
   0xc   : > { %p377_p0 = scmp.ne.s32.totalorder %s6016_s20, %s6012_s19  ;;  %p365_p1 = scmp.eq.s32.totalorder %s364_s26, 0 }
   0xd   : > { %p378_p2 = scmp.eq.s32.totalorder %s6142_s22, 1  ;;  %p383_p3 = scmp.ne.s32.totalorder %s6012_s19, %s6008_s18 }
   0xe   : > { %p384_p4 = scmp.eq.s32.totalorder %s4801_s23, 1  ;;  %p4802_p7 = scmp.ge.s32.totalorder %s6020_s21, 1 }
   0xf   : > { %s6157_s27 = scalar_select %p365_p1, %s6016_s20, %s367_s25  }
  0x10   : > { %p6159_p5 = por %p378_p2, %p377_p0  ;;  %p6163_p6 = por %p384_p4, %p383_p3 }
  0x11   : > { %7387 = sst [smem:[#allocation14_spill]] %s6157_s27  ;;  %p391_p8 = scmp.lt.s32.totalorder %s6020_s21, 3 }
  0x12   : > { %s7388_s28 = scalar_select %p6159_p5, 1, 0 }
  0x13   : > { %s7389_s29 = scalar_select %p6163_p6, 1, 0 }
  0x14   : > { %p7375_p9 = scmp.eq.s32.totalorder %s6142_s22, 0  ;;  %p6170_p10 = pnand %p4802_p7, %p391_p8 }
  0x15   : > { %7390 = sst [smem:[#allocation15_spill]] %s7389_s29  ;;  %s6022_s16 = smov [#allocation2]  }
  0x16   : > { %s410_s17 = sshll.u32 %s6022_s16, 4  ;;  %p5522_p11 = pneg %p6170_p10  ;;  %s411_s17 = int_to_ptr.vmem [resolvable:$true] %s410_s17 }
  0x17   : > { %s6023_s23 = smov [#allocation5]   ;;  %s5911_s27 = scalar_lea.vmem %s411_s17, 32 }
  0x18   : > { %s421_s25 = sshll.u32 %s6023_s23, 4  ;;  %p6178_p12 = pnand %p7375_p9, %p5522_p11  ;;  %s422_s25 = int_to_ptr.vmem [resolvable:$true] %s421_s25 }
  0x19   : > { %p5912_p0 = scmp.ne.s32.totalorder %s411_s17, %s5911_s27  ;;  %p5919_p3 = scmp.lt.s32.totalorder %s411_s17, %s411_s17 }
  0x1a   : > { %p5902_p13 = pneg %p6178_p12  ;;  %p5920_p4 = scmp.lt.s32.totalorder %s5911_s27, %s5911_s27 }
  0x1c   : > { %p5914_p1 = pnand %p5912_p0, %p5902_p13  ;;  %p5921_p7 = por %p5920_p4, %p5919_p3 }
  0x1e   : > { %p5915_p2 = pneg %p5914_p1 }
  0x20   : > { %p5922_p8 = pnand %p5921_p7, %p5915_p2 }
  0x22   : > { %5925 = shalt.err (!%p5922_p8)
}
  0x23   : > { %s7393_s5 = sld [smem:[#allocation16_spill]]  ;;  %s5937_s20 = scalar_lea.vmem %s422_s25, 16 }
  0x24   : > { %p5938_p11 = scmp.ne.s32.totalorder %s422_s25, %s5937_s20  ;;  %s5944_s24 = scalar_lea.vmem %s422_s25, 32 }
  0x25   : > { %p5945_p0 = scmp.lt.s32.totalorder %s422_s25, %s422_s25  ;;  %p5946_p1 = scmp.lt.s32.totalorder %s5944_s24, %s5937_s20 }
  0x26   : > { %p5940_p9 = pnand %p5938_p11, %p5902_p13 }
  0x27   : > { %p5947_p5 = por %p5946_p1, %p5945_p0 }
  0x28   : > { %p5941_p6 = pneg %p5940_p9 }
  0x29   : > { %5525 = dma.hbm_to_vmem [thread:$0]  (!%p6178_p12), %s7393_s5, 32, %s411_s17, [#allocation3]  }
  0x2a   : > { %p5948_p3 = pnand %p5947_p5, %p5941_p6 }
  0x2c   : > { %5951 = shalt.err (!%p5948_p3)
}
  0x2d   : > { %s7394_s6 = sld [smem:[#allocation17_spill]]  ;;  %p7395_p2 = scmp.eq.s32.totalorder (!%p6170_p10), %s6142_s22, 0 }
  0x2f   : > { %482 = sbr.rel (%p6170_p10) target bundleno = 7584 (0x1da0), region = 80 }
  0x33   : > { %5528 = dma.hbm_to_vmem [thread:$0]  (!%p6178_p12), %s7394_s6, 16, %s422_s25, [#allocation6]  }
  0x34   : > { %5995 = dma.done.wait (%p7395_p2), [#allocation3], 32   ;;  %p7396_p9 = pmov %p7395_p2 }
  0x35   : > { %p7397_p13 = pmov %p7395_p2 }
  0x36   : > { %5997 = vsyncadd (%p7396_p9), [#allocation3], 4294967264 }
  0x37   : > { %5999 = dma.done.wait (%p7397_p13), [#allocation6], 16   ;;  %p7398_p5 = pmov %p7395_p2 }
  0x38   : > { %v6024_v0 = vmov 0.0   ;;  %vm6025_vm0 = vmmov 0   ;;  %p544_p6 = scmp.lt.s32.totalorder %s6142_s22, 1  ;;  %v6026_v1 = vmov 0   ;;  %v5643_v2 = vld [vmem:[%s7361_s3 + $0x38] sm:$0xff]   ;;  %v5644_v3 = vld [vmem:[%s7361_s3 + $0x30] sm:$0xff]   ;;  %v810_v33 = vlaneseq }
  0x39   : > { %6001 = vsyncadd (%p7398_p5), [#allocation6], 4294967280  ;;  %5148 = vmatprep.subr.bf16.mxu0 %v6024_v0  ;;  %5164 = vmatprep.mubr.msk.bf16.mxu0 %vm6025_vm0, %v6024_v0  ;;  %v5645_v4 = vld [vmem:[%s7361_s3 + $0x28] sm:$0xff]   ;;  %v5646_v5 = vld [vmem:[%s7361_s3 + $0x20] sm:$0xff]   ;;  %v6027_v15 = vmov 1   ;;  %vm712_vm1 = vcmask 523264  }
  0x3a   : > { %5168 = vmatprep.subr.bf16.mxu1 %v6024_v0  ;;  %5176 = vmatprep.mubr.msk.bf16.mxu1 %vm6025_vm0, %v6024_v0  ;;  %s6222_s29 = scalar_select %p544_p6, %s6142_s22, 1  ;;  %v5652_v6 = vld [vmem:[%s7362_s4 + $0x18] sm:$0xff]   ;;  %v5653_v8 = vld [vmem:[%s7362_s4 + $0x10] sm:$0xff]   ;;  %v5654_v9 = vld [vmem:[%s7362_s4 + $0x8] sm:$0xff]   ;;  %v6028_v28 = vmov 2   ;;  %v6029_v31 = vmov 3  }
  0x3b   : > { %5588 = vset.pattern.permute.xlu0 %v6026_v1  ;;  %5149 = vmatpush3.bf16.msra.mxu0 %v5643_v2  ;;  %v5647_v7 = vld [vmem:[%s7361_s3 + $0x18] sm:$0xff]   ;;  %v5648_v10 = vld [vmem:[%s7361_s3 + $0x10] sm:$0xff]   ;;  %v5649_v11 = vld [vmem:[%s7361_s3 + $0x8] sm:$0xff]   ;;  %v811_v34 = vshrl.u32 %v810_v33, 7  ;;  %vm824_vm5 = vcmask 130048   ;;  %s6030_s23 = smov 112  }
  0x3c   : > { %5150 = vmatprep.subr.bf16.mxu0 %v6024_v0  ;;  %s5008_s25 = sshll.u32 %s6222_s29, 3  ;;  %5169 = vmatpush3.bf16.msra.mxu1 %v5652_v6  ;;  %v5650_v12 = vld [vmem:[%s7361_s3] sm:$0xff]   ;;  %s6031_s27 = smov 80   ;;  %vm1203_vm13 = vcmask 261120   ;;  %vm1206_vm14 = vcmask 392192  }
  0x3d   : > { %s553_s20 = scalar_lea.vmem %s7359_s1, %s5008_s25  ;;  %5170 = vmatprep.subr.bf16.mxu1 %v6024_v0  ;;  %v5655_v14 = vld [vmem:[%s7362_s4] sm:$0xff]   ;;  %5589 = vset.pattern.permute.xlu1 %v6027_v15  ;;  %v6299_v35 = vsub.s32 1, %v811_v34  ;;  %v6301_v36 = vsub.s32 0, %v811_v34  ;;  %v6317_v49 = vsub.s32 2, %v811_v34  ;;  %v6327_v63 = vsub.s32 3, %v811_v34  ;;  %s6032_s6 = smov 96  }
  0x3e   : > { %v5651_v13 = vld [vmem:[%s553_s20] sm:$0xff]   ;;  %s7381_s20 = sshll.u32 %s6222_s29, 4  ;;  %s6033_s5 = smov 16  }
  0x3f   : > { %5151 = vmatpush3.bf16.msra.mxu0 %v5644_v3  ;;  %v590_v22 = vld [vmem:[#allocation2] sm:$0x3]  ;;  %s548_s25 = scalar_lea.vmem %s7358_s0, %s7381_s20  ;;  %s6034_s24 = smov 32  }
  0x40   : > { %5152 = vmatprep.subr.bf16.mxu0 %v6024_v0  ;;  %5171 = vmatpush3.bf16.msra.mxu1 %v5653_v8  ;;  %v6312_v39 = vld [vmem:[%s548_s25] sm:$0xff]  ;;  %v6314_v44 = vld [vmem:[%s548_s25 + $0x8] sm:$0xff]  ;;  %s6035_s26 = smov 48   ;;  %s5004_s16 = sshll.u32 %s6142_s22, 7 }
  0x41   : > { %5172 = vmatprep.subr.bf16.mxu1 %v6024_v0  ;;  %vm562_vm2 = vcmp.gt.f32.partialorder %v6312_v39, 0.0  ;;  %vm563_vm6 = vcmp.gt.f32.partialorder %v6314_v44, 0.0  ;;  %s7317_s30 = scalar_lea.hbm %s7373_s15, %s5004_s16  ;;  %p7400_p12 = scmp.ne.s32.totalorder %s7388_s28, 0 }
  0x42   : > { %s6040_s22 = smov [#allocation7]  }
  0x43   : > { %5153 = vmatpush3.bf16.msra.mxu0 %v5645_v4 }
  0x44   : > { %5154 = vmatprep.subr.bf16.mxu0 %v6024_v0  ;;  %5173 = vmatpush3.bf16.msra.mxu1 %v5654_v9 }
  0x45   : > { %5174 = vmatprep.subr.bf16.mxu1 %v6024_v0 }
  0x47   : > { %5155 = vmatpush3.bf16.msra.mxu0 %v5646_v5 }
  0x48   : > { %5156 = vmatprep.subr.bf16.mxu0 %v6024_v0  ;;  %5175 = vmatpush3.bf16.msra.mxu1 %v5655_v14 }
  0x49   : > { %5186 = vmatprep.subr.bf16.mxu1 %v6024_v0 }
  0x4b   : > { %5157 = vmatpush3.bf16.msra.mxu0 %v5647_v7 }
  0x4c   : > { %5158 = vmatprep.subr.bf16.mxu0 %v6024_v0 }
  0x4f   : > { %5159 = vmatpush3.bf16.msra.mxu0 %v5648_v10 }
  0x50   : > { %5160 = vmatprep.subr.bf16.mxu0 %v6024_v0 }
  0x53   : > { %5161 = vmatpush3.bf16.msra.mxu0 %v5649_v11 }
  0x54   : > { %5162 = vmatprep.subr.bf16.mxu0 %v6024_v0 }
  0x57   : > { %5163 = vmatpush3.bf16.msra.mxu0 %v5650_v12 }
  0x58   : > { %5180 = vmatprep.subr.bf16.mxu0 %v6024_v0 }
  0x5a   : > { %5165 = vmatmul.mubr.bf16.vlgmr.msra.gmra.mxu0 %v5651_v13 }
  0x5b   : > { %5182 = vmatprep.mubr.msk.bf16.mxu0 %vm6025_vm0, %v6024_v0 }
 0x11a   : > { %v680_v16 = vpop.f32.mrf.mxu0 }
 0x11c   : > { %v5166_v17 = vpop.f32.mrf.mxu0 }
 0x11e   : > { %v683_v18 = vpop.f32.mrf.mxu0 }
 0x11f   : > { %v6276_v19 = vpack.c.bf16 %v683_v18, %v680_v16 }
 0x120   : > { %v5167_v20 = vpop.f32.mrf.mxu0 }
 0x121   : > { %5177 = vmatmul.mubr.msk.bf16.vlgmr.msra.gmra.mxu1 %vm712_vm1, %v6276_v19  ;;  %v714_v21 = vsel %vm712_vm1, %v6276_v19, 0 }
 0x122   : > { %5187 = vmatpush3.bf16.msra.mxu1 %v6276_v19  ;;  %5181 = vmatpush3.bf16.xpose.msra.mxu0 %v714_v21 }
 0x123   : > { %5192 = vmatprep.subr.bf16.mxu0 %v6024_v0  ;;  %5188 = vmatprep.mubr.msk.bf16.mxu1 %vm6025_vm0, %v6024_v0 }
 0x124   : > { %5198 = vmatprep.subr.bf16.mxu1 %v6024_v0 }
 0x129   : > { %5183 = vmatmul.mubr.msk.bf16.vlgmr.msra.gmra.mxu0 %vm712_vm1, %v590_v22 }
 0x12a   : > { %5194 = vmatprep.mubr.msk.bf16.mxu0 %vm6025_vm0, %v6024_v0 }
 0x1e1   : > { %v750_v23 = vpop.f32.mrf.mxu1 }
 0x1e2   : > { %895 = vperm.xlu1 %5589, %v750_v23   ;;  %802 = vperm.xlu0 %5588, %v750_v23  }
 0x1e3   : > { %v5178_v24 = vpop.f32.mrf.mxu1 }
 0x1e5   : > { %v753_v25 = vpop.f32.mrf.mxu1 }
 0x1e6   : > { %899 = vperm.xlu1 %5589, %v753_v25   ;;  %807 = vperm.xlu0 %5588, %v753_v25  }
 0x1e7   : > { %v5179_v26 = vpop.f32.mrf.mxu1 }
 0x1e9   : > { %v6290_v27 = vpop.f32.mrf.mxu0 }
 0x1ea   : > { %5591 = vset.pattern.permute.xlu1 %v6028_v28  ;;  %5590 = vset.pattern.permute.xlu0 %v6028_v28  ;;  %v905_v37 = vrot.slane %v6290_v27, %v6299_v35  ;;  %v813_v38 = vrot.slane %v6290_v27, %v6301_v36  ;;  %v1000_v58 = vrot.slane %v6290_v27, %v6317_v49 }
 0x1eb   : > { %994 = vperm.xlu1 %5591, %v753_v25   ;;  %990 = vperm.xlu0 %5590, %v750_v23   ;;  %v5184_v29 = vpop.f32.mrf.mxu0  ;;  %v1094_v11 = vrot.slane %v6290_v27, %v6327_v63 }
 0x1ed   : > { %v797_v30 = vpop.f32.mrf.mxu0 }
 0x1ef   : > { %5592 = vset.pattern.permute.xlu1 %v6029_v31  ;;  %5593 = vset.pattern.permute.xlu0 %v6029_v31  ;;  %v5185_v32 = vpop.f32.mrf.mxu0 }
 0x1f0   : > { %1084 = vperm.xlu1 %5592, %v750_v23   ;;  %1088 = vperm.xlu0 %5593, %v753_v25  }
 0x1f4   : > { %5594 = vset.pattern.permute.xlu1 %v6026_v1  ;;  %5596 = vset.pattern.permute.xlu0 %v6026_v1 }
 0x25d   : > { %v896_v40 = vpop.permute.xlu1 %895  ;;  %v803_v41 = vpop.permute.xlu0 %802 }
 0x25e   : > { %v906_v42 = vadd.f32 %v905_v37, %v896_v40  ;;  %v814_v43 = vadd.f32 %v813_v38, %v803_v41 }
 0x260   : > { %v910_v45 = vmul.f32 0.2, %v906_v42  ;;  %v818_v46 = vmul.f32 0.2, %v814_v43  ;;  %vm816_vm3 = vcmp.gt.f32.partialorder %v814_v43, 0.0  ;;  %vm908_vm4 = vcmp.gt.f32.partialorder %v906_v42, 0.0 }
 0x261   : > { %v900_v47 = vpop.permute.xlu1 %899  ;;  %v808_v48 = vpop.permute.xlu0 %807 }
 0x262   : > { %v907_v50 = vadd.f32 %v905_v37, %v900_v47  ;;  %v815_v51 = vadd.f32 %v813_v38, %v808_v48  ;;  %v820_v52 = vsel %vm816_vm3, %v814_v43, %v818_v46  ;;  %v912_v53 = vsel %vm908_vm4, %v906_v42, %v910_v45 }
 0x263   : > { %v822_v54 = vsel %vm562_vm2, %v820_v52, -1e+30  ;;  %v914_v59 = vsel %vm562_vm2, %v912_v53, -1e+30 }
 0x264   : > { %v911_v55 = vmul.f32 0.2, %v907_v50  ;;  %v819_v56 = vmul.f32 0.2, %v815_v51  ;;  %v825_v57 = vsel %vm824_vm5, %v822_v54, -inf  ;;  %vm817_vm7 = vcmp.gt.f32.partialorder %v815_v51, 0.0 }
 0x265   : > { %826 = vmax.xlane.f32.xlu1 %v825_v57  ;;  %vm909_vm8 = vcmp.gt.f32.partialorder %v907_v50, 0.0  ;;  %v916_v7 = vsel %vm824_vm5, %v914_v59, -inf }
 0x266   : > { %v995_v60 = vpop.permute.xlu1 %994  ;;  %v991_v61 = vpop.permute.xlu0 %990  ;;  %v821_v62 = vsel %vm817_vm7, %v815_v51, %v819_v56  ;;  %v913_v2 = vsel %vm909_vm8, %v907_v50, %v911_v55 }
 0x267   : > { %v1002_v3 = vadd.f32 %v1000_v58, %v995_v60  ;;  %v1001_v4 = vadd.f32 %v1000_v58, %v991_v61  ;;  %v823_v5 = vsel %vm563_vm6, %v821_v62, -1e+30  ;;  %v915_v8 = vsel %vm563_vm6, %v913_v2, -1e+30 }
 0x268   : > { %v828_v6 = vsel %vm824_vm5, %v823_v5, -inf  ;;  %v919_v20 = vsel %vm824_vm5, %v915_v8, -inf }
 0x269   : > { %v1006_v9 = vmul.f32 0.2, %v1002_v3  ;;  %v1005_v10 = vmul.f32 0.2, %v1001_v4  ;;  %829 = vmax.xlane.f32.xlu0 %v828_v6  ;;  %917 = vmax.xlane.f32.xlu1 %v916_v7  ;;  %vm1003_vm9 = vcmp.gt.f32.partialorder %v1001_v4, 0.0  ;;  %vm1004_vm10 = vcmp.gt.f32.partialorder %v1002_v3, 0.0 }
 0x26b   : > { %v1085_v12 = vpop.permute.xlu1 %1084  ;;  %v1089_v13 = vpop.permute.xlu0 %1088  ;;  %v1007_v14 = vsel %vm1003_vm9, %v1001_v4, %v1005_v10  ;;  %v1008_v16 = vsel %vm1004_vm10, %v1002_v3, %v1006_v9 }
 0x26c   : > { %v1095_v17 = vadd.f32 %v1094_v11, %v1085_v12  ;;  %v1096_v18 = vadd.f32 %v1094_v11, %v1089_v13  ;;  %v1009_v21 = vsel %vm562_vm2, %v1007_v14, -1e+30  ;;  %v1010_v23 = vsel %vm563_vm6, %v1008_v16, -1e+30 }
 0x26d   : > { %920 = vmax.xlane.f32.xlu0 %v919_v20  ;;  %v1011_v22 = vsel %vm824_vm5, %v1009_v21, -inf  ;;  %v1014_v26 = vsel %vm824_vm5, %v1010_v23, -inf }
 0x26e   : > { %v1099_v24 = vmul.f32 0.2, %v1095_v17  ;;  %v1100_v25 = vmul.f32 0.2, %v1096_v18  ;;  %1012 = vmax.xlane.f32.xlu1 %v1011_v22  ;;  %vm1097_vm11 = vcmp.gt.f32.partialorder %v1095_v17, 0.0  ;;  %vm1098_vm12 = vcmp.gt.f32.partialorder %v1096_v18, 0.0 }
 0x270   : > { %v1101_v27 = vsel %vm1097_vm11, %v1095_v17, %v1099_v24  ;;  %v1102_v29 = vsel %vm1098_vm12, %v1096_v18, %v1100_v25 }
 0x271   : > { %1015 = vmax.xlane.f32.xlu0 %v1014_v26  ;;  %v1103_v30 = vsel %vm562_vm2, %v1101_v27, -1e+30  ;;  %v1104_v32 = vsel %vm563_vm6, %v1102_v29, -1e+30 }
 0x272   : > { %v1105_v33 = vsel %vm824_vm5, %v1103_v30, -inf  ;;  %v1108_v34 = vsel %vm824_vm5, %v1104_v32, -inf }
 0x273   : > { %1106 = vmax.xlane.f32.xlu1 %v1105_v33 }
 0x275   : > { %1109 = vmax.xlane.f32.xlu0 %v1108_v34 }
 0x284   : > { %942 = vrot.lane.b32.xlu1 %v6276_v19, %s6030_s23 }
 0x2ee   : > { %v827_v37 = vpop.xlane.xlu1 %826 }
 0x2ef   : > { %v831_v38 = vsub.f32 %v822_v54, %v827_v37 }
 0x2f1   : > { %v833_v40 = vmul.f32 1.442695, %v831_v38 }
 0x2f2   : > { %v830_v41 = vpop.xlane.xlu0 %829  ;;  %v918_v42 = vpop.xlane.xlu1 %917 }
 0x2f3   : > { %5708 = vpow2.f32 %v833_v40  ;;  %v832_v43 = vsub.f32 %v823_v5, %v830_v41  ;;  %v922_v45 = vsub.f32 %v914_v59, %v918_v42 }
 0x2f5   : > { %v835_v46 = vmul.f32 1.442695, %v832_v43  ;;  %v924_v47 = vmul.f32 1.442695, %v922_v45 }
 0x2f6   : > { %v921_v48 = vpop.xlane.xlu0 %920 }
 0x2f7   : > { %5710 = vpow2.f32 %v835_v46  ;;  %v923_v50 = vsub.f32 %v915_v8, %v921_v48  ;;  %v1013_v51 = vpop.xlane.xlu1 %1012 }
 0x2f8   : > { %5712 = vpow2.f32 %v924_v47  ;;  %v1017_v52 = vsub.f32 %v1009_v21, %v1013_v51 }
 0x2f9   : > { %v926_v53 = vmul.f32 1.442695, %v923_v50 }
 0x2fa   : > { %v1019_v55 = vmul.f32 1.442695, %v1017_v52  ;;  %v1016_v56 = vpop.xlane.xlu0 %1015 }
 0x2fb   : > { %5714 = vpow2.f32 %v926_v53  ;;  %v1018_v57 = vsub.f32 %v1010_v23, %v1016_v56 }
 0x2fc   : > { %5716 = vpow2.f32 %v1019_v55  ;;  %v1107_v54 = vpop.xlane.xlu1 %1106 }
 0x2fd   : > { %v1021_v58 = vmul.f32 1.442695, %v1018_v57  ;;  %v1111_v60 = vsub.f32 %v1103_v30, %v1107_v54 }
 0x2fe   : > { %v1110_v61 = vpop.xlane.xlu0 %1109 }
 0x2ff   : > { %5718 = vpow2.f32 %v1021_v58  ;;  %v1113_v59 = vmul.f32 1.442695, %v1111_v60  ;;  %v1112_v62 = vsub.f32 %v1104_v32, %v1110_v61 }
 0x300   : > { %v5709_v2 = vpop.eup %5708  ;;  %v943_v3 = vpop.permute.xlu1 %942 }
 0x301   : > { %5720 = vpow2.f32 %v1113_v59  ;;  %v1115_v4 = vmul.f32 1.442695, %v1112_v62  ;;  %5193 = vmatpush3.bf16.msra.mxu0 %v943_v3  ;;  %v837_v5 = vsel %vm562_vm2, %v5709_v2, 0.0 }
 0x302   : > { %v839_v6 = vsel %vm824_vm5, %v837_v5, 0.0  ;;  %5204 = vmatprep.subr.bf16.mxu0 %v6024_v0 }
 0x303   : > { %5722 = vpow2.f32 %v1115_v4  ;;  %840 = vadd.xlane.f32.xlu1 %v839_v6  ;;  %v5657_v6 = vld [vmem:[%s7365_s7 + $0x10] sm:$0xff]  }
 0x304   : > { %v5711_v7 = vpop.eup %5710 }
 0x305   : > { %v5713_v8 = vpop.eup %5712  ;;  %v838_v9 = vsel %vm563_vm6, %v5711_v7, 0.0 }
 0x306   : > { %v842_v10 = vsel %vm824_vm5, %v838_v9, 0.0  ;;  %v928_v11 = vsel %vm562_vm2, %v5713_v8, 0.0 }
 0x307   : > { %843 = vadd.xlane.f32.xlu0 %v842_v10  ;;  %v930_v12 = vsel %vm824_vm5, %v928_v11, 0.0 }
 0x308   : > { %v5715_v13 = vpop.eup %5714  ;;  %931 = vadd.xlane.f32.xlu1 %v930_v12 }
 0x309   : > { %v5717_v14 = vpop.eup %5716  ;;  %v929_v16 = vsel %vm563_vm6, %v5715_v13, 0.0 }
 0x30a   : > { %v933_v17 = vsel %vm824_vm5, %v929_v16, 0.0  ;;  %v1023_v18 = vsel %vm562_vm2, %v5717_v14, 0.0  ;;  %v5659_v14 = vld [vmem:[%s7365_s7] sm:$0xff]  }
 0x30b   : > { %934 = vadd.xlane.f32.xlu0 %v933_v17  ;;  %v1025_v20 = vsel %vm824_vm5, %v1023_v18, 0.0 }
 0x30c   : > { %v5719_v21 = vpop.eup %5718  ;;  %1026 = vadd.xlane.f32.xlu1 %v1025_v20 }
 0x30d   : > { %v1024_v22 = vsel %vm563_vm6, %v5719_v21, 0.0  ;;  %v5660_v21 = vld [vmem:[%s7366_s8 + $0x18] sm:$0xff]  }
 0x30e   : > { %v5721_v23 = vpop.eup %5720  ;;  %v1028_v24 = vsel %vm824_vm5, %v1024_v22, 0.0 }
 0x30f   : > { %1029 = vadd.xlane.f32.xlu0 %v1028_v24  ;;  %v1117_v25 = vsel %vm562_vm2, %v5721_v23, 0.0 }
 0x310   : > { %v5723_v26 = vpop.eup %5722  ;;  %v1119_v27 = vsel %vm824_vm5, %v1117_v25, 0.0 }
 0x311   : > { %1120 = vadd.xlane.f32.xlu1 %v1119_v27  ;;  %v1118_v29 = vsel %vm563_vm6, %v5723_v26, 0.0  ;;  %v5661_v26 = vld [vmem:[%s7366_s8 + $0x10] sm:$0xff]  }
 0x312   : > { %v1122_v30 = vsel %vm824_vm5, %v1118_v29, 0.0 }
 0x313   : > { %1123 = vadd.xlane.f32.xlu0 %v1122_v30  ;;  %v5662_v30 = vld [vmem:[%s7366_s8 + $0x8] sm:$0xff]  }
 0x322   : > { %1130 = vrot.lane.b32.xlu1 %v6276_v19, %s6031_s27 }
 0x329   : > { %1036 = vrot.lane.b32.xlu0 %v6276_v19, %s6032_s6 }
 0x38c   : > { %v841_v32 = vpop.xlane.xlu1 %840 }
 0x38d   : > { %5724 = vrcp.f32 %v841_v32 }
 0x390   : > { %v844_v33 = vpop.xlane.xlu0 %843 }
 0x391   : > { %5726 = vrcp.f32 %v844_v33  ;;  %v932_v34 = vpop.xlane.xlu1 %931 }
 0x392   : > { %5728 = vrcp.f32 %v932_v34 }
 0x394   : > { %v935_v37 = vpop.xlane.xlu0 %934 }
 0x395   : > { %5730 = vrcp.f32 %v935_v37  ;;  %v1027_v38 = vpop.xlane.xlu1 %1026 }
 0x396   : > { %5732 = vrcp.f32 %v1027_v38 }
 0x398   : > { %v1030_v40 = vpop.xlane.xlu0 %1029 }
 0x399   : > { %5734 = vrcp.f32 %v1030_v40 }
 0x39a   : > { %v1121_v41 = vpop.xlane.xlu1 %1120  ;;  %v5725_v42 = vpop.eup %5724 }
 0x39b   : > { %5736 = vrcp.f32 %v1121_v41  ;;  %v846_v46 = vmul.f32 %v5725_v42, %v837_v5  ;;  %v5656_v5 = vld [vmem:[%s7365_s7 + $0x18] sm:$0xff]   ;;  %v4835_v42 = vld [vmem:[#allocation5] ss:$0 sm:$0xff] }
 0x39c   : > { %v1124_v43 = vpop.xlane.xlu0 %1123 }
 0x39d   : > { %5738 = vrcp.f32 %v1124_v43 }
 0x39e   : > { %v5727_v45 = vpop.eup %5726  ;;  %v1131_v54 = vpop.permute.xlu1 %1130 }
 0x39f   : > { %v848_v19 = vmul.f32 %v5727_v45, %v838_v9  ;;  %v5729_v47 = vpop.eup %5728  ;;  %v5658_v9 = vld [vmem:[%s7365_s7 + $0x8] sm:$0xff]  }
 0x3a0   : > { %v1037_v51 = vpop.permute.xlu0 %1036  ;;  %v937_v52 = vmul.f32 %v5729_v47, %v928_v11 }
 0x3a1   : > { %v849_v48 = vpack.c.bf16 %v848_v19, %v846_v46 }
 0x3a2   : > { %v5731_v50 = vpop.eup %5730 }
 0x3a3   : > { %5189 = vmatmul.mubr.msk.bf16.vlgmr.msra.gmra.mxu1 %vm824_vm5, %v849_v48  ;;  %v939_v53 = vmul.f32 %v5731_v50, %v929_v16  ;;  %v5733_v55 = vpop.eup %5732 }
 0x3a4   : > { %5199 = vmatpush3.bf16.msra.mxu1 %v1037_v51  ;;  %5200 = vmatprep.mubr.msk.bf16.mxu1 %vm6025_vm0, %v6024_v0  ;;  %v1032_v58 = vmul.f32 %v5733_v55, %v1023_v18  ;;  %v5663_v55 = vld [vmem:[%s7366_s8] sm:$0xff]  }
 0x3a5   : > { %v940_v56 = vpack.c.bf16 %v939_v53, %v937_v52  ;;  %5210 = vmatprep.subr.bf16.mxu1 %v6024_v0 }
 0x3a6   : > { %v5735_v57 = vpop.eup %5734 }
 0x3a7   : > { %5195 = vmatmul.mubr.msk.bf16.vlgmr.msra.gmra.mxu0 %vm824_vm5, %v940_v56  ;;  %v1034_v60 = vmul.f32 %v5735_v57, %v1024_v22 }
 0x3a8   : > { %v5737_v61 = vpop.eup %5736  ;;  %5205 = vmatpush3.bf16.msra.mxu0 %v1131_v54  ;;  %5206 = vmatprep.mubr.msk.bf16.mxu0 %vm6025_vm0, %v6024_v0 }
 0x3a9   : > { %v1035_v59 = vpack.c.bf16 %v1034_v60, %v1032_v58  ;;  %5222 = vmatprep.subr.bf16.mxu0 %v6024_v0  ;;  %v1126_v2 = vmul.f32 %v5737_v61, %v1117_v25 }
 0x3aa   : > { %v5739_v62 = vpop.eup %5738 }
 0x3ab   : > { %5201 = vmatmul.mubr.msk.bf16.vlgmr.msra.gmra.mxu1 %vm824_vm5, %v1035_v59  ;;  %v1128_v3 = vmul.f32 %v5739_v62, %v1118_v29  ;;  %v1236_v59 = vld [vmem:[%s7367_s9] sm:$0x3] }
 0x3ac   : > { %5218 = vmatprep.mubr.msk.bf16.mxu1 %vm6025_vm0, %v6024_v0  ;;  %5211 = vmatpush3.bf16.msra.mxu1 %v5656_v5 }
 0x3ad   : > { %v1129_v4 = vpack.c.bf16 %v1128_v3, %v1126_v2  ;;  %5212 = vmatprep.subr.bf16.mxu1 %v6024_v0 }
 0x3af   : > { %5207 = vmatmul.mubr.msk.bf16.vlgmr.msra.gmra.mxu0 %vm824_vm5, %v1129_v4 }
 0x3b0   : > { %5230 = vmatprep.mubr.msk.bf16.mxu0 %vm6025_vm0, %v6024_v0  ;;  %5213 = vmatpush3.bf16.msra.mxu1 %v5657_v6 }
 0x3b1   : > { %5214 = vmatprep.subr.bf16.mxu1 %v6024_v0  ;;  %5223 = vmatpush3.bf16.msra.mxu0 %v5660_v21 }
 0x3b2   : > { %5224 = vmatprep.subr.bf16.mxu0 %v6024_v0 }
 0x3b4   : > { %5215 = vmatpush3.bf16.msra.mxu1 %v5658_v9 }
 0x3b5   : > { %5216 = vmatprep.subr.bf16.mxu1 %v6024_v0  ;;  %5225 = vmatpush3.bf16.msra.mxu0 %v5661_v26 }
 0x3b6   : > { %5226 = vmatprep.subr.bf16.mxu0 %v6024_v0 }
 0x3b8   : > { %5217 = vmatpush3.bf16.msra.mxu1 %v5659_v14 }
 0x3b9   : > { %5234 = vmatprep.subr.bf16.mxu1 %v6024_v0  ;;  %5227 = vmatpush3.bf16.msra.mxu0 %v5662_v30 }
 0x3ba   : > { %5228 = vmatprep.subr.bf16.mxu0 %v6024_v0 }
 0x3bd   : > { %5229 = vmatpush3.bf16.msra.mxu0 %v5663_v55 }
 0x3be   : > { %5240 = vmatprep.subr.bf16.mxu0 %v6024_v0 }
 0x463   : > { %v887_v7 = vpop.f32.mrf.mxu1 }
 0x465   : > { %v5190_v8 = vpop.f32.mrf.mxu1 }
 0x467   : > { %v890_v10 = vpop.f32.mrf.mxu1  ;;  %v982_v11 = vpop.f32.mrf.mxu0 }
 0x468   : > { %1179 = vrot.lane.b32.xlu1 %v982_v11, %s6033_s5 }
 0x469   : > { %v5191_v12 = vpop.f32.mrf.mxu1  ;;  %v5196_v13 = vpop.f32.mrf.mxu0 }
 0x46b   : > { %v985_v16 = vpop.f32.mrf.mxu0  ;;  %v1076_v17 = vpop.f32.mrf.mxu1 }
 0x46c   : > { %1181 = vrot.lane.b32.xlu0 %v985_v16, %s6033_s5  ;;  %1187 = vrot.lane.b32.xlu1 %v1076_v17, %s6034_s24 }
 0x46d   : > { %v5197_v18 = vpop.f32.mrf.mxu0  ;;  %v5202_v20 = vpop.f32.mrf.mxu1 }
 0x46f   : > { %v1079_v22 = vpop.f32.mrf.mxu1  ;;  %v1170_v23 = vpop.f32.mrf.mxu0 }
 0x470   : > { %1189 = vrot.lane.b32.xlu0 %v1079_v22, %s6034_s24  ;;  %1195 = vrot.lane.b32.xlu1 %v1170_v23, %s6035_s26 }
 0x471   : > { %v5203_v24 = vpop.f32.mrf.mxu1  ;;  %v5208_v25 = vpop.f32.mrf.mxu0 }
 0x473   : > { %v1173_v27 = vpop.f32.mrf.mxu0 }
 0x474   : > { %1197 = vrot.lane.b32.xlu0 %v1173_v27, %s6035_s26 }
 0x475   : > { %v5209_v29 = vpop.f32.mrf.mxu0 }
 0x4da   : > { %v1180_v32 = vpop.permute.xlu1 %1179 }
 0x4db   : > { %v1201_v37 = vsel %vm824_vm5, %v887_v7, %v1180_v32 }
 0x4de   : > { %v1182_v33 = vpop.permute.xlu0 %1181  ;;  %v1188_v34 = vpop.permute.xlu1 %1187 }
 0x4df   : > { %v1204_v38 = vsel %vm1203_vm13, %v1201_v37, %v1188_v34  ;;  %v1202_v45 = vsel %vm824_vm5, %v890_v10, %v1182_v33 }
 0x4e2   : > { %v1190_v40 = vpop.permute.xlu0 %1189  ;;  %v1196_v41 = vpop.permute.xlu1 %1195 }
 0x4e3   : > { %v1207_v43 = vsel %vm1206_vm14, %v1204_v38, %v1196_v41  ;;  %v1205_v46 = vsel %vm1203_vm13, %v1202_v45, %v1190_v40 }
 0x4e4   : > { %v1215_v19 = vadd.f32 %v4835_v42, %v1207_v43 }
 0x4e6   : > { %v1198_v47 = vpop.permute.xlu0 %1197  ;;  %v1217_v51 = vmax.f32 %v1215_v19, 0.0 }
 0x4e7   : > { %v1208_v48 = vsel %vm1206_vm14, %v1205_v46, %v1198_v47 }
 0x4e8   : > { %v1216_v50 = vadd.f32 %v4835_v42, %v1208_v48 }
 0x4ea   : > { %v1218_v52 = vmax.f32 %v1216_v50, 0.0 }
 0x4ec   : > { %v1219_v53 = vpack.c.bf16 %v1218_v52, %v1217_v51 }
 0x4ee   : > { %5219 = vmatmul.mubr.msk.bf16.vlgmr.msra.gmra.mxu1 %vm712_vm1, %v1219_v53 }
 0x4ef   : > { %5236 = vmatprep.mubr.msk.bf16.mxu1 %vm6025_vm0, %v6024_v0 }
 0x5ae   : > { %v1299_v56 = vpop.f32.mrf.mxu1 }
 0x5b0   : > { %v5220_v57 = vpop.f32.mrf.mxu1 }
 0x5b2   : > { %v1302_v54 = vpop.f32.mrf.mxu1 }
 0x5b3   : > { %v6442_v58 = vpack.c.bf16 %v1302_v54, %v1299_v56 }
 0x5b4   : > { %v5221_v60 = vpop.f32.mrf.mxu1 }
 0x5b5   : > { %5231 = vmatmul.mubr.msk.bf16.vlgmr.msra.gmra.mxu0 %vm712_vm1, %v6442_v58  ;;  %v1332_v61 = vsel %vm712_vm1, %v6442_v58, 0 }
 0x5b6   : > { %5241 = vmatpush3.bf16.msra.mxu0 %v6442_v58  ;;  %5235 = vmatpush3.bf16.xpose.msra.mxu1 %v1332_v61 }
 0x5b7   : > { %5246 = vmatprep.subr.bf16.mxu1 %v6024_v0  ;;  %5242 = vmatprep.mubr.msk.bf16.mxu0 %vm6025_vm0, %v6024_v0 }
 0x5b8   : > { %5252 = vmatprep.subr.bf16.mxu0 %v6024_v0 }
 0x5bd   : > { %5237 = vmatmul.mubr.msk.bf16.vlgmr.msra.gmra.mxu1 %vm712_vm1, %v1236_v59 }
 0x5be   : > { %5248 = vmatprep.mubr.msk.bf16.mxu1 %vm6025_vm0, %v6024_v0 }
 0x675   : > { %v1368_v62 = vpop.f32.mrf.mxu0 }
 0x676   : > { %1420 = vperm.xlu1 %5594, %v1368_v62  }
 0x677   : > { %v5232_v2 = vpop.f32.mrf.mxu0 }
 0x679   : > { %v1371_v3 = vpop.f32.mrf.mxu0 }
 0x67a   : > { %5595 = vset.pattern.permute.xlu1 %v6027_v15  ;;  %1425 = vperm.xlu0 %5596, %v1371_v3  }
 0x67b   : > { %1512 = vperm.xlu1 %5595, %v1368_v62   ;;  %v5233_v4 = vpop.f32.mrf.mxu0 }
 0x67d   : > { %v1412_v5 = vpop.f32.mrf.mxu1 }
 0x67e   : > { %5597 = vset.pattern.permute.xlu0 %v6028_v28  ;;  %v1431_v9 = vrot.slane %v1412_v5, %v6301_v36  ;;  %v1522_v12 = vrot.slane %v1412_v5, %v6299_v35  ;;  %v1617_v25 = vrot.slane %v1412_v5, %v6317_v49  ;;  %v1711_v43 = vrot.slane %v1412_v5, %v6327_v63 }
 0x67f   : > { %1516 = vperm.xlu1 %5595, %v1371_v3   ;;  %1607 = vperm.xlu0 %5597, %v1368_v62   ;;  %v5238_v6 = vpop.f32.mrf.mxu1 }
 0x681   : > { %v1415_v7 = vpop.f32.mrf.mxu1 }
 0x683   : > { %5598 = vset.pattern.permute.xlu1 %v6028_v28  ;;  %5600 = vset.pattern.permute.xlu0 %v6029_v31  ;;  %v5239_v8 = vpop.f32.mrf.mxu1 }
 0x684   : > { %1611 = vperm.xlu1 %5598, %v1371_v3   ;;  %1705 = vperm.xlu0 %5600, %v1371_v3  }
 0x688   : > { %5599 = vset.pattern.permute.xlu1 %v6029_v31  ;;  %5603 = vset.pattern.permute.xlu0 %v6026_v1 }
 0x689   : > { %1701 = vperm.xlu1 %5599, %v1368_v62  }
 0x68d   : > { %5601 = vset.pattern.permute.xlu1 %v6026_v1 }
 0x6f1   : > { %v1421_v10 = vpop.permute.xlu1 %1420 }
 0x6f2   : > { %v1432_v11 = vadd.f32 %v1431_v9, %v1421_v10 }
 0x6f4   : > { %v1436_v13 = vmul.f32 0.2, %v1432_v11  ;;  %vm1434_vm15 = vcmp.gt.f32.partialorder %v1432_v11, 0.0 }
 0x6f5   : > { %v1426_v14 = vpop.permute.xlu0 %1425 }
 0x6f6   : > { %v1433_v16 = vadd.f32 %v1431_v9, %v1426_v14  ;;  %v1513_v17 = vpop.permute.xlu1 %1512  ;;  %v1438_v18 = vsel %vm1434_vm15, %v1432_v11, %v1436_v13 }
 0x6f7   : > { %v1523_v20 = vadd.f32 %v1522_v12, %v1513_v17  ;;  %v1440_v21 = vsel %vm562_vm2, %v1438_v18, -1e+30 }
 0x6f8   : > { %v1437_v22 = vmul.f32 0.2, %v1433_v16  ;;  %v1442_v23 = vsel %vm824_vm5, %v1440_v21, -inf  ;;  %vm1435_vm3 = vcmp.gt.f32.partialorder %v1433_v16, 0.0 }
 0x6f9   : > { %v1527_v24 = vmul.f32 0.2, %v1523_v20  ;;  %1443 = vmax.xlane.f32.xlu1 %v1442_v23  ;;  %vm1525_vm4 = vcmp.gt.f32.partialorder %v1523_v20, 0.0 }
 0x6fa   : > { %v1517_v26 = vpop.permute.xlu1 %1516  ;;  %v1608_v27 = vpop.permute.xlu0 %1607  ;;  %v1439_v29 = vsel %vm1435_vm3, %v1433_v16, %v1437_v22 }
 0x6fb   : > { %v1524_v30 = vadd.f32 %v1522_v12, %v1517_v26  ;;  %v1618_v32 = vadd.f32 %v1617_v25, %v1608_v27  ;;  %v1441_v33 = vsel %vm563_vm6, %v1439_v29, -1e+30  ;;  %v1529_v34 = vsel %vm1525_vm4, %v1523_v20, %v1527_v24 }
 0x6fc   : > { %v1445_v37 = vsel %vm824_vm5, %v1441_v33, -inf  ;;  %v1531_v38 = vsel %vm562_vm2, %v1529_v34, -1e+30 }
 0x6fd   : > { %v1528_v40 = vmul.f32 0.2, %v1524_v30  ;;  %v1622_v41 = vmul.f32 0.2, %v1618_v32  ;;  %1446 = vmax.xlane.f32.xlu0 %v1445_v37  ;;  %v1533_v42 = vsel %vm824_vm5, %v1531_v38, -inf  ;;  %vm1526_vm7 = vcmp.gt.f32.partialorder %v1524_v30, 0.0 }
 0x6fe   : > { %1534 = vmax.xlane.f32.xlu1 %v1533_v42  ;;  %vm1620_vm8 = vcmp.gt.f32.partialorder %v1618_v32, 0.0 }
 0x6ff   : > { %v1612_v45 = vpop.permute.xlu1 %1611  ;;  %v1706_v46 = vpop.permute.xlu0 %1705  ;;  %v1530_v19 = vsel %vm1526_vm7, %v1524_v30, %v1528_v40  ;;  %v1624_v47 = vsel %vm1620_vm8, %v1618_v32, %v1622_v41 }
 0x700   : > { %v1619_v48 = vadd.f32 %v1617_v25, %v1612_v45  ;;  %v1713_v50 = vadd.f32 %v1711_v43, %v1706_v46  ;;  %v1532_v51 = vsel %vm563_vm6, %v1530_v19, -1e+30  ;;  %v1626_v52 = vsel %vm562_vm2, %v1624_v47, -1e+30 }
 0x701   : > { %v1536_v53 = vsel %vm824_vm5, %v1532_v51, -inf  ;;  %v1628_v55 = vsel %vm824_vm5, %v1626_v52, -inf }
 0x702   : > { %v1623_v56 = vmul.f32 0.2, %v1619_v48  ;;  %v1717_v57 = vmul.f32 0.2, %v1713_v50  ;;  %1537 = vmax.xlane.f32.xlu0 %v1536_v53  ;;  %1629 = vmax.xlane.f32.xlu1 %v1628_v55  ;;  %vm1621_vm9 = vcmp.gt.f32.partialorder %v1619_v48, 0.0  ;;  %vm1715_vm10 = vcmp.gt.f32.partialorder %v1713_v50, 0.0 }
 0x704   : > { %v1702_v54 = vpop.permute.xlu1 %1701  ;;  %v1625_v60 = vsel %vm1621_vm9, %v1619_v48, %v1623_v56  ;;  %v1719_v61 = vsel %vm1715_vm10, %v1713_v50, %v1717_v57 }
 0x705   : > { %v1712_v59 = vadd.f32 %v1711_v43, %v1702_v54  ;;  %v1627_v62 = vsel %vm563_vm6, %v1625_v60, -1e+30  ;;  %v1721_v4 = vsel %vm563_vm6, %v1719_v61, -1e+30 }
 0x706   : > { %v1631_v2 = vsel %vm824_vm5, %v1627_v62, -inf  ;;  %v1725_v6 = vsel %vm824_vm5, %v1721_v4, -inf }
 0x707   : > { %v1716_v3 = vmul.f32 0.2, %v1712_v59  ;;  %1632 = vmax.xlane.f32.xlu0 %v1631_v2  ;;  %vm1714_vm11 = vcmp.gt.f32.partialorder %v1712_v59, 0.0 }
 0x709   : > { %v1718_v5 = vsel %vm1714_vm11, %v1712_v59, %v1716_v3 }
 0x70a   : > { %v1720_v7 = vsel %vm562_vm2, %v1718_v5, -1e+30 }
 0x70b   : > { %1726 = vmax.xlane.f32.xlu0 %v1725_v6  ;;  %v1722_v8 = vsel %vm824_vm5, %v1720_v7, -inf }
 0x70c   : > { %1723 = vmax.xlane.f32.xlu1 %v1722_v8 }
 0x71d   : > { %1559 = vrot.lane.b32.xlu1 %v6442_v58, %s6030_s23 }
 0x782   : > { %v1444_v9 = vpop.xlane.xlu1 %1443 }
 0x783   : > { %v1448_v10 = vsub.f32 %v1440_v21, %v1444_v9 }
 0x785   : > { %v1450_v11 = vmul.f32 1.442695, %v1448_v10 }
 0x786   : > { %v1447_v12 = vpop.xlane.xlu0 %1446 }
 0x787   : > { %5740 = vpow2.f32 %v1450_v11  ;;  %v1449_v13 = vsub.f32 %v1441_v33, %v1447_v12  ;;  %v1535_v14 = vpop.xlane.xlu1 %1534 }
 0x788   : > { %v1539_v16 = vsub.f32 %v1531_v38, %v1535_v14 }
 0x789   : > { %v1452_v17 = vmul.f32 1.442695, %v1449_v13 }
 0x78a   : > { %v1541_v18 = vmul.f32 1.442695, %v1539_v16 }
 0x78b   : > { %5742 = vpow2.f32 %v1452_v17  ;;  %v1538_v20 = vpop.xlane.xlu0 %1537  ;;  %v1630_v22 = vpop.xlane.xlu1 %1629 }
 0x78c   : > { %5744 = vpow2.f32 %v1541_v18  ;;  %v1540_v23 = vsub.f32 %v1532_v51, %v1538_v20  ;;  %v1634_v24 = vsub.f32 %v1626_v52, %v1630_v22 }
 0x78e   : > { %v1543_v25 = vmul.f32 1.442695, %v1540_v23  ;;  %v1636_v26 = vmul.f32 1.442695, %v1634_v24 }
 0x790   : > { %5746 = vpow2.f32 %v1543_v25  ;;  %v1633_v27 = vpop.xlane.xlu0 %1632 }
 0x791   : > { %5748 = vpow2.f32 %v1636_v26  ;;  %v1635_v21 = vsub.f32 %v1627_v62, %v1633_v27 }
 0x793   : > { %v1638_v29 = vmul.f32 1.442695, %v1635_v21 }
 0x794   : > { %v5741_v30 = vpop.eup %5740  ;;  %v1727_v32 = vpop.xlane.xlu0 %1726 }
 0x795   : > { %5750 = vpow2.f32 %v1638_v29  ;;  %v1729_v33 = vsub.f32 %v1721_v4, %v1727_v32  ;;  %v1724_v34 = vpop.xlane.xlu1 %1723  ;;  %v1454_v37 = vsel %vm562_vm2, %v5741_v30, 0.0 }
 0x796   : > { %v1728_v38 = vsub.f32 %v1720_v7, %v1724_v34  ;;  %v1456_v40 = vsel %vm824_vm5, %v1454_v37, 0.0 }
 0x797   : > { %v1732_v41 = vmul.f32 1.442695, %v1729_v33  ;;  %1457 = vadd.xlane.f32.xlu1 %v1456_v40 }
 0x798   : > { %v5743_v42 = vpop.eup %5742  ;;  %v1730_v43 = vmul.f32 1.442695, %v1728_v38 }
 0x799   : > { %v5745_v45 = vpop.eup %5744  ;;  %5752 = vpow2.f32 %v1732_v41  ;;  %v1560_v46 = vpop.permute.xlu1 %1559  ;;  %v1455_v19 = vsel %vm563_vm6, %v5743_v42, 0.0  ;;  %v5664_v42 = vld [vmem:[%s7365_s7 + $0x38] sm:$0xff]  }
 0x79a   : > { %5754 = vpow2.f32 %v1730_v43  ;;  %5247 = vmatpush3.bf16.msra.mxu1 %v1560_v46  ;;  %v1459_v47 = vsel %vm824_vm5, %v1455_v19, 0.0  ;;  %v1545_v48 = vsel %vm562_vm2, %v5745_v45, 0.0  ;;  %v5665_v46 = vld [vmem:[%s7365_s7 + $0x30] sm:$0xff]  }
 0x79b   : > { %1460 = vadd.xlane.f32.xlu0 %v1459_v47  ;;  %v1547_v50 = vsel %vm824_vm5, %v1545_v48, 0.0  ;;  %5258 = vmatprep.subr.bf16.mxu1 %v6024_v0 }
 0x79c   : > { %1548 = vadd.xlane.f32.xlu1 %v1547_v50  ;;  %v5666_v50 = vld [vmem:[%s7365_s7 + $0x28] sm:$0xff]  }
 0x79d   : > { %v5747_v51 = vpop.eup %5746 }
 0x79e   : > { %v5749_v52 = vpop.eup %5748  ;;  %v1546_v53 = vsel %vm563_vm6, %v5747_v51, 0.0 }
 0x79f   : > { %v1550_v55 = vsel %vm824_vm5, %v1546_v53, 0.0  ;;  %v1640_v56 = vsel %vm562_vm2, %v5749_v52, 0.0 }
 0x7a0   : > { %1551 = vadd.xlane.f32.xlu0 %v1550_v55  ;;  %v1642_v57 = vsel %vm824_vm5, %v1640_v56, 0.0  ;;  %v5667_v55 = vld [vmem:[%s7365_s7 + $0x20] sm:$0xff]  }
 0x7a1   : > { %1643 = vadd.xlane.f32.xlu1 %v1642_v57 }
 0x7a2   : > { %v5751_v54 = vpop.eup %5750 }
 0x7a3   : > { %v1641_v60 = vsel %vm563_vm6, %v5751_v54, 0.0 }
 0x7a4   : > { %v1645_v61 = vsel %vm824_vm5, %v1641_v60, 0.0 }
 0x7a5   : > { %1646 = vadd.xlane.f32.xlu0 %v1645_v61 }
 0x7a6   : > { %v5753_v59 = vpop.eup %5752 }
 0x7a7   : > { %v5755_v62 = vpop.eup %5754  ;;  %v1735_v2 = vsel %vm563_vm6, %v5753_v59, 0.0 }
 0x7a8   : > { %v1739_v3 = vsel %vm824_vm5, %v1735_v2, 0.0  ;;  %v1734_v4 = vsel %vm562_vm2, %v5755_v62, 0.0  ;;  %v5669_v62 = vld [vmem:[%s7366_s8 + $0x30] sm:$0xff]  }
 0x7a9   : > { %1740 = vadd.xlane.f32.xlu0 %v1739_v3  ;;  %v1736_v5 = vsel %vm824_vm5, %v1734_v4, 0.0 }
 0x7aa   : > { %1737 = vadd.xlane.f32.xlu1 %v1736_v5 }
 0x7bb   : > { %1747 = vrot.lane.b32.xlu1 %v6442_v58, %s6031_s27 }
 0x7bf   : > { %1653 = vrot.lane.b32.xlu0 %v6442_v58, %s6032_s6 }
 0x820   : > { %v1458_v6 = vpop.xlane.xlu1 %1457 }
 0x821   : > { %5756 = vrcp.f32 %v1458_v6 }
 0x824   : > { %v1461_v7 = vpop.xlane.xlu0 %1460 }
 0x825   : > { %5758 = vrcp.f32 %v1461_v7  ;;  %v1549_v8 = vpop.xlane.xlu1 %1548 }
 0x826   : > { %5760 = vrcp.f32 %v1549_v8 }
 0x829   : > { %v1552_v9 = vpop.xlane.xlu0 %1551 }
 0x82a   : > { %5762 = vrcp.f32 %v1552_v9  ;;  %v1644_v10 = vpop.xlane.xlu1 %1643 }
 0x82b   : > { %5764 = vrcp.f32 %v1644_v10 }
 0x82e   : > { %v1647_v11 = vpop.xlane.xlu0 %1646  ;;  %v5757_v12 = vpop.eup %5756 }
 0x82f   : > { %5766 = vrcp.f32 %v1647_v11  ;;  %v1463_v17 = vmul.f32 %v5757_v12, %v1454_v37 }
 0x832   : > { %v5759_v13 = vpop.eup %5758  ;;  %v1741_v14 = vpop.xlane.xlu0 %1740 }
 0x833   : > { %5768 = vrcp.f32 %v1741_v14  ;;  %v1738_v16 = vpop.xlane.xlu1 %1737  ;;  %v1465_v18 = vmul.f32 %v5759_v13, %v1455_v19  ;;  %v5761_v58 = vpop.eup %5760  ;;  %v4851_v13 = vld [vmem:[%s7368_s10] ss:$0 sm:$0xff] }
 0x834   : > { %5770 = vrcp.f32 %v1738_v16  ;;  %v1554_v24 = vmul.f32 %v5761_v58, %v1545_v48 }
 0x835   : > { %v1466_v20 = vpack.c.bf16 %v1465_v18, %v1463_v17 }
 0x836   : > { %v1654_v22 = vpop.permute.xlu0 %1653 }
 0x837   : > { %v5763_v23 = vpop.eup %5762  ;;  %5243 = vmatmul.mubr.msk.bf16.vlgmr.msra.gmra.mxu0 %vm824_vm5, %v1466_v20  ;;  %v1748_v29 = vpop.permute.xlu1 %1747 }
 0x838   : > { %5253 = vmatpush3.bf16.msra.mxu0 %v1654_v22  ;;  %v1556_v25 = vmul.f32 %v5763_v23, %v1546_v53  ;;  %5254 = vmatprep.mubr.msk.bf16.mxu0 %vm6025_vm0, %v6024_v0  ;;  %v5765_v26 = vpop.eup %5764 }
 0x839   : > { %5264 = vmatprep.subr.bf16.mxu0 %v6024_v0  ;;  %v1649_v30 = vmul.f32 %v5765_v26, %v1640_v56  ;;  %v5671_v26 = vld [vmem:[%s7366_s8 + $0x20] sm:$0xff]  }
 0x83a   : > { %v1557_v27 = vpack.c.bf16 %v1556_v25, %v1554_v24 }
 0x83c   : > { %v5767_v21 = vpop.eup %5766  ;;  %5249 = vmatmul.mubr.msk.bf16.vlgmr.msra.gmra.mxu1 %vm824_vm5, %v1557_v27 }
 0x83d   : > { %5259 = vmatpush3.bf16.msra.mxu1 %v1748_v29  ;;  %v1651_v32 = vmul.f32 %v5767_v21, %v1641_v60  ;;  %5260 = vmatprep.mubr.msk.bf16.mxu1 %vm6025_vm0, %v6024_v0  ;;  %v5668_v60 = vld [vmem:[%s7366_s8 + $0x38] sm:$0xff]  }
 0x83e   : > { %5276 = vmatprep.subr.bf16.mxu1 %v6024_v0 }
 0x83f   : > { %v1652_v33 = vpack.c.bf16 %v1651_v32, %v1649_v30 }
 0x840   : > { %v5769_v34 = vpop.eup %5768 }
 0x841   : > { %v5771_v37 = vpop.eup %5770  ;;  %5255 = vmatmul.mubr.msk.bf16.vlgmr.msra.gmra.mxu0 %vm824_vm5, %v1652_v33  ;;  %v1745_v38 = vmul.f32 %v5769_v34, %v1735_v2  ;;  %v4868_v34 = vld [vmem:[%s7367_s9 + $0x2] sm:$0x3] }
 0x842   : > { %v1743_v40 = vmul.f32 %v5771_v37, %v1734_v4  ;;  %5272 = vmatprep.mubr.msk.bf16.mxu0 %vm6025_vm0, %v6024_v0  ;;  %5265 = vmatpush3.bf16.msra.mxu0 %v5664_v42  ;;  %v5670_v4 = vld [vmem:[%s7366_s8 + $0x28] sm:$0xff]  }
 0x843   : > { %5266 = vmatprep.subr.bf16.mxu0 %v6024_v0 }
 0x844   : > { %v1746_v41 = vpack.c.bf16 %v1745_v38, %v1743_v40 }
 0x846   : > { %5261 = vmatmul.mubr.msk.bf16.vlgmr.msra.gmra.mxu1 %vm824_vm5, %v1746_v41  ;;  %5267 = vmatpush3.bf16.msra.mxu0 %v5665_v46 }
 0x847   : > { %5284 = vmatprep.mubr.msk.bf16.mxu1 %vm6025_vm0, %v6024_v0  ;;  %5268 = vmatprep.subr.bf16.mxu0 %v6024_v0 }
 0x848   : > { %5277 = vmatpush3.bf16.msra.mxu1 %v5668_v60 }
 0x849   : > { %5278 = vmatprep.subr.bf16.mxu1 %v6024_v0 }
 0x84a   : > { %5269 = vmatpush3.bf16.msra.mxu0 %v5666_v50 }
 0x84b   : > { %5270 = vmatprep.subr.bf16.mxu0 %v6024_v0 }
 0x84c   : > { %5279 = vmatpush3.bf16.msra.mxu1 %v5669_v62 }
 0x84d   : > { %5280 = vmatprep.subr.bf16.mxu1 %v6024_v0 }
 0x84e   : > { %5271 = vmatpush3.bf16.msra.mxu0 %v5667_v55 }
 0x84f   : > { %5288 = vmatprep.subr.bf16.mxu0 %v6024_v0 }
 0x850   : > { %5281 = vmatpush3.bf16.msra.mxu1 %v5670_v4 }
 0x851   : > { %5282 = vmatprep.subr.bf16.mxu1 %v6024_v0 }
 0x854   : > { %5283 = vmatpush3.bf16.msra.mxu1 %v5671_v26 }
 0x855   : > { %5294 = vmatprep.subr.bf16.mxu1 %v6024_v0 }
 0x8f7   : > { %v1504_v43 = vpop.f32.mrf.mxu0 }
 0x8f9   : > { %v5244_v45 = vpop.f32.mrf.mxu0 }
 0x8fb   : > { %v1507_v19 = vpop.f32.mrf.mxu0 }
 0x8fc   : > { %v1599_v47 = vpop.f32.mrf.mxu1 }
 0x8fd   : > { %v5245_v48 = vpop.f32.mrf.mxu0  ;;  %1796 = vrot.lane.b32.xlu1 %v1599_v47, %s6033_s5 }
 0x8fe   : > { %v5250_v51 = vpop.f32.mrf.mxu1 }
 0x900   : > { %v1602_v52 = vpop.f32.mrf.mxu1 }
 0x901   : > { %v1693_v53 = vpop.f32.mrf.mxu0  ;;  %1798 = vrot.lane.b32.xlu0 %v1602_v52, %s6033_s5 }
 0x902   : > { %1804 = vrot.lane.b32.xlu1 %v1693_v53, %s6034_s24  ;;  %v5251_v56 = vpop.f32.mrf.mxu1 }
 0x903   : > { %v5256_v57 = vpop.f32.mrf.mxu0 }
 0x905   : > { %v1696_v54 = vpop.f32.mrf.mxu0 }
 0x906   : > { %1806 = vrot.lane.b32.xlu0 %v1696_v54, %s6034_s24  ;;  %v1787_v61 = vpop.f32.mrf.mxu1 }
 0x907   : > { %v5257_v59 = vpop.f32.mrf.mxu0  ;;  %1812 = vrot.lane.b32.xlu1 %v1787_v61, %s6035_s26 }
 0x908   : > { %v5262_v2 = vpop.f32.mrf.mxu1 }
 0x90a   : > { %v1790_v3 = vpop.f32.mrf.mxu1 }
 0x90b   : > { %1814 = vrot.lane.b32.xlu0 %v1790_v3, %s6035_s26 }
 0x90c   : > { %v5263_v5 = vpop.f32.mrf.mxu1 }
 0x96f   : > { %v1797_v6 = vpop.permute.xlu1 %1796 }
 0x970   : > { %v1818_v9 = vsel %vm824_vm5, %v1504_v43, %v1797_v6 }
 0x973   : > { %v1799_v7 = vpop.permute.xlu0 %1798 }
 0x974   : > { %v1805_v8 = vpop.permute.xlu1 %1804  ;;  %v1819_v16 = vsel %vm824_vm5, %v1507_v19, %v1799_v7 }
 0x975   : > { %v1820_v11 = vsel %vm1203_vm13, %v1818_v9, %v1805_v8 }
 0x978   : > { %v1807_v10 = vpop.permute.xlu0 %1806 }
 0x979   : > { %v1813_v12 = vpop.permute.xlu1 %1812  ;;  %v1821_v17 = vsel %vm1203_vm13, %v1819_v16, %v1807_v10 }
 0x97a   : > { %v1822_v14 = vsel %vm1206_vm14, %v1820_v11, %v1813_v12 }
 0x97b   : > { %v1830_v18 = vadd.f32 %v4851_v13, %v1822_v14 }
 0x97d   : > { %v1815_v58 = vpop.permute.xlu0 %1814  ;;  %v1832_v23 = vmax.f32 %v1830_v18, 0.0 }
 0x97e   : > { %v1823_v20 = vsel %vm1206_vm14, %v1821_v17, %v1815_v58 }
 0x97f   : > { %v1831_v22 = vadd.f32 %v4851_v13, %v1823_v20 }
 0x981   : > { %v1833_v24 = vmax.f32 %v1831_v22, 0.0 }
 0x983   : > { %v1834_v25 = vpack.c.bf16 %v1833_v24, %v1832_v23 }
 0x985   : > { %5273 = vmatmul.mubr.msk.bf16.vlgmr.msra.gmra.mxu0 %vm712_vm1, %v1834_v25 }
 0x986   : > { %5290 = vmatprep.mubr.msk.bf16.mxu0 %vm6025_vm0, %v6024_v0 }
 0xa45   : > { %v1918_v27 = vpop.f32.mrf.mxu0 }
 0xa47   : > { %v5274_v21 = vpop.f32.mrf.mxu0 }
 0xa49   : > { %v1921_v29 = vpop.f32.mrf.mxu0 }
 0xa4a   : > { %v6589_v30 = vpack.c.bf16 %v1921_v29, %v1918_v27 }
 0xa4b   : > { %v5275_v32 = vpop.f32.mrf.mxu0 }
 0xa4c   : > { %5285 = vmatmul.mubr.msk.bf16.vlgmr.msra.gmra.mxu1 %vm712_vm1, %v6589_v30  ;;  %v1951_v33 = vsel %vm712_vm1, %v6589_v30, 0 }
 0xa4d   : > { %5295 = vmatpush3.bf16.msra.mxu1 %v6589_v30  ;;  %5289 = vmatpush3.bf16.xpose.msra.mxu0 %v1951_v33 }
 0xa4e   : > { %5300 = vmatprep.subr.bf16.mxu0 %v6024_v0  ;;  %5296 = vmatprep.mubr.msk.bf16.mxu1 %vm6025_vm0, %v6024_v0 }
 0xa4f   : > { %5306 = vmatprep.subr.bf16.mxu1 %v6024_v0 }
 0xa54   : > { %5291 = vmatmul.mubr.msk.bf16.vlgmr.msra.gmra.mxu0 %vm712_vm1, %v4868_v34 }
 0xa55   : > { %5302 = vmatprep.mubr.msk.bf16.mxu0 %vm6025_vm0, %v6024_v0 }
 0xb0c   : > { %v1987_v37 = vpop.f32.mrf.mxu1 }
 0xb0d   : > { %2039 = vperm.xlu1 %5601, %v1987_v37  }
 0xb0e   : > { %v5286_v38 = vpop.f32.mrf.mxu1 }
 0xb10   : > { %v1990_v40 = vpop.f32.mrf.mxu1 }
 0xb11   : > { %5602 = vset.pattern.permute.xlu1 %v6027_v15  ;;  %2044 = vperm.xlu0 %5603, %v1990_v40  }
 0xb12   : > { %2131 = vperm.xlu1 %5602, %v1987_v37   ;;  %v5287_v41 = vpop.f32.mrf.mxu1 }
 0xb14   : > { %v2031_v42 = vpop.f32.mrf.mxu0 }
 0xb15   : > { %5604 = vset.pattern.permute.xlu0 %v6028_v28  ;;  %v2050_v19 = vrot.slane %v2031_v42, %v6301_v36  ;;  %v2141_v50 = vrot.slane %v2031_v42, %v6299_v35  ;;  %v2236_v62 = vrot.slane %v2031_v42, %v6317_v49  ;;  %v2330_v14 = vrot.slane %v2031_v42, %v6327_v63 }
 0xb16   : > { %2135 = vperm.xlu1 %5602, %v1990_v40   ;;  %2226 = vperm.xlu0 %5604, %v1987_v37   ;;  %v5292_v43 = vpop.f32.mrf.mxu0 }
 0xb18   : > { %v2034_v45 = vpop.f32.mrf.mxu0 }
 0xb1a   : > { %5605 = vset.pattern.permute.xlu1 %v6028_v28  ;;  %5607 = vset.pattern.permute.xlu0 %v6029_v31  ;;  %v5293_v46 = vpop.f32.mrf.mxu0 }
 0xb1b   : > { %2230 = vperm.xlu1 %5605, %v1990_v40   ;;  %2324 = vperm.xlu0 %5607, %v1990_v40  }
 0xb1f   : > { %5606 = vset.pattern.permute.xlu1 %v6029_v31  ;;  %5610 = vset.pattern.permute.xlu0 %v6026_v1 }
 0xb20   : > { %2320 = vperm.xlu1 %5606, %v1987_v37  }
 0xb24   : > { %5608 = vset.pattern.permute.xlu1 %v6026_v1 }
 0xb88   : > { %v2040_v47 = vpop.permute.xlu1 %2039 }
 0xb89   : > { %v2051_v48 = vadd.f32 %v2050_v19, %v2040_v47 }
 0xb8b   : > { %v2055_v51 = vmul.f32 0.2, %v2051_v48  ;;  %vm2053_vm12 = vcmp.gt.f32.partialorder %v2051_v48, 0.0 }
 0xb8c   : > { %v2045_v52 = vpop.permute.xlu0 %2044 }
 0xb8d   : > { %v2052_v53 = vadd.f32 %v2050_v19, %v2045_v52  ;;  %v2132_v55 = vpop.permute.xlu1 %2131  ;;  %v2057_v56 = vsel %vm2053_vm12, %v2051_v48, %v2055_v51 }
 0xb8e   : > { %v2142_v57 = vadd.f32 %v2141_v50, %v2132_v55  ;;  %v2059_v54 = vsel %vm562_vm2, %v2057_v56, -1e+30 }
 0xb8f   : > { %v2056_v60 = vmul.f32 0.2, %v2052_v53  ;;  %v2061_v61 = vsel %vm824_vm5, %v2059_v54, -inf  ;;  %vm2054_vm15 = vcmp.gt.f32.partialorder %v2052_v53, 0.0 }
 0xb90   : > { %v2146_v59 = vmul.f32 0.2, %v2142_v57  ;;  %2062 = vmax.xlane.f32.xlu1 %v2061_v61  ;;  %vm2144_vm3 = vcmp.gt.f32.partialorder %v2142_v57, 0.0 }
 0xb91   : > { %v2136_v2 = vpop.permute.xlu1 %2135  ;;  %v2227_v3 = vpop.permute.xlu0 %2226  ;;  %v2058_v4 = vsel %vm2054_vm15, %v2052_v53, %v2056_v60 }
 0xb92   : > { %v2143_v5 = vadd.f32 %v2141_v50, %v2136_v2  ;;  %v2237_v6 = vadd.f32 %v2236_v62, %v2227_v3  ;;  %v2060_v7 = vsel %vm563_vm6, %v2058_v4, -1e+30  ;;  %v2148_v8 = vsel %vm2144_vm3, %v2142_v57, %v2146_v59 }
 0xb93   : > { %v2064_v9 = vsel %vm824_vm5, %v2060_v7, -inf  ;;  %v2150_v10 = vsel %vm562_vm2, %v2148_v8, -1e+30 }
 0xb94   : > { %v2147_v11 = vmul.f32 0.2, %v2143_v5  ;;  %v2241_v12 = vmul.f32 0.2, %v2237_v6  ;;  %2065 = vmax.xlane.f32.xlu0 %v2064_v9  ;;  %v2152_v13 = vsel %vm824_vm5, %v2150_v10, -inf  ;;  %vm2145_vm4 = vcmp.gt.f32.partialorder %v2143_v5, 0.0 }
 0xb95   : > { %2153 = vmax.xlane.f32.xlu1 %v2152_v13  ;;  %vm2239_vm7 = vcmp.gt.f32.partialorder %v2237_v6, 0.0 }
 0xb96   : > { %v2231_v16 = vpop.permute.xlu1 %2230  ;;  %v2325_v17 = vpop.permute.xlu0 %2324  ;;  %v2149_v18 = vsel %vm2145_vm4, %v2143_v5, %v2147_v11  ;;  %v2243_v58 = vsel %vm2239_vm7, %v2237_v6, %v2241_v12 }
 0xb97   : > { %v2238_v20 = vadd.f32 %v2236_v62, %v2231_v16  ;;  %v2332_v22 = vadd.f32 %v2330_v14, %v2325_v17  ;;  %v2151_v23 = vsel %vm563_vm6, %v2149_v18, -1e+30  ;;  %v2245_v24 = vsel %vm562_vm2, %v2243_v58, -1e+30 }
 0xb98   : > { %v2155_v25 = vsel %vm824_vm5, %v2151_v23, -inf  ;;  %v2247_v26 = vsel %vm824_vm5, %v2245_v24, -inf }
 0xb99   : > { %v2242_v27 = vmul.f32 0.2, %v2238_v20  ;;  %v2336_v21 = vmul.f32 0.2, %v2332_v22  ;;  %2156 = vmax.xlane.f32.xlu0 %v2155_v25  ;;  %2248 = vmax.xlane.f32.xlu1 %v2247_v26  ;;  %vm2240_vm8 = vcmp.gt.f32.partialorder %v2238_v20, 0.0  ;;  %vm2334_vm9 = vcmp.gt.f32.partialorder %v2332_v22, 0.0 }
 0xb9b   : > { %v2321_v29 = vpop.permute.xlu1 %2320  ;;  %v2244_v32 = vsel %vm2240_vm8, %v2238_v20, %v2242_v27  ;;  %v2338_v33 = vsel %vm2334_vm9, %v2332_v22, %v2336_v21 }
 0xb9c   : > { %v2331_v34 = vadd.f32 %v2330_v14, %v2321_v29  ;;  %v2246_v37 = vsel %vm563_vm6, %v2244_v32, -1e+30  ;;  %v2340_v41 = vsel %vm563_vm6, %v2338_v33, -1e+30 }
 0xb9d   : > { %v2250_v38 = vsel %vm824_vm5, %v2246_v37, -inf  ;;  %v2344_v43 = vsel %vm824_vm5, %v2340_v41, -inf }
 0xb9e   : > { %v2335_v40 = vmul.f32 0.2, %v2331_v34  ;;  %2251 = vmax.xlane.f32.xlu0 %v2250_v38  ;;  %vm2333_vm10 = vcmp.gt.f32.partialorder %v2331_v34, 0.0 }
 0xba0   : > { %v2337_v42 = vsel %vm2333_vm10, %v2331_v34, %v2335_v40 }
 0xba1   : > { %v2339_v45 = vsel %vm562_vm2, %v2337_v42, -1e+30 }
 0xba2   : > { %2345 = vmax.xlane.f32.xlu0 %v2344_v43  ;;  %v2341_v46 = vsel %vm824_vm5, %v2339_v45, -inf }
 0xba3   : > { %2342 = vmax.xlane.f32.xlu1 %v2341_v46 }
 0xbb4   : > { %2178 = vrot.lane.b32.xlu1 %v6589_v30, %s6030_s23 }
 0xc19   : > { %v2063_v19 = vpop.xlane.xlu1 %2062 }
 0xc1a   : > { %v2067_v47 = vsub.f32 %v2059_v54, %v2063_v19 }
 0xc1c   : > { %v2069_v48 = vmul.f32 1.442695, %v2067_v47 }
 0xc1d   : > { %v2066_v50 = vpop.xlane.xlu0 %2065 }
 0xc1e   : > { %5772 = vpow2.f32 %v2069_v48  ;;  %v2068_v51 = vsub.f32 %v2060_v7, %v2066_v50  ;;  %v2154_v52 = vpop.xlane.xlu1 %2153 }
 0xc1f   : > { %v2158_v53 = vsub.f32 %v2150_v10, %v2154_v52 }
 0xc20   : > { %v2071_v55 = vmul.f32 1.442695, %v2068_v51 }
 0xc21   : > { %v2160_v56 = vmul.f32 1.442695, %v2158_v53 }
 0xc22   : > { %5774 = vpow2.f32 %v2071_v55  ;;  %v2249_v57 = vpop.xlane.xlu1 %2248  ;;  %v2157_v60 = vpop.xlane.xlu0 %2156 }
 0xc23   : > { %5776 = vpow2.f32 %v2160_v56  ;;  %v2253_v61 = vsub.f32 %v2245_v24, %v2249_v57  ;;  %v2159_v59 = vsub.f32 %v2151_v23, %v2157_v60 }
 0xc25   : > { %v2255_v62 = vmul.f32 1.442695, %v2253_v61  ;;  %v2162_v2 = vmul.f32 1.442695, %v2159_v59 }
 0xc27   : > { %5778 = vpow2.f32 %v2255_v62  ;;  %v2252_v3 = vpop.xlane.xlu0 %2251 }
 0xc28   : > { %5780 = vpow2.f32 %v2162_v2  ;;  %v2254_v54 = vsub.f32 %v2246_v37, %v2252_v3 }
 0xc2a   : > { %v2257_v4 = vmul.f32 1.442695, %v2254_v54 }
 0xc2b   : > { %v5773_v5 = vpop.eup %5772  ;;  %v2346_v6 = vpop.xlane.xlu0 %2345 }
 0xc2c   : > { %5782 = vpow2.f32 %v2257_v4  ;;  %v2348_v7 = vsub.f32 %v2340_v41, %v2346_v6  ;;  %v2343_v8 = vpop.xlane.xlu1 %2342  ;;  %v2073_v9 = vsel %vm562_vm2, %v5773_v5, 0.0 }
 0xc2d   : > { %v2347_v10 = vsub.f32 %v2339_v45, %v2343_v8  ;;  %v2075_v11 = vsel %vm824_vm5, %v2073_v9, 0.0 }
 0xc2e   : > { %v2351_v12 = vmul.f32 1.442695, %v2348_v7  ;;  %2076 = vadd.xlane.f32.xlu1 %v2075_v11 }
 0xc2f   : > { %v5775_v13 = vpop.eup %5774  ;;  %v2349_v14 = vmul.f32 1.442695, %v2347_v10 }
 0xc30   : > { %v5777_v16 = vpop.eup %5776  ;;  %5784 = vpow2.f32 %v2351_v12  ;;  %v2179_v17 = vpop.permute.xlu1 %2178  ;;  %v2074_v18 = vsel %vm563_vm6, %v5775_v13, 0.0  ;;  %v5672_v13 = vld [vmem:[%s7365_s7 + $0x58] sm:$0xff]  }
 0xc31   : > { %5786 = vpow2.f32 %v2349_v14  ;;  %5301 = vmatpush3.bf16.msra.mxu0 %v2179_v17  ;;  %v2078_v58 = vsel %vm824_vm5, %v2074_v18, 0.0  ;;  %v2164_v20 = vsel %vm562_vm2, %v5777_v16, 0.0  ;;  %v5673_v17 = vld [vmem:[%s7365_s7 + $0x50] sm:$0xff]  }
 0xc32   : > { %2079 = vadd.xlane.f32.xlu0 %v2078_v58  ;;  %v2166_v22 = vsel %vm824_vm5, %v2164_v20, 0.0  ;;  %5312 = vmatprep.subr.bf16.mxu0 %v6024_v0 }
 0xc33   : > { %2167 = vadd.xlane.f32.xlu1 %v2166_v22  ;;  %v5674_v22 = vld [vmem:[%s7365_s7 + $0x48] sm:$0xff]  }
 0xc34   : > { %v5779_v23 = vpop.eup %5778 }
 0xc35   : > { %v5781_v24 = vpop.eup %5780  ;;  %v2259_v25 = vsel %vm562_vm2, %v5779_v23, 0.0 }
 0xc36   : > { %v2261_v26 = vsel %vm824_vm5, %v2259_v25, 0.0  ;;  %v2165_v27 = vsel %vm563_vm6, %v5781_v24, 0.0 }
 0xc37   : > { %2262 = vadd.xlane.f32.xlu1 %v2261_v26  ;;  %v2169_v21 = vsel %vm824_vm5, %v2165_v27, 0.0  ;;  %v5675_v26 = vld [vmem:[%s7365_s7 + $0x40] sm:$0xff]  }
 0xc38   : > { %2170 = vadd.xlane.f32.xlu0 %v2169_v21 }
 0xc39   : > { %v5783_v29 = vpop.eup %5782 }
 0xc3a   : > { %v2260_v32 = vsel %vm563_vm6, %v5783_v29, 0.0 }
 0xc3b   : > { %v2264_v33 = vsel %vm824_vm5, %v2260_v32, 0.0 }
 0xc3c   : > { %2265 = vadd.xlane.f32.xlu0 %v2264_v33 }
 0xc3d   : > { %v5785_v34 = vpop.eup %5784 }
 0xc3e   : > { %v5787_v37 = vpop.eup %5786  ;;  %v2354_v38 = vsel %vm563_vm6, %v5785_v34, 0.0 }
 0xc3f   : > { %v2358_v40 = vsel %vm824_vm5, %v2354_v38, 0.0  ;;  %v2353_v41 = vsel %vm562_vm2, %v5787_v37, 0.0  ;;  %v5677_v37 = vld [vmem:[%s7366_s8 + $0x50] sm:$0xff]  }
 0xc40   : > { %2359 = vadd.xlane.f32.xlu0 %v2358_v40  ;;  %v2355_v42 = vsel %vm824_vm5, %v2353_v41, 0.0 }
 0xc41   : > { %2356 = vadd.xlane.f32.xlu1 %v2355_v42 }
 0xc52   : > { %2366 = vrot.lane.b32.xlu1 %v6589_v30, %s6031_s27 }
 0xc56   : > { %2272 = vrot.lane.b32.xlu0 %v6589_v30, %s6032_s6 }
 0xcb7   : > { %v2077_v43 = vpop.xlane.xlu1 %2076 }
 0xcb8   : > { %5788 = vrcp.f32 %v2077_v43 }
 0xcbb   : > { %v2080_v45 = vpop.xlane.xlu0 %2079 }
 0xcbc   : > { %5790 = vrcp.f32 %v2080_v45  ;;  %v2168_v46 = vpop.xlane.xlu1 %2167 }
 0xcbd   : > { %5792 = vrcp.f32 %v2168_v46 }
 0xcc0   : > { %v2263_v19 = vpop.xlane.xlu1 %2262 }
 0xcc1   : > { %v2171_v47 = vpop.xlane.xlu0 %2170 }
 0xcc2   : > { %5794 = vrcp.f32 %v2171_v47 }
 0xcc3   : > { %5796 = vrcp.f32 %v2263_v19 }
 0xcc5   : > { %v2266_v48 = vpop.xlane.xlu0 %2265  ;;  %v5789_v50 = vpop.eup %5788 }
 0xcc6   : > { %5798 = vrcp.f32 %v2266_v48  ;;  %v2082_v55 = vmul.f32 %v5789_v50, %v2073_v9 }
 0xcc9   : > { %v5791_v51 = vpop.eup %5790  ;;  %v2360_v52 = vpop.xlane.xlu0 %2359 }
 0xcca   : > { %5800 = vrcp.f32 %v2360_v52  ;;  %v2357_v53 = vpop.xlane.xlu1 %2356  ;;  %v2084_v56 = vmul.f32 %v5791_v51, %v2074_v18  ;;  %v5793_v57 = vpop.eup %5792  ;;  %v4885_v51 = vld [vmem:[%s7368_s10 + $0x1] ss:$0 sm:$0xff] }
 0xccb   : > { %5802 = vrcp.f32 %v2357_v53  ;;  %v2173_v59 = vmul.f32 %v5793_v57, %v2164_v20 }
 0xccc   : > { %v2085_v30 = vpack.c.bf16 %v2084_v56, %v2082_v55 }
 0xccd   : > { %v2273_v60 = vpop.permute.xlu0 %2272 }
 0xcce   : > { %5297 = vmatmul.mubr.msk.bf16.vlgmr.msra.gmra.mxu1 %vm824_vm5, %v2085_v30  ;;  %v2367_v4 = vpop.permute.xlu1 %2366 }
 0xccf   : > { %v5795_v61 = vpop.eup %5794  ;;  %5307 = vmatpush3.bf16.msra.mxu1 %v2273_v60  ;;  %5308 = vmatprep.mubr.msk.bf16.mxu1 %vm6025_vm0, %v6024_v0 }
 0xcd0   : > { %v2175_v62 = vmul.f32 %v5795_v61, %v2165_v27  ;;  %5318 = vmatprep.subr.bf16.mxu1 %v6024_v0  ;;  %v5797_v2 = vpop.eup %5796 }
 0xcd1   : > { %v2268_v5 = vmul.f32 %v5797_v2, %v2259_v25  ;;  %v5679_v2 = vld [vmem:[%s7366_s8 + $0x40] sm:$0xff]  }
 0xcd2   : > { %v2176_v3 = vpack.c.bf16 %v2175_v62, %v2173_v59 }
 0xcd3   : > { %v5799_v54 = vpop.eup %5798 }
 0xcd4   : > { %5303 = vmatmul.mubr.msk.bf16.vlgmr.msra.gmra.mxu0 %vm824_vm5, %v2176_v3  ;;  %v2270_v6 = vmul.f32 %v5799_v54, %v2260_v32  ;;  %v5676_v32 = vld [vmem:[%s7366_s8 + $0x58] sm:$0xff]  }
 0xcd5   : > { %5313 = vmatpush3.bf16.msra.mxu0 %v2367_v4  ;;  %5314 = vmatprep.mubr.msk.bf16.mxu0 %vm6025_vm0, %v6024_v0 }
 0xcd6   : > { %v2271_v7 = vpack.c.bf16 %v2270_v6, %v2268_v5  ;;  %5330 = vmatprep.subr.bf16.mxu0 %v6024_v0 }
 0xcd7   : > { %v5801_v8 = vpop.eup %5800 }
 0xcd8   : > { %v5803_v9 = vpop.eup %5802  ;;  %5309 = vmatmul.mubr.msk.bf16.vlgmr.msra.gmra.mxu1 %vm824_vm5, %v2271_v7  ;;  %v2364_v10 = vmul.f32 %v5801_v8, %v2354_v38  ;;  %v4902_v8 = vld [vmem:[%s7367_s9 + $0x4] sm:$0x3] }
 0xcd9   : > { %v2362_v11 = vmul.f32 %v5803_v9, %v2353_v41  ;;  %5326 = vmatprep.mubr.msk.bf16.mxu1 %vm6025_vm0, %v6024_v0  ;;  %5319 = vmatpush3.bf16.msra.mxu1 %v5672_v13  ;;  %v5678_v41 = vld [vmem:[%s7366_s8 + $0x48] sm:$0xff]  }
 0xcda   : > { %5320 = vmatprep.subr.bf16.mxu1 %v6024_v0 }
 0xcdb   : > { %v2365_v12 = vpack.c.bf16 %v2364_v10, %v2362_v11 }
 0xcdd   : > { %5315 = vmatmul.mubr.msk.bf16.vlgmr.msra.gmra.mxu0 %vm824_vm5, %v2365_v12  ;;  %5321 = vmatpush3.bf16.msra.mxu1 %v5673_v17 }
 0xcde   : > { %5338 = vmatprep.mubr.msk.bf16.mxu0 %vm6025_vm0, %v6024_v0  ;;  %5322 = vmatprep.subr.bf16.mxu1 %v6024_v0 }
 0xcdf   : > { %5331 = vmatpush3.bf16.msra.mxu0 %v5676_v32 }
 0xce0   : > { %5332 = vmatprep.subr.bf16.mxu0 %v6024_v0 }
 0xce1   : > { %5323 = vmatpush3.bf16.msra.mxu1 %v5674_v22 }
 0xce2   : > { %5324 = vmatprep.subr.bf16.mxu1 %v6024_v0 }
 0xce3   : > { %5333 = vmatpush3.bf16.msra.mxu0 %v5677_v37 }
 0xce4   : > { %5334 = vmatprep.subr.bf16.mxu0 %v6024_v0 }
 0xce5   : > { %5325 = vmatpush3.bf16.msra.mxu1 %v5675_v26 }
 0xce6   : > { %5342 = vmatprep.subr.bf16.mxu1 %v6024_v0 }
 0xce7   : > { %5335 = vmatpush3.bf16.msra.mxu0 %v5678_v41 }
 0xce8   : > { %5336 = vmatprep.subr.bf16.mxu0 %v6024_v0 }
 0xceb   : > { %5337 = vmatpush3.bf16.msra.mxu0 %v5679_v2 }
 0xcec   : > { %5348 = vmatprep.subr.bf16.mxu0 %v6024_v0 }
 0xd8e   : > { %v2123_v14 = vpop.f32.mrf.mxu1 }
 0xd90   : > { %v5298_v16 = vpop.f32.mrf.mxu1 }
 0xd92   : > { %v2126_v18 = vpop.f32.mrf.mxu1 }
 0xd94   : > { %v2218_v58 = vpop.f32.mrf.mxu0  ;;  %v5299_v20 = vpop.f32.mrf.mxu1 }
 0xd95   : > { %2415 = vrot.lane.b32.xlu1 %v2218_v58, %s6033_s5 }
 0xd96   : > { %v5304_v23 = vpop.f32.mrf.mxu0 }
 0xd98   : > { %v2221_v24 = vpop.f32.mrf.mxu0  ;;  %v2312_v25 = vpop.f32.mrf.mxu1 }
 0xd99   : > { %2417 = vrot.lane.b32.xlu0 %v2221_v24, %s6033_s5  ;;  %2423 = vrot.lane.b32.xlu1 %v2312_v25, %s6034_s24 }
 0xd9a   : > { %v5305_v27 = vpop.f32.mrf.mxu0  ;;  %v5310_v21 = vpop.f32.mrf.mxu1 }
 0xd9c   : > { %v2315_v29 = vpop.f32.mrf.mxu1 }
 0xd9d   : > { %v2406_v33 = vpop.f32.mrf.mxu0  ;;  %2425 = vrot.lane.b32.xlu0 %v2315_v29, %s6034_s24 }
 0xd9e   : > { %2431 = vrot.lane.b32.xlu1 %v2406_v33, %s6035_s26  ;;  %v5311_v34 = vpop.f32.mrf.mxu1 }
 0xd9f   : > { %v5316_v38 = vpop.f32.mrf.mxu0 }
 0xda1   : > { %v2409_v40 = vpop.f32.mrf.mxu0 }
 0xda2   : > { %2433 = vrot.lane.b32.xlu0 %v2409_v40, %s6035_s26 }
 0xda3   : > { %v5317_v42 = vpop.f32.mrf.mxu0 }
 0xe07   : > { %v2416_v43 = vpop.permute.xlu1 %2415 }
 0xe08   : > { %v2437_v19 = vsel %vm824_vm5, %v2123_v14, %v2416_v43 }
 0xe0b   : > { %v2418_v45 = vpop.permute.xlu0 %2417  ;;  %v2424_v46 = vpop.permute.xlu1 %2423 }
 0xe0c   : > { %v2439_v48 = vsel %vm1203_vm13, %v2437_v19, %v2424_v46  ;;  %v2438_v53 = vsel %vm824_vm5, %v2126_v18, %v2418_v45 }
 0xe0f   : > { %v2426_v47 = vpop.permute.xlu0 %2425 }
 0xe10   : > { %v2432_v50 = vpop.permute.xlu1 %2431  ;;  %v2440_v55 = vsel %vm1203_vm13, %v2438_v53, %v2426_v47 }
 0xe11   : > { %v2441_v52 = vsel %vm1206_vm14, %v2439_v48, %v2432_v50 }
 0xe12   : > { %v2449_v56 = vadd.f32 %v4885_v51, %v2441_v52 }
 0xe14   : > { %v2434_v30 = vpop.permute.xlu0 %2433  ;;  %v2451_v61 = vmax.f32 %v2449_v56, 0.0 }
 0xe15   : > { %v2442_v57 = vsel %vm1206_vm14, %v2440_v55, %v2434_v30 }
 0xe16   : > { %v2450_v60 = vadd.f32 %v4885_v51, %v2442_v57 }
 0xe18   : > { %v2452_v59 = vmax.f32 %v2450_v60, 0.0 }
 0xe1a   : > { %v2453_v62 = vpack.c.bf16 %v2452_v59, %v2451_v61 }
 0xe1c   : > { %5327 = vmatmul.mubr.msk.bf16.vlgmr.msra.gmra.mxu1 %vm712_vm1, %v2453_v62 }
 0xe1d   : > { %5344 = vmatprep.mubr.msk.bf16.mxu1 %vm6025_vm0, %v6024_v0 }
 0xedc   : > { %v2537_v3 = vpop.f32.mrf.mxu1 }
 0xede   : > { %v5328_v54 = vpop.f32.mrf.mxu1 }
 0xee0   : > { %v2540_v4 = vpop.f32.mrf.mxu1 }
 0xee1   : > { %v6736_v5 = vpack.c.bf16 %v2540_v4, %v2537_v3 }
 0xee2   : > { %v5329_v6 = vpop.f32.mrf.mxu1 }
 0xee3   : > { %5339 = vmatmul.mubr.msk.bf16.vlgmr.msra.gmra.mxu0 %vm712_vm1, %v6736_v5  ;;  %v2570_v7 = vsel %vm712_vm1, %v6736_v5, 0 }
 0xee4   : > { %5349 = vmatpush3.bf16.msra.mxu0 %v6736_v5  ;;  %5343 = vmatpush3.bf16.xpose.msra.mxu1 %v2570_v7 }
 0xee5   : > { %5354 = vmatprep.subr.bf16.mxu1 %v6024_v0  ;;  %5350 = vmatprep.mubr.msk.bf16.mxu0 %vm6025_vm0, %v6024_v0 }
 0xee6   : > { %5360 = vmatprep.subr.bf16.mxu0 %v6024_v0 }
 0xeeb   : > { %5345 = vmatmul.mubr.msk.bf16.vlgmr.msra.gmra.mxu1 %vm712_vm1, %v4902_v8 }
 0xeec   : > { %5356 = vmatprep.mubr.msk.bf16.mxu1 %vm6025_vm0, %v6024_v0 }
 0xfa3   : > { %v2606_v9 = vpop.f32.mrf.mxu0 }
 0xfa4   : > { %2658 = vperm.xlu1 %5608, %v2606_v9  }
 0xfa5   : > { %v5340_v10 = vpop.f32.mrf.mxu0 }
 0xfa7   : > { %v2609_v11 = vpop.f32.mrf.mxu0 }
 0xfa8   : > { %5609 = vset.pattern.permute.xlu1 %v6027_v15  ;;  %2663 = vperm.xlu0 %5610, %v2609_v11  }
 0xfa9   : > { %2750 = vperm.xlu1 %5609, %v2606_v9   ;;  %v5341_v12 = vpop.f32.mrf.mxu0 }
 0xfab   : > { %v2650_v13 = vpop.f32.mrf.mxu1 }
 0xfac   : > { %5611 = vset.pattern.permute.xlu0 %v6028_v28  ;;  %v2669_v18 = vrot.slane %v2650_v13, %v6301_v36  ;;  %v2760_v22 = vrot.slane %v2650_v13, %v6299_v35  ;;  %v2855_v37 = vrot.slane %v2650_v13, %v6317_v49  ;;  %v2949_v52 = vrot.slane %v2650_v13, %v6327_v63 }
 0xfad   : > { %2754 = vperm.xlu1 %5609, %v2609_v11   ;;  %2845 = vperm.xlu0 %5611, %v2606_v9   ;;  %v5346_v14 = vpop.f32.mrf.mxu1 }
 0xfaf   : > { %v2653_v16 = vpop.f32.mrf.mxu1 }
 0xfb1   : > { %5612 = vset.pattern.permute.xlu1 %v6028_v28  ;;  %5614 = vset.pattern.permute.xlu0 %v6029_v31  ;;  %v5347_v17 = vpop.f32.mrf.mxu1 }
 0xfb2   : > { %2849 = vperm.xlu1 %5612, %v2609_v11   ;;  %2943 = vperm.xlu0 %5614, %v2609_v11  }
 0xfb6   : > { %5613 = vset.pattern.permute.xlu1 %v6029_v31  ;;  %5617 = vset.pattern.permute.xlu0 %v6026_v1 }
 0xfb7   : > { %2939 = vperm.xlu1 %5613, %v2606_v9  }
 0xfbb   : > { %5615 = vset.pattern.permute.xlu1 %v6026_v1 }
0x101f   : > { %v2659_v58 = vpop.permute.xlu1 %2658 }
0x1020   : > { %v2670_v20 = vadd.f32 %v2669_v18, %v2659_v58 }
0x1022   : > { %v2674_v23 = vmul.f32 0.2, %v2670_v20  ;;  %vm2672_vm11 = vcmp.gt.f32.partialorder %v2670_v20, 0.0 }
0x1023   : > { %v2664_v24 = vpop.permute.xlu0 %2663 }
0x1024   : > { %v2671_v25 = vadd.f32 %v2669_v18, %v2664_v24  ;;  %v2751_v26 = vpop.permute.xlu1 %2750  ;;  %v2676_v27 = vsel %vm2672_vm11, %v2670_v20, %v2674_v23 }
0x1025   : > { %v2761_v21 = vadd.f32 %v2760_v22, %v2751_v26  ;;  %v2678_v29 = vsel %vm562_vm2, %v2676_v27, -1e+30 }
0x1026   : > { %v2675_v32 = vmul.f32 0.2, %v2671_v25  ;;  %v2680_v33 = vsel %vm824_vm5, %v2678_v29, -inf  ;;  %vm2673_vm12 = vcmp.gt.f32.partialorder %v2671_v25, 0.0 }
0x1027   : > { %v2765_v34 = vmul.f32 0.2, %v2761_v21  ;;  %2681 = vmax.xlane.f32.xlu1 %v2680_v33  ;;  %vm2763_vm15 = vcmp.gt.f32.partialorder %v2761_v21, 0.0 }
0x1028   : > { %v2755_v38 = vpop.permute.xlu1 %2754  ;;  %v2846_v40 = vpop.permute.xlu0 %2845  ;;  %v2677_v41 = vsel %vm2673_vm12, %v2671_v25, %v2675_v32 }
0x1029   : > { %v2762_v42 = vadd.f32 %v2760_v22, %v2755_v38  ;;  %v2856_v43 = vadd.f32 %v2855_v37, %v2846_v40  ;;  %v2679_v45 = vsel %vm563_vm6, %v2677_v41, -1e+30  ;;  %v2767_v46 = vsel %vm2763_vm15, %v2761_v21, %v2765_v34 }
0x102a   : > { %v2683_v19 = vsel %vm824_vm5, %v2679_v45, -inf  ;;  %v2769_v47 = vsel %vm562_vm2, %v2767_v46, -1e+30 }
0x102b   : > { %v2766_v48 = vmul.f32 0.2, %v2762_v42  ;;  %vm2858_vm3 = vcmp.gt.f32.partialorder %v2856_v43, 0.0  ;;  %v2860_v50 = vmul.f32 0.2, %v2856_v43  ;;  %2684 = vmax.xlane.f32.xlu0 %v2683_v19  ;;  %v2771_v51 = vsel %vm824_vm5, %v2769_v47, -inf }
0x102c   : > { %2772 = vmax.xlane.f32.xlu1 %v2771_v51  ;;  %vm2764_vm4 = vcmp.gt.f32.partialorder %v2762_v42, 0.0 }
0x102d   : > { %v2850_v53 = vpop.permute.xlu1 %2849  ;;  %v2944_v55 = vpop.permute.xlu0 %2943  ;;  %v2768_v56 = vsel %vm2764_vm4, %v2762_v42, %v2766_v48  ;;  %v2862_v30 = vsel %vm2858_vm3, %v2856_v43, %v2860_v50 }
0x102e   : > { %v2857_v57 = vadd.f32 %v2855_v37, %v2850_v53  ;;  %v2951_v60 = vadd.f32 %v2949_v52, %v2944_v55  ;;  %v2770_v61 = vsel %vm563_vm6, %v2768_v56, -1e+30  ;;  %v2864_v59 = vsel %vm562_vm2, %v2862_v30, -1e+30 }
0x102f   : > { %v2774_v62 = vsel %vm824_vm5, %v2770_v61, -inf  ;;  %v2866_v2 = vsel %vm824_vm5, %v2864_v59, -inf }
0x1030   : > { %v2861_v3 = vmul.f32 0.2, %v2857_v57  ;;  %vm2953_vm7 = vcmp.gt.f32.partialorder %v2951_v60, 0.0  ;;  %v2955_v54 = vmul.f32 0.2, %v2951_v60  ;;  %2775 = vmax.xlane.f32.xlu0 %v2774_v62  ;;  %2867 = vmax.xlane.f32.xlu1 %v2866_v2  ;;  %vm2859_vm8 = vcmp.gt.f32.partialorder %v2857_v57, 0.0 }
0x1032   : > { %v2940_v4 = vpop.permute.xlu1 %2939  ;;  %v2863_v6 = vsel %vm2859_vm8, %v2857_v57, %v2861_v3  ;;  %v2957_v7 = vsel %vm2953_vm7, %v2951_v60, %v2955_v54 }
0x1033   : > { %v2950_v8 = vadd.f32 %v2949_v52, %v2940_v4  ;;  %v2865_v9 = vsel %vm563_vm6, %v2863_v6, -1e+30  ;;  %v2959_v12 = vsel %vm563_vm6, %v2957_v7, -1e+30 }
0x1034   : > { %v2869_v10 = vsel %vm824_vm5, %v2865_v9, -inf  ;;  %v2963_v14 = vsel %vm824_vm5, %v2959_v12, -inf }
0x1035   : > { %v2954_v11 = vmul.f32 0.2, %v2950_v8  ;;  %2870 = vmax.xlane.f32.xlu0 %v2869_v10  ;;  %vm2952_vm9 = vcmp.gt.f32.partialorder %v2950_v8, 0.0 }
0x1037   : > { %v2956_v13 = vsel %vm2952_vm9, %v2950_v8, %v2954_v11 }
0x1038   : > { %v2958_v16 = vsel %vm562_vm2, %v2956_v13, -1e+30 }
0x1039   : > { %2964 = vmax.xlane.f32.xlu0 %v2963_v14  ;;  %v2960_v17 = vsel %vm824_vm5, %v2958_v16, -inf }
0x103a   : > { %2961 = vmax.xlane.f32.xlu1 %v2960_v17 }
0x104b   : > { %2797 = vrot.lane.b32.xlu1 %v6736_v5, %s6030_s23 }
0x10b0   : > { %v2682_v18 = vpop.xlane.xlu1 %2681 }
0x10b1   : > { %v2686_v58 = vsub.f32 %v2678_v29, %v2682_v18 }
0x10b3   : > { %v2688_v20 = vmul.f32 1.442695, %v2686_v58 }
0x10b4   : > { %v2685_v22 = vpop.xlane.xlu0 %2684 }
0x10b5   : > { %5804 = vpow2.f32 %v2688_v20  ;;  %v2687_v23 = vsub.f32 %v2679_v45, %v2685_v22  ;;  %v2773_v24 = vpop.xlane.xlu1 %2772 }
0x10b6   : > { %v2777_v25 = vsub.f32 %v2769_v47, %v2773_v24 }
0x10b7   : > { %v2690_v26 = vmul.f32 1.442695, %v2687_v23 }
0x10b8   : > { %v2779_v27 = vmul.f32 1.442695, %v2777_v25 }
0x10b9   : > { %5806 = vpow2.f32 %v2690_v26  ;;  %v2776_v21 = vpop.xlane.xlu0 %2775  ;;  %v2868_v32 = vpop.xlane.xlu1 %2867 }
0x10ba   : > { %5808 = vpow2.f32 %v2779_v27  ;;  %v2778_v33 = vsub.f32 %v2770_v61, %v2776_v21  ;;  %v2872_v34 = vsub.f32 %v2864_v59, %v2868_v32 }
0x10bc   : > { %v2781_v37 = vmul.f32 1.442695, %v2778_v33  ;;  %v2874_v38 = vmul.f32 1.442695, %v2872_v34 }
0x10be   : > { %5810 = vpow2.f32 %v2781_v37  ;;  %v2871_v40 = vpop.xlane.xlu0 %2870 }
0x10bf   : > { %5812 = vpow2.f32 %v2874_v38  ;;  %v2873_v29 = vsub.f32 %v2865_v9, %v2871_v40 }
0x10c1   : > { %v2876_v41 = vmul.f32 1.442695, %v2873_v29 }
0x10c2   : > { %v5805_v42 = vpop.eup %5804  ;;  %v2965_v43 = vpop.xlane.xlu0 %2964 }
0x10c3   : > { %5814 = vpow2.f32 %v2876_v41  ;;  %v2967_v45 = vsub.f32 %v2959_v12, %v2965_v43  ;;  %v2962_v46 = vpop.xlane.xlu1 %2961  ;;  %v2692_v19 = vsel %vm562_vm2, %v5805_v42, 0.0 }
0x10c4   : > { %v2966_v47 = vsub.f32 %v2958_v16, %v2962_v46  ;;  %v2694_v48 = vsel %vm824_vm5, %v2692_v19, 0.0 }
0x10c5   : > { %v2970_v50 = vmul.f32 1.442695, %v2967_v45  ;;  %2695 = vadd.xlane.f32.xlu1 %v2694_v48 }
0x10c6   : > { %v5807_v51 = vpop.eup %5806  ;;  %v2968_v52 = vmul.f32 1.442695, %v2966_v47 }
0x10c7   : > { %v5809_v53 = vpop.eup %5808  ;;  %5816 = vpow2.f32 %v2970_v50  ;;  %v2798_v55 = vpop.permute.xlu1 %2797  ;;  %v2693_v56 = vsel %vm563_vm6, %v5807_v51, 0.0  ;;  %v5680_v51 = vld [vmem:[%s7365_s7 + $0x78] sm:$0xff]  }
0x10c8   : > { %5818 = vpow2.f32 %v2968_v52  ;;  %5355 = vmatpush3.bf16.msra.mxu1 %v2798_v55  ;;  %v2697_v30 = vsel %vm824_vm5, %v2693_v56, 0.0  ;;  %v2783_v57 = vsel %vm562_vm2, %v5809_v53, 0.0  ;;  %v5681_v55 = vld [vmem:[%s7365_s7 + $0x70] sm:$0xff]  }
0x10c9   : > { %2698 = vadd.xlane.f32.xlu0 %v2697_v30  ;;  %v2785_v60 = vsel %vm824_vm5, %v2783_v57, 0.0  ;;  %5366 = vmatprep.subr.bf16.mxu1 %v6024_v0 }
0x10ca   : > { %2786 = vadd.xlane.f32.xlu1 %v2785_v60 }
0x10cb   : > { %v5811_v61 = vpop.eup %5810 }
0x10cc   : > { %v5813_v59 = vpop.eup %5812  ;;  %v2784_v62 = vsel %vm563_vm6, %v5811_v61, 0.0  ;;  %v5682_v61 = vld [vmem:[%s7365_s7 + $0x68] sm:$0xff]  }
0x10cd   : > { %v2788_v2 = vsel %vm824_vm5, %v2784_v62, 0.0  ;;  %v2878_v3 = vsel %vm562_vm2, %v5813_v59, 0.0 }
0x10ce   : > { %2789 = vadd.xlane.f32.xlu0 %v2788_v2  ;;  %v2880_v54 = vsel %vm824_vm5, %v2878_v3, 0.0 }
0x10cf   : > { %2881 = vadd.xlane.f32.xlu1 %v2880_v54 }
0x10d0   : > { %v5815_v4 = vpop.eup %5814 }
0x10d1   : > { %v2879_v6 = vsel %vm563_vm6, %v5815_v4, 0.0 }
0x10d2   : > { %v2883_v7 = vsel %vm824_vm5, %v2879_v6, 0.0 }
0x10d3   : > { %2884 = vadd.xlane.f32.xlu0 %v2883_v7 }
0x10d4   : > { %v5817_v8 = vpop.eup %5816 }
0x10d5   : > { %v5819_v9 = vpop.eup %5818  ;;  %v2973_v10 = vsel %vm563_vm6, %v5817_v8, 0.0 }
0x10d6   : > { %v2977_v11 = vsel %vm824_vm5, %v2973_v10, 0.0  ;;  %v2972_v12 = vsel %vm562_vm2, %v5819_v9, 0.0  ;;  %v5685_v9 = vld [vmem:[%s7366_s8 + $0x70] sm:$0xff]  }
0x10d7   : > { %2978 = vadd.xlane.f32.xlu0 %v2977_v11  ;;  %v2974_v13 = vsel %vm824_vm5, %v2972_v12, 0.0 }
0x10d8   : > { %2975 = vadd.xlane.f32.xlu1 %v2974_v13 }
0x10e9   : > { %2985 = vrot.lane.b32.xlu1 %v6736_v5, %s6031_s27 }
0x10ed   : > { %2891 = vrot.lane.b32.xlu0 %v6736_v5, %s6032_s6 }
0x114e   : > { %v2696_v14 = vpop.xlane.xlu1 %2695 }
0x114f   : > { %5820 = vrcp.f32 %v2696_v14 }
0x1152   : > { %v2699_v16 = vpop.xlane.xlu0 %2698 }
0x1153   : > { %5822 = vrcp.f32 %v2699_v16  ;;  %v2787_v17 = vpop.xlane.xlu1 %2786 }
0x1154   : > { %5824 = vrcp.f32 %v2787_v17 }
0x1157   : > { %v2790_v18 = vpop.xlane.xlu0 %2789 }
0x1158   : > { %5826 = vrcp.f32 %v2790_v18  ;;  %v2882_v58 = vpop.xlane.xlu1 %2881 }
0x1159   : > { %5828 = vrcp.f32 %v2882_v58 }
0x115c   : > { %v2885_v20 = vpop.xlane.xlu0 %2884  ;;  %v5821_v22 = vpop.eup %5820 }
0x115d   : > { %5830 = vrcp.f32 %v2885_v20  ;;  %v2701_v26 = vmul.f32 %v5821_v22, %v2692_v19 }
0x1160   : > { %v5823_v23 = vpop.eup %5822  ;;  %v2979_v24 = vpop.xlane.xlu0 %2978 }
0x1161   : > { %5832 = vrcp.f32 %v2979_v24  ;;  %v2976_v25 = vpop.xlane.xlu1 %2975  ;;  %v2703_v27 = vmul.f32 %v5823_v23, %v2693_v56  ;;  %v5825_v5 = vpop.eup %5824  ;;  %v4919_v23 = vld [vmem:[%s7368_s10 + $0x2] ss:$0 sm:$0xff] }
0x1162   : > { %5834 = vrcp.f32 %v2976_v25  ;;  %v2792_v34 = vmul.f32 %v5825_v5, %v2783_v57 }
0x1163   : > { %v2704_v21 = vpack.c.bf16 %v2703_v27, %v2701_v26 }
0x1164   : > { %v2892_v32 = vpop.permute.xlu0 %2891 }
0x1165   : > { %v5827_v33 = vpop.eup %5826  ;;  %5351 = vmatmul.mubr.msk.bf16.vlgmr.msra.gmra.mxu0 %vm824_vm5, %v2704_v21  ;;  %v2986_v41 = vpop.permute.xlu1 %2985 }
0x1166   : > { %5361 = vmatpush3.bf16.msra.mxu0 %v2892_v32  ;;  %v2794_v37 = vmul.f32 %v5827_v33, %v2784_v62  ;;  %5362 = vmatprep.mubr.msk.bf16.mxu0 %vm6025_vm0, %v6024_v0  ;;  %v5829_v38 = vpop.eup %5828 }
0x1167   : > { %5372 = vmatprep.subr.bf16.mxu0 %v6024_v0  ;;  %v2887_v42 = vmul.f32 %v5829_v38, %v2878_v3  ;;  %v5683_v3 = vld [vmem:[%s7365_s7 + $0x60] sm:$0xff]  }
0x1168   : > { %v2795_v40 = vpack.c.bf16 %v2794_v37, %v2792_v34  ;;  %v5687_v38 = vld [vmem:[%s7366_s8 + $0x60] sm:$0xff]  }
0x116a   : > { %v5831_v29 = vpop.eup %5830  ;;  %5357 = vmatmul.mubr.msk.bf16.vlgmr.msra.gmra.mxu1 %vm824_vm5, %v2795_v40 }
0x116b   : > { %5367 = vmatpush3.bf16.msra.mxu1 %v2986_v41  ;;  %v2889_v43 = vmul.f32 %v5831_v29, %v2879_v6  ;;  %5368 = vmatprep.mubr.msk.bf16.mxu1 %vm6025_vm0, %v6024_v0  ;;  %v5684_v6 = vld [vmem:[%s7366_s8 + $0x78] sm:$0xff]  }
0x116c   : > { %5384 = vmatprep.subr.bf16.mxu1 %v6024_v0 }
0x116d   : > { %v2890_v45 = vpack.c.bf16 %v2889_v43, %v2887_v42 }
0x116e   : > { %v5833_v46 = vpop.eup %5832 }
0x116f   : > { %v5835_v19 = vpop.eup %5834  ;;  %5363 = vmatmul.mubr.msk.bf16.vlgmr.msra.gmra.mxu0 %vm824_vm5, %v2890_v45  ;;  %v2983_v47 = vmul.f32 %v5833_v46, %v2973_v10  ;;  %v4936_v46 = vld [vmem:[%s7367_s9 + $0x6] sm:$0x3] }
0x1170   : > { %v2981_v48 = vmul.f32 %v5835_v19, %v2972_v12  ;;  %5380 = vmatprep.mubr.msk.bf16.mxu0 %vm6025_vm0, %v6024_v0  ;;  %5373 = vmatpush3.bf16.msra.mxu0 %v5680_v51  ;;  %v5686_v12 = vld [vmem:[%s7366_s8 + $0x68] sm:$0xff]  }
0x1171   : > { %5374 = vmatprep.subr.bf16.mxu0 %v6024_v0 }
0x1172   : > { %v2984_v50 = vpack.c.bf16 %v2983_v47, %v2981_v48 }
0x1174   : > { %5369 = vmatmul.mubr.msk.bf16.vlgmr.msra.gmra.mxu1 %vm824_vm5, %v2984_v50  ;;  %5375 = vmatpush3.bf16.msra.mxu0 %v5681_v55 }
0x1175   : > { %5392 = vmatprep.mubr.msk.bf16.mxu1 %vm6025_vm0, %v6024_v0  ;;  %5376 = vmatprep.subr.bf16.mxu0 %v6024_v0 }
0x1176   : > { %5385 = vmatpush3.bf16.msra.mxu1 %v5684_v6 }
0x1177   : > { %5386 = vmatprep.subr.bf16.mxu1 %v6024_v0 }
0x1178   : > { %5377 = vmatpush3.bf16.msra.mxu0 %v5682_v61 }
0x1179   : > { %5378 = vmatprep.subr.bf16.mxu0 %v6024_v0 }
0x117a   : > { %5387 = vmatpush3.bf16.msra.mxu1 %v5685_v9 }
0x117b   : > { %5388 = vmatprep.subr.bf16.mxu1 %v6024_v0 }
0x117c   : > { %5379 = vmatpush3.bf16.msra.mxu0 %v5683_v3 }
0x117d   : > { %5396 = vmatprep.subr.bf16.mxu0 %v6024_v0 }
0x117e   : > { %5389 = vmatpush3.bf16.msra.mxu1 %v5686_v12 }
0x117f   : > { %5390 = vmatprep.subr.bf16.mxu1 %v6024_v0 }
0x1182   : > { %5391 = vmatpush3.bf16.msra.mxu1 %v5687_v38 }
0x1183   : > { %5402 = vmatprep.subr.bf16.mxu1 %v6024_v0 }
0x1225   : > { %v2742_v52 = vpop.f32.mrf.mxu0 }
0x1227   : > { %v5352_v53 = vpop.f32.mrf.mxu0 }
0x1229   : > { %v2745_v56 = vpop.f32.mrf.mxu0 }
0x122a   : > { %v2837_v30 = vpop.f32.mrf.mxu1 }
0x122b   : > { %v5353_v57 = vpop.f32.mrf.mxu0  ;;  %3034 = vrot.lane.b32.xlu1 %v2837_v30, %s6033_s5 }
0x122c   : > { %v5358_v60 = vpop.f32.mrf.mxu1 }
0x122e   : > { %v2840_v59 = vpop.f32.mrf.mxu1 }
0x122f   : > { %v2931_v62 = vpop.f32.mrf.mxu0  ;;  %3036 = vrot.lane.b32.xlu0 %v2840_v59, %s6033_s5 }
0x1230   : > { %3042 = vrot.lane.b32.xlu1 %v2931_v62, %s6034_s24  ;;  %v5359_v2 = vpop.f32.mrf.mxu1 }
0x1231   : > { %v5364_v54 = vpop.f32.mrf.mxu0 }
0x1233   : > { %v2934_v4 = vpop.f32.mrf.mxu0 }
0x1234   : > { %3044 = vrot.lane.b32.xlu0 %v2934_v4, %s6034_s24  ;;  %v3025_v7 = vpop.f32.mrf.mxu1 }
0x1235   : > { %v5365_v8 = vpop.f32.mrf.mxu0  ;;  %3050 = vrot.lane.b32.xlu1 %v3025_v7, %s6035_s26 }
0x1236   : > { %v5370_v10 = vpop.f32.mrf.mxu1 }
0x1238   : > { %v3028_v11 = vpop.f32.mrf.mxu1 }
0x1239   : > { %3052 = vrot.lane.b32.xlu0 %v3028_v11, %s6035_s26 }
0x123a   : > { %v5371_v13 = vpop.f32.mrf.mxu1 }
0x129d   : > { %v3035_v14 = vpop.permute.xlu1 %3034 }
0x129e   : > { %v3056_v18 = vsel %vm824_vm5, %v2742_v52, %v3035_v14 }
0x12a1   : > { %v3037_v16 = vpop.permute.xlu0 %3036 }
0x12a2   : > { %v3043_v17 = vpop.permute.xlu1 %3042  ;;  %v3057_v25 = vsel %vm824_vm5, %v2745_v56, %v3037_v16 }
0x12a3   : > { %v3058_v20 = vsel %vm1203_vm13, %v3056_v18, %v3043_v17 }
0x12a6   : > { %v3045_v58 = vpop.permute.xlu0 %3044 }
0x12a7   : > { %v3051_v22 = vpop.permute.xlu1 %3050  ;;  %v3059_v26 = vsel %vm1203_vm13, %v3057_v25, %v3045_v58 }
0x12a8   : > { %v3060_v24 = vsel %vm1206_vm14, %v3058_v20, %v3051_v22 }
0x12a9   : > { %v3068_v27 = vadd.f32 %v4919_v23, %v3060_v24 }
0x12ab   : > { %v3053_v5 = vpop.permute.xlu0 %3052  ;;  %v3070_v33 = vmax.f32 %v3068_v27, 0.0 }
0x12ac   : > { %v3061_v21 = vsel %vm1206_vm14, %v3059_v26, %v3053_v5 }
0x12ad   : > { %v3069_v32 = vadd.f32 %v4919_v23, %v3061_v21 }
0x12af   : > { %v3071_v34 = vmax.f32 %v3069_v32, 0.0 }
0x12b1   : > { %v3072_v37 = vpack.c.bf16 %v3071_v34, %v3070_v33 }
0x12b3   : > { %5381 = vmatmul.mubr.msk.bf16.vlgmr.msra.gmra.mxu0 %vm712_vm1, %v3072_v37 }
0x12b4   : > { %5398 = vmatprep.mubr.msk.bf16.mxu0 %vm6025_vm0, %v6024_v0 }
0x1373   : > { %v3156_v40 = vpop.f32.mrf.mxu0 }
0x1375   : > { %v5382_v29 = vpop.f32.mrf.mxu0 }
0x1377   : > { %v3159_v41 = vpop.f32.mrf.mxu0 }
0x1378   : > { %v6883_v42 = vpack.c.bf16 %v3159_v41, %v3156_v40 }
0x1379   : > { %v5383_v43 = vpop.f32.mrf.mxu0 }
0x137a   : > { %5393 = vmatmul.mubr.msk.bf16.vlgmr.msra.gmra.mxu1 %vm712_vm1, %v6883_v42  ;;  %v3189_v45 = vsel %vm712_vm1, %v6883_v42, 0 }
0x137b   : > { %5403 = vmatpush3.bf16.msra.mxu1 %v6883_v42  ;;  %5397 = vmatpush3.bf16.xpose.msra.mxu0 %v3189_v45 }
0x137c   : > { %5408 = vmatprep.subr.bf16.mxu0 %v6024_v0  ;;  %5404 = vmatprep.mubr.msk.bf16.mxu1 %vm6025_vm0, %v6024_v0 }
0x137d   : > { %5414 = vmatprep.subr.bf16.mxu1 %v6024_v0 }
0x1382   : > { %5399 = vmatmul.mubr.msk.bf16.vlgmr.msra.gmra.mxu0 %vm712_vm1, %v4936_v46 }
0x1383   : > { %5410 = vmatprep.mubr.msk.bf16.mxu0 %vm6025_vm0, %v6024_v0 }
0x143a   : > { %v3225_v19 = vpop.f32.mrf.mxu1 }
0x143b   : > { %3277 = vperm.xlu1 %5615, %v3225_v19  }
0x143c   : > { %v5394_v47 = vpop.f32.mrf.mxu1 }
0x143e   : > { %v3228_v48 = vpop.f32.mrf.mxu1 }
0x143f   : > { %5616 = vset.pattern.permute.xlu1 %v6027_v15  ;;  %3282 = vperm.xlu0 %5617, %v3228_v48  }
0x1440   : > { %3369 = vperm.xlu1 %5616, %v3225_v19   ;;  %v5395_v50 = vpop.f32.mrf.mxu1 }
0x1442   : > { %v3269_v51 = vpop.f32.mrf.mxu0 }
0x1443   : > { %5618 = vset.pattern.permute.xlu0 %v6028_v28  ;;  %v3288_v56 = vrot.slane %v3269_v51, %v6301_v36  ;;  %v3379_v60 = vrot.slane %v3269_v51, %v6299_v35  ;;  %v3474_v9 = vrot.slane %v3269_v51, %v6317_v49  ;;  %v3568_v24 = vrot.slane %v3269_v51, %v6327_v63 }
0x1444   : > { %3373 = vperm.xlu1 %5616, %v3228_v48   ;;  %3464 = vperm.xlu0 %5618, %v3225_v19   ;;  %v5400_v52 = vpop.f32.mrf.mxu0 }
0x1446   : > { %v3272_v53 = vpop.f32.mrf.mxu0 }
0x1448   : > { %5619 = vset.pattern.permute.xlu1 %v6028_v28  ;;  %5621 = vset.pattern.permute.xlu0 %v6029_v31  ;;  %v5401_v55 = vpop.f32.mrf.mxu0 }
0x1449   : > { %3468 = vperm.xlu1 %5619, %v3228_v48   ;;  %3562 = vperm.xlu0 %5621, %v3228_v48  }
0x144d   : > { %5620 = vset.pattern.permute.xlu1 %v6029_v31  ;;  %5624 = vset.pattern.permute.xlu0 %v6026_v1 }
0x144e   : > { %3558 = vperm.xlu1 %5620, %v3225_v19  }
0x1452   : > { %5622 = vset.pattern.permute.xlu1 %v6026_v1 }
0x14b6   : > { %v3278_v30 = vpop.permute.xlu1 %3277 }
0x14b7   : > { %v3289_v57 = vadd.f32 %v3288_v56, %v3278_v30 }
0x14b9   : > { %vm3291_vm10 = vcmp.gt.f32.partialorder %v3289_v57, 0.0  ;;  %v3293_v61 = vmul.f32 0.2, %v3289_v57 }
0x14ba   : > { %v3283_v59 = vpop.permute.xlu0 %3282 }
0x14bb   : > { %v3290_v62 = vadd.f32 %v3288_v56, %v3283_v59  ;;  %v3370_v2 = vpop.permute.xlu1 %3369  ;;  %v3295_v3 = vsel %vm3291_vm10, %v3289_v57, %v3293_v61 }
0x14bc   : > { %v3380_v54 = vadd.f32 %v3379_v60, %v3370_v2  ;;  %v3297_v4 = vsel %vm562_vm2, %v3295_v3, -1e+30 }
0x14bd   : > { %vm3292_vm11 = vcmp.gt.f32.partialorder %v3290_v62, 0.0  ;;  %v3294_v6 = vmul.f32 0.2, %v3290_v62  ;;  %v3299_v7 = vsel %vm824_vm5, %v3297_v4, -inf }
0x14be   : > { %vm3382_vm12 = vcmp.gt.f32.partialorder %v3380_v54, 0.0  ;;  %v3384_v8 = vmul.f32 0.2, %v3380_v54  ;;  %3300 = vmax.xlane.f32.xlu1 %v3299_v7 }
0x14bf   : > { %v3374_v10 = vpop.permute.xlu1 %3373  ;;  %v3465_v11 = vpop.permute.xlu0 %3464  ;;  %v3296_v12 = vsel %vm3292_vm11, %v3290_v62, %v3294_v6 }
0x14c0   : > { %v3381_v13 = vadd.f32 %v3379_v60, %v3374_v10  ;;  %v3475_v14 = vadd.f32 %v3474_v9, %v3465_v11  ;;  %v3298_v16 = vsel %vm563_vm6, %v3296_v12, -1e+30  ;;  %v3386_v17 = vsel %vm3382_vm12, %v3380_v54, %v3384_v8 }
0x14c1   : > { %v3302_v18 = vsel %vm824_vm5, %v3298_v16, -inf  ;;  %v3388_v58 = vsel %vm562_vm2, %v3386_v17, -1e+30 }
0x14c2   : > { %vm3383_vm15 = vcmp.gt.f32.partialorder %v3381_v13, 0.0  ;;  %v3385_v20 = vmul.f32 0.2, %v3381_v13  ;;  %vm3477_vm3 = vcmp.gt.f32.partialorder %v3475_v14, 0.0  ;;  %v3479_v22 = vmul.f32 0.2, %v3475_v14  ;;  %3303 = vmax.xlane.f32.xlu0 %v3302_v18 }
0x14c3   : > { %v3390_v23 = vsel %vm824_vm5, %v3388_v58, -inf }
0x14c4   : > { %3391 = vmax.xlane.f32.xlu1 %v3390_v23  ;;  %v3469_v25 = vpop.permute.xlu1 %3468  ;;  %v3563_v26 = vpop.permute.xlu0 %3562  ;;  %v3387_v27 = vsel %vm3383_vm15, %v3381_v13, %v3385_v20  ;;  %v3481_v5 = vsel %vm3477_vm3, %v3475_v14, %v3479_v22 }
0x14c5   : > { %v3476_v21 = vadd.f32 %v3474_v9, %v3469_v25  ;;  %v3570_v32 = vadd.f32 %v3568_v24, %v3563_v26  ;;  %v3389_v33 = vsel %vm563_vm6, %v3387_v27, -1e+30  ;;  %v3483_v34 = vsel %vm562_vm2, %v3481_v5, -1e+30 }
0x14c6   : > { %v3393_v37 = vsel %vm824_vm5, %v3389_v33, -inf  ;;  %v3485_v38 = vsel %vm824_vm5, %v3483_v34, -inf }
0x14c7   : > { %vm3478_vm4 = vcmp.gt.f32.partialorder %v3476_v21, 0.0  ;;  %v3480_v40 = vmul.f32 0.2, %v3476_v21  ;;  %vm3572_vm7 = vcmp.gt.f32.partialorder %v3570_v32, 0.0  ;;  %v3574_v29 = vmul.f32 0.2, %v3570_v32  ;;  %3394 = vmax.xlane.f32.xlu0 %v3393_v37 }
0x14c8   : > { %3486 = vmax.xlane.f32.xlu1 %v3485_v38 }
0x14c9   : > { %v3559_v41 = vpop.permute.xlu1 %3558  ;;  %v3482_v43 = vsel %vm3478_vm4, %v3476_v21, %v3480_v40  ;;  %v3576_v45 = vsel %vm3572_vm7, %v3570_v32, %v3574_v29 }
0x14ca   : > { %v3569_v46 = vadd.f32 %v3568_v24, %v3559_v41  ;;  %v3484_v19 = vsel %vm563_vm6, %v3482_v43, -1e+30  ;;  %v3578_v50 = vsel %vm563_vm6, %v3576_v45, -1e+30 }
0x14cb   : > { %v3488_v47 = vsel %vm824_vm5, %v3484_v19, -inf  ;;  %v3582_v52 = vsel %vm824_vm5, %v3578_v50, -inf }
0x14cc   : > { %vm3571_vm8 = vcmp.gt.f32.partialorder %v3569_v46, 0.0  ;;  %v3573_v48 = vmul.f32 0.2, %v3569_v46  ;;  %3489 = vmax.xlane.f32.xlu0 %v3488_v47 }
0x14ce   : > { %v3575_v51 = vsel %vm3571_vm8, %v3569_v46, %v3573_v48 }
0x14cf   : > { %v3577_v53 = vsel %vm562_vm2, %v3575_v51, -1e+30 }
0x14d0   : > { %3583 = vmax.xlane.f32.xlu0 %v3582_v52  ;;  %v3579_v55 = vsel %vm824_vm5, %v3577_v53, -inf }
0x14d1   : > { %3580 = vmax.xlane.f32.xlu1 %v3579_v55 }
0x14e2   : > { %3416 = vrot.lane.b32.xlu1 %v6883_v42, %s6030_s23 }
0x1547   : > { %v3301_v56 = vpop.xlane.xlu1 %3300 }
0x1548   : > { %v3305_v30 = vsub.f32 %v3297_v4, %v3301_v56 }
0x154a   : > { %v3307_v57 = vmul.f32 1.442695, %v3305_v30 }
0x154b   : > { %v3304_v60 = vpop.xlane.xlu0 %3303 }
0x154c   : > { %5836 = vpow2.f32 %v3307_v57  ;;  %v3306_v61 = vsub.f32 %v3298_v16, %v3304_v60 }
0x154d   : > { %v3392_v59 = vpop.xlane.xlu1 %3391 }
0x154e   : > { %v3309_v62 = vmul.f32 1.442695, %v3306_v61  ;;  %v3396_v2 = vsub.f32 %v3388_v58, %v3392_v59 }
0x1550   : > { %5838 = vpow2.f32 %v3309_v62  ;;  %v3398_v3 = vmul.f32 1.442695, %v3396_v2  ;;  %v3395_v54 = vpop.xlane.xlu0 %3394 }
0x1551   : > { %v3487_v6 = vpop.xlane.xlu1 %3486  ;;  %v3397_v7 = vsub.f32 %v3389_v33, %v3395_v54 }
0x1552   : > { %5840 = vpow2.f32 %v3398_v3  ;;  %v3491_v8 = vsub.f32 %v3483_v34, %v3487_v6 }
0x1553   : > { %v3400_v9 = vmul.f32 1.442695, %v3397_v7 }
0x1554   : > { %v3493_v10 = vmul.f32 1.442695, %v3491_v8 }
0x1555   : > { %5842 = vpow2.f32 %v3400_v9  ;;  %v3490_v11 = vpop.xlane.xlu0 %3489 }
0x1556   : > { %5844 = vpow2.f32 %v3493_v10  ;;  %v3492_v4 = vsub.f32 %v3484_v19, %v3490_v11 }
0x1558   : > { %v3495_v12 = vmul.f32 1.442695, %v3492_v4 }
0x1559   : > { %v5837_v13 = vpop.eup %5836  ;;  %v3584_v14 = vpop.xlane.xlu0 %3583 }
0x155a   : > { %5846 = vpow2.f32 %v3495_v12  ;;  %v3586_v16 = vsub.f32 %v3578_v50, %v3584_v14  ;;  %v3581_v17 = vpop.xlane.xlu1 %3580  ;;  %v3311_v18 = vsel %vm562_vm2, %v5837_v13, 0.0 }
0x155b   : > { %v3585_v58 = vsub.f32 %v3577_v53, %v3581_v17  ;;  %v3313_v20 = vsel %vm824_vm5, %v3311_v18, 0.0 }
0x155c   : > { %v3589_v22 = vmul.f32 1.442695, %v3586_v16  ;;  %3314 = vadd.xlane.f32.xlu1 %v3313_v20 }
0x155d   : > { %v5839_v23 = vpop.eup %5838  ;;  %v3587_v24 = vmul.f32 1.442695, %v3585_v58 }
0x155e   : > { %5848 = vpow2.f32 %v3589_v22  ;;  %v3417_v25 = vpop.permute.xlu1 %3416  ;;  %v3312_v26 = vsel %vm563_vm6, %v5839_v23, 0.0  ;;  %v5688_v23 = vld [vmem:[%s7365_s7 + $0x98] sm:$0xff]  }
0x155f   : > { %v5841_v27 = vpop.eup %5840  ;;  %5850 = vpow2.f32 %v3587_v24  ;;  %5409 = vmatpush3.bf16.msra.mxu0 %v3417_v25  ;;  %v3316_v5 = vsel %vm824_vm5, %v3312_v26, 0.0 }
0x1560   : > { %3317 = vadd.xlane.f32.xlu0 %v3316_v5  ;;  %v3402_v21 = vsel %vm562_vm2, %v5841_v27, 0.0  ;;  %5420 = vmatprep.subr.bf16.mxu0 %v6024_v0 }
0x1561   : > { %v3404_v32 = vsel %vm824_vm5, %v3402_v21, 0.0 }
0x1562   : > { %v5843_v33 = vpop.eup %5842  ;;  %3405 = vadd.xlane.f32.xlu1 %v3404_v32 }
0x1563   : > { %v5845_v34 = vpop.eup %5844  ;;  %v3403_v37 = vsel %vm563_vm6, %v5843_v33, 0.0  ;;  %v5690_v33 = vld [vmem:[%s7365_s7 + $0x88] sm:$0xff]  }
0x1564   : > { %v3497_v38 = vsel %vm562_vm2, %v5845_v34, 0.0  ;;  %v3407_v40 = vsel %vm824_vm5, %v3403_v37, 0.0 }
0x1565   : > { %v3499_v29 = vsel %vm824_vm5, %v3497_v38, 0.0  ;;  %3408 = vadd.xlane.f32.xlu0 %v3407_v40  ;;  %v5691_v40 = vld [vmem:[%s7365_s7 + $0x80] sm:$0xff]  }
0x1566   : > { %3500 = vadd.xlane.f32.xlu1 %v3499_v29 }
0x1567   : > { %v5847_v41 = vpop.eup %5846 }
0x1568   : > { %v3498_v43 = vsel %vm563_vm6, %v5847_v41, 0.0 }
0x1569   : > { %v3502_v45 = vsel %vm824_vm5, %v3498_v43, 0.0 }
0x156a   : > { %3503 = vadd.xlane.f32.xlu0 %v3502_v45 }
0x156b   : > { %v5849_v46 = vpop.eup %5848 }
0x156c   : > { %v5851_v19 = vpop.eup %5850  ;;  %v3592_v47 = vsel %vm563_vm6, %v5849_v46, 0.0 }
0x156d   : > { %v3596_v48 = vsel %vm824_vm5, %v3592_v47, 0.0  ;;  %v3591_v50 = vsel %vm562_vm2, %v5851_v19, 0.0  ;;  %v5693_v19 = vld [vmem:[%s7366_s8 + $0x90] sm:$0xff]  }
0x156e   : > { %3597 = vadd.xlane.f32.xlu0 %v3596_v48  ;;  %v3593_v51 = vsel %vm824_vm5, %v3591_v50, 0.0 }
0x156f   : > { %3594 = vadd.xlane.f32.xlu1 %v3593_v51 }
0x1580   : > { %3604 = vrot.lane.b32.xlu1 %v6883_v42, %s6031_s27 }
0x1584   : > { %3510 = vrot.lane.b32.xlu0 %v6883_v42, %s6032_s6 }
0x15e5   : > { %v3315_v52 = vpop.xlane.xlu1 %3314 }
0x15e6   : > { %5852 = vrcp.f32 %v3315_v52 }
0x15e9   : > { %v3318_v53 = vpop.xlane.xlu0 %3317 }
0x15ea   : > { %5854 = vrcp.f32 %v3318_v53 }
0x15eb   : > { %v3406_v55 = vpop.xlane.xlu1 %3405 }
0x15ec   : > { %5856 = vrcp.f32 %v3406_v55 }
0x15ee   : > { %v3409_v56 = vpop.xlane.xlu0 %3408 }
0x15ef   : > { %v3501_v30 = vpop.xlane.xlu1 %3500  ;;  %5858 = vrcp.f32 %v3409_v56 }
0x15f0   : > { %5860 = vrcp.f32 %v3501_v30 }
0x15f3   : > { %v3504_v57 = vpop.xlane.xlu0 %3503  ;;  %v5853_v60 = vpop.eup %5852 }
0x15f4   : > { %5862 = vrcp.f32 %v3504_v57  ;;  %v3320_v2 = vmul.f32 %v5853_v60, %v3311_v18 }
0x15f7   : > { %v5855_v61 = vpop.eup %5854  ;;  %v3598_v59 = vpop.xlane.xlu0 %3597 }
0x15f8   : > { %5864 = vrcp.f32 %v3598_v59  ;;  %v3595_v62 = vpop.xlane.xlu1 %3594  ;;  %v3322_v3 = vmul.f32 %v5855_v61, %v3312_v26  ;;  %v5689_v26 = vld [vmem:[%s7365_s7 + $0x90] sm:$0xff]   ;;  %v4953_v61 = vld [vmem:[%s7368_s10 + $0x3] ss:$0 sm:$0xff] }
0x15f9   : > { %5866 = vrcp.f32 %v3595_v62  ;;  %v5857_v42 = vpop.eup %5856 }
0x15fa   : > { %v3323_v54 = vpack.c.bf16 %v3322_v3, %v3320_v2  ;;  %v3411_v8 = vmul.f32 %v5857_v42, %v3402_v21 }
0x15fb   : > { %v3511_v6 = vpop.permute.xlu0 %3510 }
0x15fc   : > { %v5859_v7 = vpop.eup %5858  ;;  %5405 = vmatmul.mubr.msk.bf16.vlgmr.msra.gmra.mxu1 %vm824_vm5, %v3323_v54  ;;  %v3605_v12 = vpop.permute.xlu1 %3604 }
0x15fd   : > { %5415 = vmatpush3.bf16.msra.mxu1 %v3511_v6  ;;  %v3413_v9 = vmul.f32 %v5859_v7, %v3403_v37  ;;  %5416 = vmatprep.mubr.msk.bf16.mxu1 %vm6025_vm0, %v6024_v0  ;;  %v5861_v10 = vpop.eup %5860 }
0x15fe   : > { %5426 = vmatprep.subr.bf16.mxu1 %v6024_v0  ;;  %v3506_v13 = vmul.f32 %v5861_v10, %v3497_v38  ;;  %v5695_v10 = vld [vmem:[%s7366_s8 + $0x80] sm:$0xff]  }
0x15ff   : > { %v3414_v11 = vpack.c.bf16 %v3413_v9, %v3411_v8 }
0x1601   : > { %v5863_v4 = vpop.eup %5862  ;;  %5411 = vmatmul.mubr.msk.bf16.vlgmr.msra.gmra.mxu0 %vm824_vm5, %v3414_v11 }
0x1602   : > { %5421 = vmatpush3.bf16.msra.mxu0 %v3605_v12  ;;  %v3508_v14 = vmul.f32 %v5863_v4, %v3498_v43  ;;  %5422 = vmatprep.mubr.msk.bf16.mxu0 %vm6025_vm0, %v6024_v0  ;;  %v5692_v43 = vld [vmem:[%s7366_s8 + $0x98] sm:$0xff]  }
0x1603   : > { %5438 = vmatprep.subr.bf16.mxu0 %v6024_v0 }
0x1604   : > { %v3509_v16 = vpack.c.bf16 %v3508_v14, %v3506_v13 }
0x1605   : > { %v5865_v17 = vpop.eup %5864 }
0x1606   : > { %v5867_v18 = vpop.eup %5866  ;;  %5417 = vmatmul.mubr.msk.bf16.vlgmr.msra.gmra.mxu1 %vm824_vm5, %v3509_v16  ;;  %v3602_v58 = vmul.f32 %v5865_v17, %v3592_v47  ;;  %v4970_v17 = vld [vmem:[%s7367_s9 + $0x8] sm:$0x3] }
0x1607   : > { %v3600_v20 = vmul.f32 %v5867_v18, %v3591_v50  ;;  %5434 = vmatprep.mubr.msk.bf16.mxu1 %vm6025_vm0, %v6024_v0  ;;  %5427 = vmatpush3.bf16.msra.mxu1 %v5688_v23  ;;  %v5694_v50 = vld [vmem:[%s7366_s8 + $0x88] sm:$0xff]  }
0x1608   : > { %5428 = vmatprep.subr.bf16.mxu1 %v6024_v0 }
0x1609   : > { %v3603_v22 = vpack.c.bf16 %v3602_v58, %v3600_v20 }
0x160b   : > { %5423 = vmatmul.mubr.msk.bf16.vlgmr.msra.gmra.mxu0 %vm824_vm5, %v3603_v22  ;;  %5429 = vmatpush3.bf16.msra.mxu1 %v5689_v26 }
0x160c   : > { %5446 = vmatprep.mubr.msk.bf16.mxu0 %vm6025_vm0, %v6024_v0  ;;  %5430 = vmatprep.subr.bf16.mxu1 %v6024_v0 }
0x160d   : > { %5439 = vmatpush3.bf16.msra.mxu0 %v5692_v43 }
0x160e   : > { %5440 = vmatprep.subr.bf16.mxu0 %v6024_v0 }
0x160f   : > { %5431 = vmatpush3.bf16.msra.mxu1 %v5690_v33 }
0x1610   : > { %5432 = vmatprep.subr.bf16.mxu1 %v6024_v0 }
0x1611   : > { %5441 = vmatpush3.bf16.msra.mxu0 %v5693_v19 }
0x1612   : > { %5442 = vmatprep.subr.bf16.mxu0 %v6024_v0 }
0x1613   : > { %5433 = vmatpush3.bf16.msra.mxu1 %v5691_v40 }
0x1614   : > { %5450 = vmatprep.subr.bf16.mxu1 %v6024_v0 }
0x1615   : > { %5443 = vmatpush3.bf16.msra.mxu0 %v5694_v50 }
0x1616   : > { %5444 = vmatprep.subr.bf16.mxu0 %v6024_v0 }
0x1619   : > { %5445 = vmatpush3.bf16.msra.mxu0 %v5695_v10 }
0x161a   : > { %5456 = vmatprep.subr.bf16.mxu0 %v6024_v0 }
0x16bc   : > { %v3361_v24 = vpop.f32.mrf.mxu1 }
0x16be   : > { %v5406_v25 = vpop.f32.mrf.mxu1 }
0x16c0   : > { %v3364_v27 = vpop.f32.mrf.mxu1 }
0x16c1   : > { %v3456_v5 = vpop.f32.mrf.mxu0 }
0x16c2   : > { %3653 = vrot.lane.b32.xlu1 %v3456_v5, %s6033_s5  ;;  %v5407_v21 = vpop.f32.mrf.mxu1 }
0x16c3   : > { %v5412_v32 = vpop.f32.mrf.mxu0 }
0x16c5   : > { %v3459_v34 = vpop.f32.mrf.mxu0 }
0x16c6   : > { %3655 = vrot.lane.b32.xlu0 %v3459_v34, %s6033_s5  ;;  %v3550_v37 = vpop.f32.mrf.mxu1 }
0x16c7   : > { %v5413_v38 = vpop.f32.mrf.mxu0  ;;  %3661 = vrot.lane.b32.xlu1 %v3550_v37, %s6034_s24 }
0x16c8   : > { %v5418_v29 = vpop.f32.mrf.mxu1 }
0x16ca   : > { %v3553_v41 = vpop.f32.mrf.mxu1 }
0x16cb   : > { %v3644_v45 = vpop.f32.mrf.mxu0  ;;  %3663 = vrot.lane.b32.xlu0 %v3553_v41, %s6034_s24 }
0x16cc   : > { %3669 = vrot.lane.b32.xlu1 %v3644_v45, %s6035_s26  ;;  %v5419_v46 = vpop.f32.mrf.mxu1 }
0x16cd   : > { %v5424_v47 = vpop.f32.mrf.mxu0 }
0x16cf   : > { %v3647_v48 = vpop.f32.mrf.mxu0 }
0x16d0   : > { %3671 = vrot.lane.b32.xlu0 %v3647_v48, %s6035_s26 }
0x16d1   : > { %v5425_v51 = vpop.f32.mrf.mxu0 }
0x1734   : > { %v3654_v52 = vpop.permute.xlu1 %3653 }
0x1735   : > { %v3675_v56 = vsel %vm824_vm5, %v3361_v24, %v3654_v52 }
0x1738   : > { %v3656_v53 = vpop.permute.xlu0 %3655 }
0x1739   : > { %v3662_v55 = vpop.permute.xlu1 %3661  ;;  %v3676_v62 = vsel %vm824_vm5, %v3364_v27, %v3656_v53 }
0x173a   : > { %v3677_v57 = vsel %vm1203_vm13, %v3675_v56, %v3662_v55 }
0x173d   : > { %v3664_v30 = vpop.permute.xlu0 %3663 }
0x173e   : > { %v3670_v60 = vpop.permute.xlu1 %3669  ;;  %v3678_v2 = vsel %vm1203_vm13, %v3676_v62, %v3664_v30 }
0x173f   : > { %v3679_v59 = vsel %vm1206_vm14, %v3677_v57, %v3670_v60 }
0x1740   : > { %v3687_v3 = vadd.f32 %v4953_v61, %v3679_v59 }
0x1742   : > { %v3672_v42 = vpop.permute.xlu0 %3671  ;;  %v3689_v7 = vmax.f32 %v3687_v3, 0.0 }
0x1743   : > { %v3680_v54 = vsel %vm1206_vm14, %v3678_v2, %v3672_v42 }
0x1744   : > { %v3688_v6 = vadd.f32 %v4953_v61, %v3680_v54 }
0x1746   : > { %v3690_v8 = vmax.f32 %v3688_v6, 0.0 }
0x1748   : > { %v3691_v9 = vpack.c.bf16 %v3690_v8, %v3689_v7 }
0x174a   : > { %5435 = vmatmul.mubr.msk.bf16.vlgmr.msra.gmra.mxu1 %vm712_vm1, %v3691_v9 }
0x174b   : > { %5452 = vmatprep.mubr.msk.bf16.mxu1 %vm6025_vm0, %v6024_v0 }
0x180a   : > { %v3775_v11 = vpop.f32.mrf.mxu1 }
0x180c   : > { %v5436_v4 = vpop.f32.mrf.mxu1 }
0x180e   : > { %v3778_v12 = vpop.f32.mrf.mxu1 }
0x180f   : > { %v7030_v13 = vpack.c.bf16 %v3778_v12, %v3775_v11 }
0x1810   : > { %v5437_v14 = vpop.f32.mrf.mxu1 }
0x1811   : > { %5447 = vmatmul.mubr.msk.bf16.vlgmr.msra.gmra.mxu0 %vm712_vm1, %v7030_v13  ;;  %v3808_v16 = vsel %vm712_vm1, %v7030_v13, 0 }
0x1812   : > { %5457 = vmatpush3.bf16.msra.mxu0 %v7030_v13  ;;  %5451 = vmatpush3.bf16.xpose.msra.mxu1 %v3808_v16 }
0x1813   : > { %5462 = vmatprep.subr.bf16.mxu1 %v6024_v0  ;;  %5458 = vmatprep.mubr.msk.bf16.mxu0 %vm6025_vm0, %v6024_v0 }
0x1814   : > { %5468 = vmatprep.subr.bf16.mxu0 %v6024_v0 }
0x1819   : > { %5453 = vmatmul.mubr.msk.bf16.vlgmr.msra.gmra.mxu1 %vm712_vm1, %v4970_v17 }
0x181a   : > { %5464 = vmatprep.mubr.msk.bf16.mxu1 %vm6025_vm0, %v6024_v0 }
0x18d1   : > { %v3844_v18 = vpop.f32.mrf.mxu0 }
0x18d2   : > { %3896 = vperm.xlu1 %5622, %v3844_v18  }
0x18d3   : > { %v5448_v58 = vpop.f32.mrf.mxu0 }
0x18d5   : > { %v3847_v20 = vpop.f32.mrf.mxu0 }
0x18d6   : > { %5623 = vset.pattern.permute.xlu1 %v6027_v15  ;;  %3901 = vperm.xlu0 %5624, %v3847_v20  }
0x18d7   : > { %3988 = vperm.xlu1 %5623, %v3844_v18   ;;  %v5449_v22 = vpop.f32.mrf.mxu0 }
0x18d9   : > { %v3888_v23 = vpop.f32.mrf.mxu1 }
0x18da   : > { %5625 = vset.pattern.permute.xlu0 %v6028_v28  ;;  %v3907_v27 = vrot.slane %v3888_v23, %v6301_v36  ;;  %v3998_v32 = vrot.slane %v3888_v23, %v6299_v35  ;;  %v4093_v46 = vrot.slane %v3888_v23, %v6317_v49  ;;  %v4187_v57 = vrot.slane %v3888_v23, %v6327_v63 }
0x18db   : > { %3992 = vperm.xlu1 %5623, %v3847_v20   ;;  %4083 = vperm.xlu0 %5625, %v3844_v18   ;;  %v5454_v24 = vpop.f32.mrf.mxu1 }
0x18dd   : > { %v3891_v25 = vpop.f32.mrf.mxu1 }
0x18df   : > { %5626 = vset.pattern.permute.xlu1 %v6028_v28  ;;  %5628 = vset.pattern.permute.xlu0 %v6029_v31  ;;  %v5455_v26 = vpop.f32.mrf.mxu1 }
0x18e0   : > { %4087 = vperm.xlu1 %5626, %v3847_v20   ;;  %4181 = vperm.xlu0 %5628, %v3847_v20  }
0x18e4   : > { %5627 = vset.pattern.permute.xlu1 %v6029_v31  ;;  %5630 = vset.pattern.permute.xlu0 %v6026_v1 }
0x18e5   : > { %4177 = vperm.xlu1 %5627, %v3844_v18  }
0x18e9   : > { %5629 = vset.pattern.permute.xlu1 %v6026_v1 }
0x194d   : > { %v3897_v5 = vpop.permute.xlu1 %3896 }
0x194e   : > { %v3908_v21 = vadd.f32 %v3907_v27, %v3897_v5 }
0x1950   : > { %vm3910_vm9 = vcmp.gt.f32.partialorder %v3908_v21, 0.0  ;;  %v3912_v33 = vmul.f32 0.2, %v3908_v21 }
0x1951   : > { %v3902_v34 = vpop.permute.xlu0 %3901 }
0x1952   : > { %v3909_v37 = vadd.f32 %v3907_v27, %v3902_v34  ;;  %v3989_v38 = vpop.permute.xlu1 %3988  ;;  %v3914_v40 = vsel %vm3910_vm9, %v3908_v21, %v3912_v33 }
0x1953   : > { %v3999_v29 = vadd.f32 %v3998_v32, %v3989_v38  ;;  %v3916_v41 = vsel %vm562_vm2, %v3914_v40, -1e+30 }
0x1954   : > { %vm3911_vm10 = vcmp.gt.f32.partialorder %v3909_v37, 0.0  ;;  %v3913_v43 = vmul.f32 0.2, %v3909_v37  ;;  %v3918_v45 = vsel %vm824_vm5, %v3916_v41, -inf }
0x1955   : > { %vm4001_vm11 = vcmp.gt.f32.partialorder %v3999_v29, 0.0  ;;  %v4003_v36 = vmul.f32 0.2, %v3999_v29  ;;  %3919 = vmax.xlane.f32.xlu1 %v3918_v45 }
0x1956   : > { %v3993_v35 = vpop.permute.xlu1 %3992  ;;  %v4084_v19 = vpop.permute.xlu0 %4083  ;;  %v3915_v47 = vsel %vm3911_vm10, %v3909_v37, %v3913_v43 }
0x1957   : > { %v4000_v48 = vadd.f32 %v3998_v32, %v3993_v35  ;;  %v4094_v50 = vadd.f32 %v4093_v46, %v4084_v19  ;;  %v3917_v51 = vsel %vm563_vm6, %v3915_v47, -1e+30  ;;  %v4005_v52 = vsel %vm4001_vm11, %v3999_v29, %v4003_v36 }
0x1958   : > { %v3921_v53 = vsel %vm824_vm5, %v3917_v51, -inf  ;;  %v4007_v55 = vsel %vm562_vm2, %v4005_v52, -1e+30 }
0x1959   : > { %vm4002_vm12 = vcmp.gt.f32.partialorder %v4000_v48, 0.0  ;;  %v4004_v56 = vmul.f32 0.2, %v4000_v48  ;;  %vm4096_vm15 = vcmp.gt.f32.partialorder %v4094_v50, 0.0  ;;  %v4098_v30 = vmul.f32 0.2, %v4094_v50  ;;  %3922 = vmax.xlane.f32.xlu0 %v3921_v53 }
0x195a   : > { %v4009_v49 = vsel %vm824_vm5, %v4007_v55, -inf }
0x195b   : > { %4010 = vmax.xlane.f32.xlu1 %v4009_v49  ;;  %v4088_v60 = vpop.permute.xlu1 %4087  ;;  %v4182_v61 = vpop.permute.xlu0 %4181  ;;  %v4006_v59 = vsel %vm4002_vm12, %v4000_v48, %v4004_v56  ;;  %v4100_v62 = vsel %vm4096_vm15, %v4094_v50, %v4098_v30 }
0x195c   : > { %v4095_v2 = vadd.f32 %v4093_v46, %v4088_v60  ;;  %v4189_v3 = vadd.f32 %v4187_v57, %v4182_v61  ;;  %v4008_v42 = vsel %vm563_vm6, %v4006_v59, -1e+30  ;;  %v4102_v54 = vsel %vm562_vm2, %v4100_v62, -1e+30 }
0x195d   : > { %v4012_v6 = vsel %vm824_vm5, %v4008_v42, -inf  ;;  %v4104_v7 = vsel %vm824_vm5, %v4102_v54, -inf }
0x195e   : > { %vm4097_vm3 = vcmp.gt.f32.partialorder %v4095_v2, 0.0  ;;  %v4099_v8 = vmul.f32 0.2, %v4095_v2  ;;  %vm4191_vm4 = vcmp.gt.f32.partialorder %v4189_v3, 0.0  ;;  %v4193_v63 = vmul.f32 0.2, %v4189_v3  ;;  %4013 = vmax.xlane.f32.xlu0 %v4012_v6 }
0x195f   : > { %4105 = vmax.xlane.f32.xlu1 %v4104_v7 }
0x1960   : > { %v4178_v9 = vpop.permute.xlu1 %4177  ;;  %v4101_v10 = vsel %vm4097_vm3, %v4095_v2, %v4099_v8  ;;  %v4195_v11 = vsel %vm4191_vm4, %v4189_v3, %v4193_v63 }
0x1961   : > { %v4188_v4 = vadd.f32 %v4187_v57, %v4178_v9  ;;  %v4103_v12 = vsel %vm563_vm6, %v4101_v10, -1e+30  ;;  %v4197_v17 = vsel %vm563_vm6, %v4195_v11, -1e+30 }
0x1962   : > { %v4107_v14 = vsel %vm824_vm5, %v4103_v12, -inf  ;;  %v4201_v58 = vsel %vm824_vm5, %v4197_v17, -inf }
0x1963   : > { %vm4190_vm7 = vcmp.gt.f32.partialorder %v4188_v4, 0.0  ;;  %v4192_v16 = vmul.f32 0.2, %v4188_v4  ;;  %4108 = vmax.xlane.f32.xlu0 %v4107_v14 }
0x1965   : > { %v4194_v18 = vsel %vm4190_vm7, %v4188_v4, %v4192_v16 }
0x1966   : > { %v4196_v20 = vsel %vm562_vm2, %v4194_v18, -1e+30 }
0x1967   : > { %4202 = vmax.xlane.f32.xlu0 %v4201_v58  ;;  %v4198_v22 = vsel %vm824_vm5, %v4196_v20, -inf }
0x1968   : > { %4199 = vmax.xlane.f32.xlu1 %v4198_v22 }
0x1979   : > { %4035 = vrot.lane.b32.xlu1 %v7030_v13, %s6030_s23  ;;  %s7399_s23 = sshll.u32 %s6222_s29, 4 }
0x197a   : > { %s558_s17 = scalar_lea.vmem %s7360_s2, %s7399_s23 }
0x197b   : > { %v4313_v44 = vld [vmem:[%s558_s17] sm:$0xff]  ;;  %v4314_v14 = vld [vmem:[%s558_s17 + $0x8] sm:$0xff] }
0x19de   : > { %v3920_v23 = vpop.xlane.xlu1 %3919 }
0x19df   : > { %v3924_v24 = vsub.f32 %v3916_v41, %v3920_v23 }
0x19e1   : > { %v3926_v25 = vmul.f32 1.442695, %v3924_v24 }
0x19e2   : > { %v3923_v26 = vpop.xlane.xlu0 %3922 }
0x19e3   : > { %5868 = vpow2.f32 %v3926_v25  ;;  %v3925_v27 = vsub.f32 %v3917_v51, %v3923_v26 }
0x19e4   : > { %v4011_v5 = vpop.xlane.xlu1 %4010 }
0x19e5   : > { %v3928_v21 = vmul.f32 1.442695, %v3925_v27  ;;  %v4015_v32 = vsub.f32 %v4007_v55, %v4011_v5 }
0x19e7   : > { %5870 = vpow2.f32 %v3928_v21  ;;  %v4017_v33 = vmul.f32 1.442695, %v4015_v32  ;;  %v4014_v34 = vpop.xlane.xlu0 %4013 }
0x19e8   : > { %v4016_v37 = vsub.f32 %v4008_v42, %v4014_v34  ;;  %v4106_v38 = vpop.xlane.xlu1 %4105 }
0x19e9   : > { %5872 = vpow2.f32 %v4017_v33  ;;  %v4110_v40 = vsub.f32 %v4102_v54, %v4106_v38 }
0x19ea   : > { %v4019_v29 = vmul.f32 1.442695, %v4016_v37 }
0x19eb   : > { %v4112_v43 = vmul.f32 1.442695, %v4110_v40 }
0x19ec   : > { %5874 = vpow2.f32 %v4019_v29  ;;  %v4109_v45 = vpop.xlane.xlu0 %4108 }
0x19ed   : > { %5876 = vpow2.f32 %v4112_v43  ;;  %v4111_v41 = vsub.f32 %v4103_v12, %v4109_v45 }
0x19ef   : > { %v4114_v36 = vmul.f32 1.442695, %v4111_v41 }
0x19f0   : > { %v5869_v46 = vpop.eup %5868  ;;  %v4203_v35 = vpop.xlane.xlu0 %4202 }
0x19f1   : > { %5878 = vpow2.f32 %v4114_v36  ;;  %v4205_v19 = vsub.f32 %v4197_v17, %v4203_v35  ;;  %v4200_v47 = vpop.xlane.xlu1 %4199  ;;  %v7086_v48 = vsel %vm562_vm2, %v5869_v46, 0.0 }
0x19f2   : > { %v4204_v50 = vsub.f32 %v4196_v20, %v4200_v47  ;;  %v3932_v51 = vsel %vm824_vm5, %v7086_v48, 0.0  ;;  %v6037_v47 = vmov 5  }
0x19f3   : > { %v4208_v52 = vmul.f32 1.442695, %v4205_v19  ;;  %3933 = vadd.xlane.f32.xlu1 %v3932_v51 }
0x19f4   : > { %v5871_v53 = vpop.eup %5870  ;;  %v4206_v55 = vmul.f32 1.442695, %v4204_v50 }
0x19f5   : > { %5880 = vpow2.f32 %v4208_v52  ;;  %v4036_v56 = vpop.permute.xlu1 %4035  ;;  %v7092_v30 = vsel %vm563_vm6, %v5871_v53, 0.0 }
0x19f6   : > { %v5873_v49 = vpop.eup %5872  ;;  %5882 = vpow2.f32 %v4206_v55  ;;  %5463 = vmatpush3.bf16.msra.mxu1 %v4036_v56  ;;  %v3935_v57 = vsel %vm824_vm5, %v7092_v30, 0.0 }
0x19f7   : > { %3936 = vadd.xlane.f32.xlu0 %v3935_v57  ;;  %v7098_v60 = vsel %vm562_vm2, %v5873_v49, 0.0  ;;  %5474 = vmatprep.subr.bf16.mxu1 %v6024_v0 }
0x19f8   : > { %v4023_v61 = vsel %vm824_vm5, %v7098_v60, 0.0 }
0x19f9   : > { %v5875_v59 = vpop.eup %5874  ;;  %4024 = vadd.xlane.f32.xlu1 %v4023_v61 }
0x19fa   : > { %v5877_v62 = vpop.eup %5876  ;;  %v7105_v2 = vsel %vm563_vm6, %v5875_v59, 0.0 }
0x19fb   : > { %v4026_v3 = vsel %vm824_vm5, %v7105_v2, 0.0  ;;  %v7111_v42 = vsel %vm562_vm2, %v5877_v62, 0.0 }
0x19fc   : > { %4027 = vadd.xlane.f32.xlu0 %v4026_v3  ;;  %v4118_v54 = vsel %vm824_vm5, %v7111_v42, 0.0 }
0x19fd   : > { %4119 = vadd.xlane.f32.xlu1 %v4118_v54  ;;  %v6039_v54 = vmov 7  }
0x19fe   : > { %v5879_v6 = vpop.eup %5878 }
0x19ff   : > { %v7117_v7 = vsel %vm563_vm6, %v5879_v6, 0.0  ;;  %v5696_v6 = vld [vmem:[%s7369_s11 + $0x18] sm:$0xff]  }
0x1a00   : > { %v4121_v8 = vsel %vm824_vm5, %v7117_v7, 0.0 }
0x1a01   : > { %4122 = vadd.xlane.f32.xlu0 %v4121_v8  ;;  %v5698_v8 = vld [vmem:[%s7369_s11 + $0x8] sm:$0xff]  }
0x1a02   : > { %v5881_v63 = vpop.eup %5880 }
0x1a03   : > { %v5883_v9 = vpop.eup %5882  ;;  %v7123_v10 = vsel %vm563_vm6, %v5881_v63, 0.0  ;;  %vm4315_vm6 = vcmp.gt.f32.partialorder %v4313_v44, 0.0  ;;  %v5699_v63 = vld [vmem:[%s7369_s11] sm:$0xff]   ;;  %v5705_v44 = vld [vmem:[%s7371_s13 + $0x10] sm:$0xff]  }
0x1a04   : > { %v4215_v11 = vsel %vm824_vm5, %v7123_v10, 0.0  ;;  %v7129_v4 = vsel %vm562_vm2, %v5883_v9, 0.0  ;;  %v7141_v39 = vsel %vm4315_vm6, 1, %v6026_v1  ;;  %vm4316_vm2 = vcmp.gt.f32.partialorder %v4314_v14, 0.0  ;;  %v5700_v9 = vld [vmem:[%s7371_s13 + $0x38] sm:$0xff]  }
0x1a05   : > { %4216 = vadd.xlane.f32.xlu0 %v4215_v11  ;;  %v4212_v12 = vsel %vm824_vm5, %v7129_v4, 0.0  ;;  %v7147_v16 = vsel %vm4316_vm2, 1, %v6026_v1  ;;  %v6036_v1 = vmov 4   ;;  %v5702_v11 = vld [vmem:[%s7371_s13 + $0x28] sm:$0xff]  }
0x1a06   : > { %4213 = vadd.xlane.f32.xlu1 %v4212_v12  ;;  %v5704_v12 = vld [vmem:[%s7371_s13 + $0x18] sm:$0xff]  }
0x1a17   : > { %4223 = vrot.lane.b32.xlu1 %v7030_v13, %s6031_s27  ;;  %s5956_s27 = sshll.u32 %s6040_s22, 4  ;;  %s5957_s27 = int_to_ptr.vmem [resolvable:$false] %s5956_s27 }
0x1a1b   : > { %4129 = vrot.lane.b32.xlu0 %v7030_v13, %s6032_s6  ;;  %4320 = vperm.xlu1 %5629, %v7141_v39   ;;  %s541_s6 = sand.u32 1, %s6012_s19  }
0x1a1c   : > { %s4683_s17 = scalar_lea.sflag [#allocation4], %s541_s6 }
0x1a1f   : > { %5631 = vset.pattern.permute.xlu1 %v6027_v15  ;;  %4323 = vperm.xlu0 %5630, %v7147_v16  }
0x1a20   : > { %4339 = vperm.xlu1 %5631, %v7141_v39  }
0x1a23   : > { %5632 = vset.pattern.permute.xlu0 %v6028_v28 }
0x1a24   : > { %4342 = vperm.xlu1 %5631, %v7147_v16   ;;  %4358 = vperm.xlu0 %5632, %v7141_v39  }
0x1a28   : > { %5633 = vset.pattern.permute.xlu1 %v6028_v28  ;;  %5635 = vset.pattern.permute.xlu0 %v6029_v31 }
0x1a29   : > { %4361 = vperm.xlu1 %5633, %v7147_v16   ;;  %4380 = vperm.xlu0 %5635, %v7147_v16  }
0x1a2d   : > { %5634 = vset.pattern.permute.xlu1 %v6029_v31  ;;  %5637 = vset.pattern.permute.xlu0 %v6037_v47 }
0x1a2e   : > { %4377 = vperm.xlu1 %5634, %v7141_v39  }
0x1a32   : > { %5636 = vset.pattern.permute.xlu1 %v6036_v1 }
0x1a33   : > { %4396 = vperm.xlu1 %5636, %v7141_v39  }
0x1a37   : > { %4399 = vperm.xlu1 %5636, %v7147_v16  }
0x1a3b   : > { %5638 = vset.pattern.permute.xlu1 %v6037_v47 }
0x1a7c   : > { %v3934_v15 = vpop.xlane.xlu1 %3933 }
0x1a7d   : > { %5884 = vrcp.f32 %v3934_v15 }
0x1a80   : > { %v3937_v13 = vpop.xlane.xlu0 %3936 }
0x1a81   : > { %5886 = vrcp.f32 %v3937_v13 }
0x1a82   : > { %v4025_v28 = vpop.xlane.xlu1 %4024 }
0x1a83   : > { %5888 = vrcp.f32 %v4025_v28 }
0x1a85   : > { %v4028_v17 = vpop.xlane.xlu0 %4027 }
0x1a86   : > { %5890 = vrcp.f32 %v4028_v17  ;;  %v4120_v18 = vpop.xlane.xlu1 %4119 }
0x1a87   : > { %5892 = vrcp.f32 %v4120_v18 }
0x1a8a   : > { %v4123_v58 = vpop.xlane.xlu0 %4122  ;;  %v5885_v31 = vpop.eup %5884 }
0x1a8b   : > { %5894 = vrcp.f32 %v4123_v58  ;;  %v3939_v24 = vmul.f32 %v5885_v31, %v7086_v48 }
0x1a8e   : > { %v5887_v20 = vpop.eup %5886  ;;  %v4217_v22 = vpop.xlane.xlu0 %4216 }
0x1a8f   : > { %5896 = vrcp.f32 %v4217_v22  ;;  %v4214_v23 = vpop.xlane.xlu1 %4213  ;;  %v3941_v25 = vmul.f32 %v5887_v20, %v7092_v30 }
0x1a90   : > { %5898 = vrcp.f32 %v4214_v23  ;;  %v5889_v26 = vpop.eup %5888 }
0x1a91   : > { %v3942_v27 = vpack.c.bf16 %v3941_v25, %v3939_v24  ;;  %v4030_v32 = vmul.f32 %v5889_v26, %v7098_v60 }
0x1a92   : > { %v4130_v5 = vpop.permute.xlu0 %4129 }
0x1a93   : > { %v5891_v21 = vpop.eup %5890  ;;  %5459 = vmatmul.mubr.msk.bf16.vlgmr.msra.gmra.mxu0 %vm824_vm5, %v3942_v27  ;;  %v4224_v40 = vpop.permute.xlu1 %4223  ;;  %v4987_v27 = vld [vmem:[%s7368_s10 + $0x4] ss:$0 sm:$0xff] }
0x1a94   : > { %5469 = vmatpush3.bf16.msra.mxu0 %v4130_v5  ;;  %v4032_v33 = vmul.f32 %v5891_v21, %v7105_v2  ;;  %5470 = vmatprep.mubr.msk.bf16.mxu0 %vm6025_vm0, %v6024_v0  ;;  %v5893_v34 = vpop.eup %5892 }
0x1a95   : > { %5480 = vmatprep.subr.bf16.mxu0 %v6024_v0  ;;  %v4125_v29 = vmul.f32 %v5893_v34, %v7111_v42  ;;  %v6038_v42 = vmov 6  }
0x1a96   : > { %v4033_v37 = vpack.c.bf16 %v4032_v33, %v4030_v32 }
0x1a97   : > { %v4321_v14 = vpop.permute.xlu1 %4320 }
0x1a98   : > { %v5895_v38 = vpop.eup %5894  ;;  %5465 = vmatmul.mubr.msk.bf16.vlgmr.msra.gmra.mxu1 %vm824_vm5, %v4033_v37 }
0x1a99   : > { %5475 = vmatpush3.bf16.msra.mxu1 %v4224_v40  ;;  %v4127_v43 = vmul.f32 %v5895_v38, %v7117_v7  ;;  %5476 = vmatprep.mubr.msk.bf16.mxu1 %vm6025_vm0, %v6024_v0  ;;  %v5697_v7 = vld [vmem:[%s7369_s11 + $0x10] sm:$0xff]  }
0x1a9a   : > { %5492 = vmatprep.subr.bf16.mxu1 %v6024_v0  ;;  %v4324_v13 = vpop.permute.xlu0 %4323 }
0x1a9b   : > { %v4128_v45 = vpack.c.bf16 %v4127_v43, %v4125_v29  ;;  %vm4326_vm8 = vcmp.eq.s32.totalorder %v4324_v13, 1 }
0x1a9c   : > { %v5897_v41 = vpop.eup %5896 }
0x1a9d   : > { %v5899_v36 = vpop.eup %5898  ;;  %5471 = vmatmul.mubr.msk.bf16.vlgmr.msra.gmra.mxu0 %vm824_vm5, %v4128_v45  ;;  %v4221_v46 = vmul.f32 %v5897_v41, %v7123_v10  ;;  %v5701_v10 = vld [vmem:[%s7371_s13 + $0x30] sm:$0xff]  }
0x1a9e   : > { %v4219_v35 = vmul.f32 %v5899_v36, %v7129_v4  ;;  %5488 = vmatprep.mubr.msk.bf16.mxu0 %vm6025_vm0, %v6024_v0  ;;  %5481 = vmatpush3.bf16.msra.mxu0 %v5696_v6  ;;  %v5703_v4 = vld [vmem:[%s7371_s13 + $0x20] sm:$0xff]  }
0x1a9f   : > { %5482 = vmatprep.subr.bf16.mxu0 %v6024_v0  ;;  %v4359_v17 = vpop.permute.xlu0 %4358 }
0x1aa0   : > { %v4222_v19 = vpack.c.bf16 %v4221_v46, %v4219_v35  ;;  %vm4363_vm10 = vcmp.eq.s32.totalorder %v4359_v17, 1 }
0x1aa2   : > { %5477 = vmatmul.mubr.msk.bf16.vlgmr.msra.gmra.mxu1 %vm824_vm5, %v4222_v19  ;;  %5483 = vmatpush3.bf16.msra.mxu0 %v5697_v7 }
0x1aa3   : > { %5508 = vmatprep.mubr.msk.bf16.mxu1 %vm6025_vm0, %v6024_v0  ;;  %5484 = vmatprep.subr.bf16.mxu0 %v6024_v0  ;;  %vm4325_vm0 = vcmp.eq.s32.totalorder %v4321_v14, 1 }
0x1aa4   : > { %5493 = vmatpush3.bf16.msra.mxu1 %v5700_v9  ;;  %v4381_v58 = vpop.permute.xlu0 %4380 }
0x1aa5   : > { %5494 = vmatprep.subr.bf16.mxu1 %v6024_v0 }
0x1aa6   : > { %5485 = vmatpush3.bf16.msra.mxu0 %v5698_v8 }
0x1aa7   : > { %5486 = vmatprep.subr.bf16.mxu0 %v6024_v0 }
0x1aa8   : > { %5495 = vmatpush3.bf16.msra.mxu1 %v5701_v10 }
0x1aa9   : > { %5496 = vmatprep.subr.bf16.mxu1 %v6024_v0 }
0x1aaa   : > { %5487 = vmatpush3.bf16.msra.mxu0 %v5699_v63 }
0x1aac   : > { %5497 = vmatpush3.bf16.msra.mxu1 %v5702_v11 }
0x1aad   : > { %5498 = vmatprep.subr.bf16.mxu1 %v6024_v0 }
0x1ab0   : > { %5499 = vmatpush3.bf16.msra.mxu1 %v5703_v4 }
0x1ab1   : > { %5500 = vmatprep.subr.bf16.mxu1 %v6024_v0 }
0x1ab4   : > { %5501 = vmatpush3.bf16.msra.mxu1 %v5704_v12 }
0x1ab5   : > { %5502 = vmatprep.subr.bf16.mxu1 %v6024_v0 }
0x1ab8   : > { %5503 = vmatpush3.bf16.msra.mxu1 %v5705_v44 }
0x1ab9   : > { %5504 = vmatprep.subr.bf16.mxu1 %v6024_v0 }
0x1b53   : > { %v7185_v48 = vpop.f32.mrf.mxu0 }
0x1b55   : > { %v5460_v50 = vpop.f32.mrf.mxu0 }
0x1b57   : > { %v7187_v51 = vpop.f32.mrf.mxu0 }
0x1b58   : > { %v4075_v52 = vpop.f32.mrf.mxu1 }
0x1b59   : > { %v5461_v53 = vpop.f32.mrf.mxu0  ;;  %4272 = vrot.lane.b32.xlu1 %v4075_v52, %s6033_s5 }
0x1b5a   : > { %v5466_v55 = vpop.f32.mrf.mxu1 }
0x1b5c   : > { %v4078_v56 = vpop.f32.mrf.mxu1 }
0x1b5d   : > { %v4169_v30 = vpop.f32.mrf.mxu0  ;;  %4274 = vrot.lane.b32.xlu0 %v4078_v56, %s6033_s5  ;;  %s4809_s5 = sshll.u32 %s541_s6, 3 }
0x1b5e   : > { %4280 = vrot.lane.b32.xlu1 %v4169_v30, %s6034_s24  ;;  %v5467_v49 = vpop.f32.mrf.mxu1  ;;  %s543_s20 = scalar_lea.vmem [#allocation7], %s4809_s5  ;;  %s5958_s5 = scalar_lea.vmem %s5957_s27, 256 }
0x1b5f   : > { %v5472_v57 = vpop.f32.mrf.mxu0  ;;  %s4696_s25 = sshll.u32 %s543_s20, 4  ;;  %s7319_s25 = int_to_ptr.vmem [resolvable:$true] %s4696_s25 }
0x1b60   : > { %s5952_s29 = scalar_lea.vmem %s7319_s25, 128  ;;  %p5959_p8 = scmp.lt.s32.totalorder %s7319_s25, %s5957_s27 }
0x1b61   : > { %v4172_v60 = vpop.f32.mrf.mxu0  ;;  %p5953_p10 = scmp.ne.s32.totalorder %s7319_s25, %s5952_s29  ;;  %p5960_p11 = scmp.lt.s32.totalorder %s5958_s5, %s5952_s29 }
0x1b62   : > { %4282 = vrot.lane.b32.xlu0 %v4172_v60, %s6034_s24  ;;  %v4263_v61 = vpop.f32.mrf.mxu1 }
0x1b63   : > { %v5473_v59 = vpop.f32.mrf.mxu0  ;;  %4288 = vrot.lane.b32.xlu1 %v4263_v61, %s6035_s26  ;;  %p5954_p4 = pnand %p5953_p10, %p7400_p12  ;;  %p5961_p0 = por %p5960_p11, %p5959_p8 }
0x1b64   : > { %v5478_v62 = vpop.f32.mrf.mxu1 }
0x1b65   : > { %p5955_p7 = pneg %p5954_p4 }
0x1b66   : > { %v4266_v2 = vpop.f32.mrf.mxu1 }
0x1b67   : > { %4418 = vperm.xlu1 %5638, %v7147_v16   ;;  %4290 = vrot.lane.b32.xlu0 %v4266_v2, %s6035_s26  ;;  %p5962_p1 = pnand %p5961_p0, %p5955_p7 }
0x1b68   : > { %v5479_v3 = vpop.f32.mrf.mxu1 }
0x1b6b   : > { %5639 = vset.pattern.permute.xlu1 %v6038_v42  ;;  %4415 = vperm.xlu0 %5637, %v7141_v39  }
0x1b6c   : > { %4434 = vperm.xlu1 %5639, %v7141_v39  }
0x1b6f   : > { %5640 = vset.pattern.permute.xlu0 %v6038_v42 }
0x1b70   : > { %5641 = vset.pattern.permute.xlu1 %v6039_v54  ;;  %4437 = vperm.xlu0 %5640, %v7147_v16  }
0x1b71   : > { %4453 = vperm.xlu1 %5641, %v7141_v39   ;;  %v4340_v39 = vpop.permute.xlu1 %4339 }
0x1b72   : > { %vm4344_vm9 = vcmp.eq.s32.totalorder %v4340_v39, 1 }
0x1b74   : > { %5642 = vset.pattern.permute.xlu0 %v6039_v54 }
0x1b75   : > { %4456 = vperm.xlu1 %5641, %v7147_v16   ;;  %v4343_v16 = vpop.permute.xlu1 %4342 }
0x1b76   : > { %vm4345_vm11 = vcmp.eq.s32.totalorder %v4343_v16, 1 }
0x1b79   : > { %v4362_v1 = vpop.permute.xlu1 %4361 }
0x1b7d   : > { %v4378_v15 = vpop.permute.xlu1 %4377 }
0x1b7e   : > { %vm4382_vm12 = vcmp.eq.s32.totalorder %v4378_v15, 1 }
0x1b81   : > { %v4397_v28 = vpop.permute.xlu1 %4396 }
0x1b82   : > { %vm4401_vm15 = vcmp.eq.s32.totalorder %v4397_v28, 1 }
0x1b85   : > { %v7240_v18 = vpop.permute.xlu1 %4399 }
0x1bcb   : > { %v4273_v31 = vpop.permute.xlu1 %4272 }
0x1bcc   : > { %v4294_v23 = vsel %vm824_vm5, %v7185_v48, %v4273_v31 }
0x1bcf   : > { %v4275_v20 = vpop.permute.xlu0 %4274 }
0x1bd0   : > { %v4281_v22 = vpop.permute.xlu1 %4280  ;;  %v4295_v21 = vsel %vm824_vm5, %v7187_v51, %v4275_v20  ;;  %vm4364_vm5 = vcmp.eq.s32.totalorder %v4362_v1, 1 }
0x1bd1   : > { %v4296_v25 = vsel %vm1203_vm13, %v4294_v23, %v4281_v22 }
0x1bd4   : > { %v4283_v24 = vpop.permute.xlu0 %4282 }
0x1bd5   : > { %v4289_v26 = vpop.permute.xlu1 %4288  ;;  %v4297_v32 = vsel %vm1203_vm13, %v4295_v21, %v4283_v24  ;;  %vm4383_vm13 = vcmp.eq.s32.totalorder %v4381_v58, 1 }
0x1bd6   : > { %v4298_v5 = vsel %vm1206_vm14, %v4296_v25, %v4289_v26 }
0x1bd7   : > { %v4306_v33 = vadd.f32 %v4987_v27, %v4298_v5 }
0x1bd9   : > { %v4291_v34 = vpop.permute.xlu0 %4290  ;;  %v4308_v40 = vmax.f32 %v4306_v33, 0.0 }
0x1bda   : > { %v4299_v37 = vsel %vm1206_vm14, %v4297_v32, %v4291_v34  ;;  %vm4402_vm14 = vcmp.eq.s32.totalorder %v7240_v18, 1 }
0x1bdb   : > { %v4307_v38 = vadd.f32 %v4987_v27, %v4299_v37 }
0x1bdd   : > { %v4309_v29 = vmax.f32 %v4307_v38, 0.0 }
0x1bdf   : > { %v4310_v43 = vpack.c.bf16 %v4309_v29, %v4308_v40 }
0x1be1   : > { %v7253_v45 = vunpack.c.l.bf16 %v4310_v43  ;;  %v7255_v41 = vunpack.c.h.bf16 %v4310_v43 }
0x1be2   : > { %v4419_v36 = vpop.permute.xlu1 %4418 }
0x1be3   : > { %vm4421_vm3 = vcmp.eq.s32.totalorder %v4419_v36, 1  ;;  %v4327_v46 = vsel %vm4325_vm0, %v7253_v45, -1e+30  ;;  %v4328_v35 = vsel %vm4326_vm8, %v7255_v41, -1e+30  ;;  %vm4471_vm8 = vcmask 1040384  }
0x1be4   : > { %v4423_v19 = vsel %vm4421_vm3, %v7255_v41, -1e+30  ;;  %v4329_v47 = vsel %vm712_vm1, %v4327_v46, -inf  ;;  %v4330_v48 = vsel %vm712_vm1, %v4328_v35, -inf  ;;  %v4346_v50 = vsel %vm4344_vm9, %v7253_v45, -1e+30 }
0x1be5   : > { %v4331_v51 = vmax.f32 %v4329_v47, %v4330_v48  ;;  %v4347_v52 = vsel %vm4345_vm11, %v7255_v41, -1e+30  ;;  %v4348_v53 = vsel %vm712_vm1, %v4346_v50, -inf  ;;  %v4425_v55 = vsel %vm712_vm1, %v4423_v19, -inf }
0x1be6   : > { %v4349_v56 = vsel %vm712_vm1, %v4347_v52, -inf  ;;  %v4365_v30 = vsel %vm4363_vm10, %v7253_v45, -1e+30  ;;  %v4366_v49 = vsel %vm4364_vm5, %v7255_v41, -1e+30  ;;  %v4416_v57 = vpop.permute.xlu0 %4415  ;;  %vm4473_vm9 = vcmask 1041408  }
0x1be7   : > { %v4332_v60 = vrot.slane %v4331_v51, 4  ;;  %v4350_v61 = vmax.f32 %v4348_v53, %v4349_v56  ;;  %v4367_v59 = vsel %vm712_vm1, %v4365_v30, -inf  ;;  %v4368_v62 = vsel %vm712_vm1, %v4366_v49, -inf  ;;  %v4435_v2 = vpop.permute.xlu1 %4434 }
0x1be8   : > { %v4369_v3 = vmax.f32 %v4367_v59, %v4368_v62  ;;  %v4384_v42 = vsel %vm4382_vm12, %v7253_v45, -1e+30  ;;  %v4385_v54 = vsel %vm4383_vm13, %v7255_v41, -1e+30  ;;  %v4403_v6 = vsel %vm4401_vm15, %v7253_v45, -1e+30 }
0x1be9   : > { %v4333_v7 = vmax.f32 %v4331_v51, %v4332_v60  ;;  %v4351_v8 = vrot.slane %v4350_v61, 4  ;;  %v4386_v63 = vsel %vm712_vm1, %v4384_v42, -inf  ;;  %v4387_v9 = vsel %vm712_vm1, %v4385_v54, -inf }
0x1bea   : > { %v4370_v10 = vrot.slane %v4369_v3, 4  ;;  %v4388_v11 = vmax.f32 %v4386_v63, %v4387_v9  ;;  %v4404_v4 = vsel %vm4402_vm14, %v7255_v41, -1e+30  ;;  %v4405_v12 = vsel %vm712_vm1, %v4403_v6, -inf }
0x1beb   : > { %v4334_v44 = vrot.slane %v4333_v7, 2  ;;  %v4352_v14 = vmax.f32 %v4350_v61, %v4351_v8  ;;  %v4406_v39 = vsel %vm712_vm1, %v4404_v4, -inf  ;;  %vm4420_vm4 = vcmp.eq.s32.totalorder %v4416_v57, 1  ;;  %v4438_v28 = vpop.permute.xlu0 %4437 }
0x1bec   : > { %v4371_v16 = vmax.f32 %v4369_v3, %v4370_v10  ;;  %v4389_v1 = vrot.slane %v4388_v11, 4  ;;  %v4407_v15 = vmax.f32 %v4405_v12, %v4406_v39  ;;  %v4422_v13 = vsel %vm4420_vm4, %v7253_v45, -1e+30  ;;  %v4454_v17 = vpop.permute.xlu1 %4453 }
0x1bed   : > { %v4335_v58 = vmax.f32 %v4333_v7, %v4334_v44  ;;  %v4353_v31 = vrot.slane %v4352_v14, 2  ;;  %v4424_v20 = vsel %vm712_vm1, %v4422_v13, -inf  ;;  %vm4439_vm7 = vcmp.eq.s32.totalorder %v4435_v2, 1 }
0x1bee   : > { %v4372_v18 = vrot.slane %v4371_v16, 2  ;;  %v4390_v22 = vmax.f32 %v4388_v11, %v4389_v1  ;;  %v4408_v23 = vrot.slane %v4407_v15, 4  ;;  %v4426_v24 = vmax.f32 %v4424_v20, %v4425_v55 }
0x1bef   : > { %v4336_v25 = vrot.slane %v4335_v58, 1  ;;  %v4354_v26 = vmax.f32 %v4352_v14, %v4353_v31  ;;  %vm4440_vm6 = vcmp.eq.s32.totalorder %v4438_v28, 1  ;;  %v4441_v37 = vsel %vm4439_vm7, %v7253_v45, -1e+30  ;;  %v5706_v28 = vld [vmem:[%s7371_s13 + $0x8] sm:$0xff]  }
0x1bf0   : > { %v4373_v27 = vmax.f32 %v4371_v16, %v4372_v18  ;;  %v4391_v5 = vrot.slane %v4390_v22, 2  ;;  %v4409_v21 = vmax.f32 %v4407_v15, %v4408_v23  ;;  %v4427_v32 = vrot.slane %v4426_v24, 4  ;;  %v4457_v33 = vpop.permute.xlu1 %4456  ;;  %5505 = vmatpush3.bf16.msra.mxu1 %v5706_v28 }
0x1bf1   : > { %v4355_v34 = vrot.slane %v4354_v26, 1  ;;  %v4442_v38 = vsel %vm4440_vm6, %v7255_v41, -1e+30  ;;  %v4337_v40 = vmax.f32 %v4335_v58, %v4336_v25  ;;  %vm4458_vm2 = vcmp.eq.s32.totalorder %v4454_v17, 1  ;;  %5506 = vmatprep.subr.bf16.mxu1 %v6024_v0  ;;  %v5707_v17 = vld [vmem:[%s7371_s13] sm:$0xff]  }
0x1bf2   : > { %v4374_v29 = vrot.slane %v4373_v27, 1  ;;  %v4428_v43 = vmax.f32 %v4426_v24, %v4427_v32  ;;  %v4410_v36 = vrot.slane %v4409_v21, 2  ;;  %v4444_v46 = vsel %vm712_vm1, %v4442_v38, -inf  ;;  %v4988_v58 = vld [vmem:[%s7370_s12] ss:$0 sm:$0xff] }
0x1bf3   : > { %vm4459_vm0 = vcmp.eq.s32.totalorder %v4457_v33, 1  ;;  %v4356_v35 = vmax.f32 %v4354_v26, %v4355_v34  ;;  %v4392_v19 = vmax.f32 %v4390_v22, %v4391_v5  ;;  %v4443_v48 = vsel %vm712_vm1, %v4441_v37, -inf  ;;  %v4994_v0 = vld [vmem:[%s7372_s14] ss:$0 sm:$0xff] }
0x1bf4   : > { %v4429_v47 = vrot.slane %v4428_v43, 2  ;;  %v4445_v50 = vmax.f32 %v4443_v48, %v4444_v46  ;;  %v4460_v51 = vsel %vm4458_vm2, %v7253_v45, -1e+30  ;;  %v4461_v52 = vsel %vm4459_vm0, %v7255_v41, -1e+30  ;;  %5507 = vmatpush3.bf16.msra.mxu1 %v5707_v17 }
0x1bf5   : > { %v4375_v53 = vmax.f32 %v4373_v27, %v4374_v29  ;;  %v4411_v55 = vmax.f32 %v4409_v21, %v4410_v36  ;;  %v4462_v30 = vsel %vm712_vm1, %v4460_v51, -inf  ;;  %v4463_v49 = vsel %vm712_vm1, %v4461_v52, -inf }
0x1bf6   : > { %v4446_v56 = vrot.slane %v4445_v50, 4  ;;  %v4393_v57 = vrot.slane %v4392_v19, 1  ;;  %v4472_v60 = vsel %vm4471_vm8, %v4337_v40, %v4356_v35  ;;  %v4430_v61 = vmax.f32 %v4428_v43, %v4429_v47 }
0x1bf7   : > { %v4464_v59 = vmax.f32 %v4462_v30, %v4463_v49  ;;  %v4412_v3 = vrot.slane %v4411_v55, 1  ;;  %v4474_v42 = vsel %vm4473_vm9, %v4472_v60, %v4375_v53  ;;  %vm4475_vm10 = vcmask 1042432  }
0x1bf8   : > { %v4447_v62 = vmax.f32 %v4445_v50, %v4446_v56  ;;  %v4394_v54 = vmax.f32 %v4392_v19, %v4393_v57  ;;  %v4431_v41 = vrot.slane %v4430_v61, 1  ;;  %vm4477_vm11 = vcmask 1043456  }
0x1bf9   : > { %v4465_v2 = vrot.slane %v4464_v59, 4  ;;  %v4413_v9 = vmax.f32 %v4411_v55, %v4412_v3  ;;  %vm4479_vm5 = vcmask 1044480   ;;  %vm4481_vm12 = vcmask 1045504  }
0x1bfa   : > { %v4448_v45 = vrot.slane %v4447_v62, 2  ;;  %v4476_v8 = vsel %vm4475_vm10, %v4474_v42, %v4394_v54  ;;  %v4432_v11 = vmax.f32 %v4430_v61, %v4431_v41  ;;  %vm4483_vm13 = vcmask 1046528  }
0x1bfb   : > { %v4466_v6 = vmax.f32 %v4464_v59, %v4465_v2  ;;  %v4478_v12 = vsel %vm4477_vm11, %v4476_v8, %v4413_v9 }
0x1bfc   : > { %v4449_v7 = vmax.f32 %v4447_v62, %v4448_v45  ;;  %v4480_v39 = vsel %vm4479_vm5, %v4478_v12, %v4432_v11 }
0x1bfd   : > { %v4467_v63 = vrot.slane %v4466_v6, 2 }
0x1bfe   : > { %v4450_v10 = vrot.slane %v4449_v7, 1 }
0x1bff   : > { %v4468_v4 = vmax.f32 %v4466_v6, %v4467_v63 }
0x1c00   : > { %v4451_v44 = vmax.f32 %v4449_v7, %v4450_v10 }
0x1c01   : > { %v4469_v14 = vrot.slane %v4468_v4, 1 }
0x1c02   : > { %v4482_v1 = vsel %vm4481_vm12, %v4480_v39, %v4451_v44 }
0x1c03   : > { %v4470_v16 = vmax.f32 %v4468_v4, %v4469_v14 }
0x1c05   : > { %v4484_v15 = vsel %vm4483_vm13, %v4482_v1, %v4470_v16 }
0x1c06   : > { %v4485_v13 = vpack.c.bf16 %v4484_v15, %v4484_v15 }
0x1c08   : > { %5489 = vmatmul.mubr.msk.bf16.vlgmr.msra.gmra.mxu0 %vm712_vm1, %v4485_v13 }
0x1cc8   : > { %v4562_v31 = vpop.f32.mrf.mxu0 }
0x1cc9   : > { %v4563_v20 = vadd.f32 %v4988_v58, %v4562_v31 }
0x1cca   : > { %v5490_v18 = vpop.f32.mrf.mxu0 }
0x1ccb   : > { %v4568_v22 = vmax.f32 %v4563_v20, 0.0 }
0x1ccc   : > { %v4565_v23 = vpop.f32.mrf.mxu0 }
0x1ccd   : > { %v4569_v24 = vpack.c.bf16 %v4568_v22, %v4568_v22 }
0x1cce   : > { %v5491_v25 = vpop.f32.mrf.mxu0 }
0x1ccf   : > { %5509 = vmatmul.mubr.bf16.vlgmr.msra.gmra.mxu1 %v4569_v24 }
0x1d8f   : > { %v4675_v26 = vpop.f32.mrf.mxu1 }
0x1d90   : > { %v4676_v27 = vadd.f32 %v4994_v0, %v4675_v26 }
0x1d91   : > { %v5510_v5 = vpop.f32.mrf.mxu1 }
0x1d92   : > { %4681 = vst [vmem:[%s543_s20] sm:$0xff] %v4676_v27 }
0x1d93   : > { %v4678_v21 = vpop.f32.mrf.mxu1 }
0x1d94   : > { %5965 = shalt.err (!%p5962_p1)
}
0x1d95   : > { %s5966_s24 = scalar_lea.hbm %s7317_s30, 128  ;;  %s5970_s16 = scalar_lea.hbm %s7373_s15, 256 }
0x1d96   : > { %p5967_p3 = scmp.ne.s32.totalorder %s7317_s30, %s5966_s24  ;;  %p5971_p13 = scmp.lt.s32.totalorder %s7317_s30, %s7373_s15 }
0x1d97   : > { %p5972_p5 = scmp.lt.s32.totalorder %s5970_s16, %s5966_s24 }
0x1d98   : > { %p5968_p2 = pnand %p5967_p3, %p7400_p12 }
0x1d99   : > { %p5973_p6 = por %p5972_p5, %p5971_p13 }
0x1d9a   : > { %p5969_p9 = pneg %p5968_p2 }
0x1d9c   : > { %p5974_p10 = pnand %p5973_p6, %p5969_p9 }
0x1d9e   : > { %5977 = shalt.err (!%p5974_p10)
}
0x1d9f   : > { %5520 = dma.vmem_to_hbm [thread:$0]  (%p7400_p12), %s7319_s25, 128, %s7317_s30, %s4683_s17   ;;  %v5511_v32 = vpop.f32.mrf.mxu1 }
0x1da0 PF: > { %s7401_s18 = sld [smem:[#allocation11_spill]]  ;;  %p5537_p4 = scmp.ge.s32.totalorder %s6020_s21, 2 }
0x1da1   : > { %s7402_s29 = sld [smem:[#allocation15_spill]] }
0x1da6   : > { %s4708_s22 = sand.u32 1, %s7401_s18  }
0x1da7   : > { %p7403_p7 = scmp.ne.s32.totalorder %s7402_s29, 0  ;;  %s4709_s27 = scalar_lea.sflag [#allocation4], %s4708_s22 }
0x1da9   : > { %p5530_p8 = pnand %p5537_p4, %p7403_p7 }
0x1dab   : > { %p5531_p11 = pneg %p5530_p8 }
0x1dad   : > { %6003 = dma.done.wait (%p5531_p11), %s4709_s27, 128  }
0x1dae   : > { %6005 = vsyncadd (%p5531_p11), %s4709_s27, 4294967168  ;;  %s7404_s21 = sld [smem:[#allocation13_spill]]  ;;  %s7407_s18 = smov %s6012_s19 }
0x1daf   : > { %s7405_s5 = sld [smem:[#allocation12_spill]] }
0x1db0   : > { %s7406_s20 = sld [smem:[#allocation14_spill]] }
0x1db4   : > { %p27_p0 = scmp.ge.s32.totalorder %s7404_s21, 4  }
0x1db5   : > { %s7408_s19 = smov %s7405_s5 }
0x1db6   :  { %29 = sbr.rel (!%p27_p0) target bundleno = 8 (0x8), region = 146 }
0x1dbb   :  { %4714 = vsyncpa [#allocation3], 1 }
0x1dbc   :  { %4716 = vsyncpa [#allocation3 + $0x1], 1 }
0x1dbd   :  { %4717 = vsyncpa [#allocation6], 1 }
0x1dbe   :  { %4718 = vsyncpa [#allocation4], 1 }
0x1dbf   :  { %4720 = vsyncpa [#allocation4 + $0x1], 1 }

</bundles_post_ra>
